<compile_context>
chip_gen: v5e
topology: v5e:2x2
jax: 0.10.0
libtpu: 0.0.40
codegen_flags: <defaults>
</compile_context>

<pallas_src>
import jax
import jax.numpy as jnp
from jax import lax
from jax.experimental import pallas as pl
from jax.experimental.pallas import tpu as pltpu


def _round_up(x, m):
    return (x + m - 1) // m * m


def spectral_norm_weight(weight, u, eps=1e-12):
    """One power iteration, matching torch.nn.utils.spectral_norm defaults.

    Returns (normalized_weight, updated_u).  PyTorch updates the `u` buffer in
    place each forward; callers doing repeated forwards should carry the
    returned u (single-forward output is identical either way).
    """
    c_out = weight.shape[0]
    w_mat = weight.reshape(c_out, -1)
    v = w_mat.T @ u
    v = v / (jnp.linalg.norm(v) + eps)
    u_new = w_mat @ v
    u_new = u_new / (jnp.linalg.norm(u_new) + eps)
    sigma = u_new @ (w_mat @ v)
    return weight / sigma, u_new


def _make_band_conv_kernel(k, stride, w_p, w_out, tile_rows, out_dtype):
    """Kernel for one (batch, row-band) grid step.

    Ref shapes (leading batch/band dims squeezed away by the BlockSpecs):
      x_ref: (band_rows * w_p, c_in)     bf16, flattened padded-input band
      w_ref: (k*k, c_out, c_in)          bf16, spectral-normed weight
      b_ref: (c_out, 1)                  f32 bias
      o_ref: (c_out, tile_rows, w_out)   NCHW output block
    """
    # contraction over C_in: lhs (c_out, c_in) . rhs (m, c_in)^T -> (c_out, m)
    contract = (((1,), (1,)), ((), ()))

    if stride == 1:
        # Fast path: one big (C_out, m_flat) matmul per (kh, kw) over whole
        # flattened padded rows; the few "wrap" columns (w_out..w_p-1 of each
        # row) are junk and are skipped by the per-row stores below.
        m_flat = (tile_rows - 1) * w_p + w_out

        def kernel(x_ref, w_ref, b_ref, o_ref):
            c_out = w_ref.shape[1]
            acc = jnp.zeros((c_out, m_flat), jnp.float32)
            for kh in range(k):
                for kw in range(k):
                    x_slab = x_ref[pl.ds(kh * w_p + kw, m_flat), :]
                    acc = acc + lax.dot_general(
                        w_ref[kh * k + kw], x_slab, contract,
                        preferred_element_type=jnp.float32)
            acc = acc + b_ref[...]                       # (c_out, 1) broadcast
            for r in range(tile_rows):
                o_ref[:, r, :] = acc[:, r * w_p:r * w_p + w_out].astype(
                    out_dtype)

        return kernel

    # General-stride path: per-output-row matmuls with strided column gather.
    def kernel(x_ref, w_ref, b_ref, o_ref):
        c_out = w_ref.shape[1]

        def row(r, carry):
            acc = jnp.zeros((c_out, w_out), jnp.float32)
            for kh in range(k):
                for kw in range(k):
                    start = (r * stride + kh) * w_p + kw
                    xs = x_ref[pl.ds(start, w_out, stride), :]   # (w_out, c_in)
                    acc = acc + lax.dot_general(
                        w_ref[kh * k + kw], xs, contract,
                        preferred_element_type=jnp.float32)
            o_ref[:, r, :] = (acc + b_ref[...]).astype(out_dtype)
            return carry

        lax.fori_loop(0, tile_rows, row, 0)

    return kernel


def _pick_tiling(h_out, w_p, w_out, c_in, c_out, k, stride, max_tile_rows):
    """Generation-aware tile_rows / vmem_limit selection (v5e/v6e: 128 MiB,
    v7x: 64 MiB physical VMEM)."""
    try:
        vmem_cap = int(pltpu.get_tpu_info().vmem_capacity_bytes)
    except Exception:
        vmem_cap = 64 * 2**20            # conservative (v7x-sized) fallback
    vmem_limit = min(int(0.70 * vmem_cap), 96 * 2**20)

    lane = 128
    lane_cin = max(_round_up(c_in, lane), lane)
    lane_wout = max(_round_up(w_out, lane), lane)
    sub_cout = _round_up(c_out, 8)
    # per-output-row VMEM bytes: double-buffered bf16 input rows,
    # f32 accumulator columns, double-buffered f32 NCHW output rows
    per_row = (2 * stride * w_p * lane_cin * 2
               + sub_cout * w_p * 4
               + 2 * c_out * lane_wout * 4)
    fixed = (k * k * sub_cout * lane_cin * 2              # 1x-buffered weight
             + 2 * max(k - stride, 0) * w_p * lane_cin * 2  # band halo rows
             + 2 * 2**20)                                  # slack
    budget = max(vmem_limit - fixed, 4 * 2**20)
    tile_rows = int(max(8, min(max_tile_rows, budget // per_row)))

    if h_out <= tile_rows:
        tile_rows = h_out        # single band; block dim == full array dim
    else:
        tile_rows = max(8, (tile_rows // 8) * 8)   # sublane-aligned blocks
    n_bands = -(-h_out // tile_rows)
    return tile_rows, n_bands, vmem_limit


def conv_layer_forward(x, weight, bias, u, *, stride, padding=None,
                       out_dtype=jnp.float32, max_tile_rows=64):
    """ConvLayer.forward: ReflectionPad2d(padding) -> spectral_norm(Conv2d).

    x: (N, C_in, H, W) f32 NCHW.  weight: (C_out, C_in, K, K).  bias: (C_out,).
    u: (C_out,) spectral-norm power-iteration vector.
    Returns (N, C_out, H_out, W_out) NCHW (like PyTorch) in out_dtype.
    Reflection padding requires padding < H and padding < W.
    """
    n, c_in, h, w = x.shape
    c_out, _, k, _ = weight.shape
    if padding is None:
        padding = k // 2

    w_sn, _ = spectral_norm_weight(weight, u)

    # --- parameter / layout glue (plain JAX, single small bf16 intermediate) ---
    xp = jnp.pad(x, ((0, 0), (0, 0), (padding, padding), (padding, padding)),
                 mode="reflect")
    xp = jnp.transpose(xp, (0, 2, 3, 1)).astype(jnp.bfloat16)   # NHWC bf16
    h_p, w_p = h + 2 * padding, w + 2 * padding
    h_out = (h_p - k) // stride + 1
    w_out = (w_p - k) // stride + 1

    tile_rows, n_bands, vmem_limit = _pick_tiling(
        h_out, w_p, w_out, c_in, c_out, k, stride, max_tile_rows)
    h_out_p = n_bands * tile_rows
    band_rows = (tile_rows - 1) * stride + k
    band_len = band_rows * w_p

    # Overlapping row bands: only (k - stride) halo rows duplicated per band —
    # no K^2 im2col inflation and no extra f32 round trip.
    h_needed = (h_out_p - 1) * stride + k
    if h_needed > h_p:
        xp = jnp.pad(xp, ((0, 0), (0, h_needed - h_p), (0, 0), (0, 0)))
    row_idx = (jnp.arange(n_bands) * (tile_rows * stride))[:, None] \
        + jnp.arange(band_rows)[None, :]
    xb = jnp.take(xp, row_idx, axis=1)      # (N, n_bands, band_rows, W_p, C_in)
    xb = xb.reshape(n, n_bands, band_len, c_in)

    # weight as (K*K, C_out, C_in) so the kernel emits NCHW directly
    w_flat = jnp.transpose(w_sn, (2, 3, 0, 1)).reshape(k * k, c_out, c_in)
    w_flat = w_flat.astype(jnp.bfloat16)
    b_col = bias.reshape(c_out, 1).astype(jnp.float32)

    kernel = _make_band_conv_kernel(k, stride, w_p, w_out, tile_rows, out_dtype)

    x_spec = pl.BlockSpec((None, None, band_len, c_in),
                          lambda i, b: (i, b, 0, 0))
    b_spec = pl.BlockSpec((c_out, 1), lambda i, b: (0, 0))
    o_spec = pl.BlockSpec((None, c_out, tile_rows, w_out),
                          lambda i, b: (i, 0, b, 0))

    def _run(weight_spec):
        return pl.pallas_call(
            kernel,
            out_shape=jax.ShapeDtypeStruct((n, c_out, h_out_p, w_out),
                                           out_dtype),
            grid_spec=pltpu.PrefetchScalarGridSpec(
                num_scalar_prefetch=0,
                grid=(n, n_bands),
                in_specs=[x_spec, weight_spec, b_spec],
                out_specs=o_spec,
            ),
            compiler_params=pltpu.CompilerParams(
                dimension_semantics=("parallel", "parallel"),
                vmem_limit_bytes=vmem_limit),
        )(xb, w_flat, b_col)

    try:
        # Constant-index_map weight: single-buffer it so big layers don't hold
        # two weight copies in VMEM (matters on v7x's 64 MiB).
        out = _run(pl.BlockSpec((k * k, c_out, c_in), lambda i, b: (0, 0, 0),
                                pipeline_mode=pl.Buffered(1)))
    except Exception:
        out = _run(pl.BlockSpec((k * k, c_out, c_in), lambda i, b: (0, 0, 0)))

    if h_out_p != h_out:
        out = out[:, :, :h_out, :]
    return out


if __name__ == "__main__":
    key = jax.random.PRNGKey(0)
    k1, k2, k3, k4 = jax.random.split(key, 4)

    in_channels, out_channels, kernel_size, stride = 4, 8, 3, 1
    padding = kernel_size // 2   # ConvLayer default: padding = kernel_size // 2

    x = jax.random.normal(k1, (2, in_channels, 16, 16), dtype=jnp.float32)
    weight = 0.1 * jax.random.normal(
        k2, (out_channels, in_channels, kernel_size, kernel_size),
        dtype=jnp.float32)
    bias = 0.1 * jax.random.normal(k3, (out_channels,), dtype=jnp.float32)
    u0 = jax.random.normal(k4, (out_channels,), dtype=jnp.float32)
    u0 = u0 / (jnp.linalg.norm(u0) + 1e-12)

    # max_tile_rows=8 so the small test exercises the row-band tiling
    # (grid = (2 batches, 2 bands)).
    out = conv_layer_forward(x, weight, bias, u0, stride=stride,
                             padding=padding, max_tile_rows=8)
    out = jax.block_until_ready(out)

    # pure-JAX f32 reference (reflection pad + spectral-normed conv)
    w_sn_ref, _ = spectral_norm_weight(weight, u0)
    xp_ref = jnp.pad(x, ((0, 0), (0, 0), (padding, padding),
                         (padding, padding)), mode="reflect")
    ref = lax.conv_general_dilated(
        xp_ref, w_sn_ref, (stride, stride), "VALID",
        dimension_numbers=("NCHW", "OIHW", "NCHW")) + bias[None, :, None, None]

    assert out.shape == ref.shape, (out.shape, ref.shape)
    # bf16 MXU inputs with f32 accumulation: allow bf16-level rounding error.
    assert float(jnp.max(jnp.abs(out - ref))) < 5e-2
    print("KERNEL_OK")
</pallas_src>

<mosaic_0001>
module attributes {stable_mosaic.version = 11 : i64} {
  func.func @kernel(%arg0: i32, %arg1: i32, %arg2: memref<1x1x180x4xbf16, #tpu.memory_space<vmem>>, %arg3: memref<9x8x4xbf16, #tpu.memory_space<vmem>>, %arg4: memref<8x1xf32, #tpu.memory_space<vmem>>, %arg5: memref<1x8x8x16xf32, #tpu.memory_space<vmem>>) attributes {dimension_semantics = [#tpu.dimension_semantics<parallel>, #tpu.dimension_semantics<parallel>], iteration_bounds = array<i64: 2, 2>, scalar_prefetch = 0 : i64, scratch_operands = 0 : i64, tpu.core_type = #tpu.core_type<tc>, window_params = [{transform_indices = @transform_0, window_bounds = array<i64: 1, 1, 180, 4>}, {pipeline_mode = #tpu.pipeline_mode<synchronous>, transform_indices = @transform_1, window_bounds = array<i64: 9, 8, 4>}, {pipeline_mode = #tpu.pipeline_mode<synchronous>, transform_indices = @transform_2, window_bounds = array<i64: 8, 1>}, {transform_indices = @transform_3, window_bounds = array<i64: 1, 8, 8, 16>}]} {
    %cst = arith.constant 0.000000e+00 : f32
    %0 = vector.broadcast %cst : f32 to vector<8x142xf32>
    %c0 = arith.constant 0 : index
    %c0_0 = arith.constant 0 : index
    %c0_1 = arith.constant 0 : index
    %c0_2 = arith.constant 0 : index
    %1 = vector.load %arg2[%c0, %c0_0, %c0_1, %c0_2] : memref<1x1x180x4xbf16, #tpu.memory_space<vmem>>, vector<1x1x142x4xbf16>
    %2 = vector.shape_cast %1 : vector<1x1x142x4xbf16> to vector<142x4xbf16>
    %c0_3 = arith.constant 0 : index
    %c0_4 = arith.constant 0 : index
    %c0_5 = arith.constant 0 : index
    %3 = vector.load %arg3[%c0_3, %c0_4, %c0_5] : memref<9x8x4xbf16, #tpu.memory_space<vmem>>, vector<1x8x4xbf16>
    %4 = vector.shape_cast %3 : vector<1x8x4xbf16> to vector<8x4xbf16>
    %cst_6 = arith.constant dense<0.000000e+00> : vector<8x142xf32>
    %5 = tpu.matmul %4, %2, %cst_6 {dimension_numbers = #tpu.dot_dimension_numbers<[1], [1], [0], [0], [0, 0, 1, 0], [], []>} : vector<8x4xbf16>, vector<142x4xbf16>, vector<8x142xf32> -> vector<8x142xf32>
    %6 = arith.addf %0, %5 : vector<8x142xf32>
    %c0_7 = arith.constant 0 : index
    %c0_8 = arith.constant 0 : index
    %c1 = arith.constant 1 : index
    %c0_9 = arith.constant 0 : index
    %7 = vector.load %arg2[%c0_7, %c0_8, %c1, %c0_9] : memref<1x1x180x4xbf16, #tpu.memory_space<vmem>>, vector<1x1x142x4xbf16>
    %8 = vector.shape_cast %7 : vector<1x1x142x4xbf16> to vector<142x4xbf16>
    %c1_10 = arith.constant 1 : index
    %c0_11 = arith.constant 0 : index
    %c0_12 = arith.constant 0 : index
    %9 = vector.load %arg3[%c1_10, %c0_11, %c0_12] : memref<9x8x4xbf16, #tpu.memory_space<vmem>>, vector<1x8x4xbf16>
    %10 = vector.shape_cast %9 : vector<1x8x4xbf16> to vector<8x4xbf16>
    %cst_13 = arith.constant dense<0.000000e+00> : vector<8x142xf32>
    %11 = tpu.matmul %10, %8, %cst_13 {dimension_numbers = #tpu.dot_dimension_numbers<[1], [1], [0], [0], [0, 0, 1, 0], [], []>} : vector<8x4xbf16>, vector<142x4xbf16>, vector<8x142xf32> -> vector<8x142xf32>
    %12 = arith.addf %6, %11 : vector<8x142xf32>
    %c0_14 = arith.constant 0 : index
    %c0_15 = arith.constant 0 : index
    %c2 = arith.constant 2 : index
    %c0_16 = arith.constant 0 : index
    %13 = vector.load %arg2[%c0_14, %c0_15, %c2, %c0_16] : memref<1x1x180x4xbf16, #tpu.memory_space<vmem>>, vector<1x1x142x4xbf16>
    %14 = vector.shape_cast %13 : vector<1x1x142x4xbf16> to vector<142x4xbf16>
    %c2_17 = arith.constant 2 : index
    %c0_18 = arith.constant 0 : index
    %c0_19 = arith.constant 0 : index
    %15 = vector.load %arg3[%c2_17, %c0_18, %c0_19] : memref<9x8x4xbf16, #tpu.memory_space<vmem>>, vector<1x8x4xbf16>
    %16 = vector.shape_cast %15 : vector<1x8x4xbf16> to vector<8x4xbf16>
    %cst_20 = arith.constant dense<0.000000e+00> : vector<8x142xf32>
    %17 = tpu.matmul %16, %14, %cst_20 {dimension_numbers = #tpu.dot_dimension_numbers<[1], [1], [0], [0], [0, 0, 1, 0], [], []>} : vector<8x4xbf16>, vector<142x4xbf16>, vector<8x142xf32> -> vector<8x142xf32>
    %18 = arith.addf %12, %17 : vector<8x142xf32>
    %c0_21 = arith.constant 0 : index
    %c0_22 = arith.constant 0 : index
    %c18 = arith.constant 18 : index
    %c0_23 = arith.constant 0 : index
    %19 = vector.load %arg2[%c0_21, %c0_22, %c18, %c0_23] : memref<1x1x180x4xbf16, #tpu.memory_space<vmem>>, vector<1x1x142x4xbf16>
    %20 = vector.shape_cast %19 : vector<1x1x142x4xbf16> to vector<142x4xbf16>
    %c3 = arith.constant 3 : index
    %c0_24 = arith.constant 0 : index
    %c0_25 = arith.constant 0 : index
    %21 = vector.load %arg3[%c3, %c0_24, %c0_25] : memref<9x8x4xbf16, #tpu.memory_space<vmem>>, vector<1x8x4xbf16>
    %22 = vector.shape_cast %21 : vector<1x8x4xbf16> to vector<8x4xbf16>
    %cst_26 = arith.constant dense<0.000000e+00> : vector<8x142xf32>
    %23 = tpu.matmul %22, %20, %cst_26 {dimension_numbers = #tpu.dot_dimension_numbers<[1], [1], [0], [0], [0, 0, 1, 0], [], []>} : vector<8x4xbf16>, vector<142x4xbf16>, vector<8x142xf32> -> vector<8x142xf32>
    %24 = arith.addf %18, %23 : vector<8x142xf32>
    %c0_27 = arith.constant 0 : index
    %c0_28 = arith.constant 0 : index
    %c19 = arith.constant 19 : index
    %c0_29 = arith.constant 0 : index
    %25 = vector.load %arg2[%c0_27, %c0_28, %c19, %c0_29] : memref<1x1x180x4xbf16, #tpu.memory_space<vmem>>, vector<1x1x142x4xbf16>
    %26 = vector.shape_cast %25 : vector<1x1x142x4xbf16> to vector<142x4xbf16>
    %c4 = arith.constant 4 : index
    %c0_30 = arith.constant 0 : index
    %c0_31 = arith.constant 0 : index
    %27 = vector.load %arg3[%c4, %c0_30, %c0_31] : memref<9x8x4xbf16, #tpu.memory_space<vmem>>, vector<1x8x4xbf16>
    %28 = vector.shape_cast %27 : vector<1x8x4xbf16> to vector<8x4xbf16>
    %cst_32 = arith.constant dense<0.000000e+00> : vector<8x142xf32>
    %29 = tpu.matmul %28, %26, %cst_32 {dimension_numbers = #tpu.dot_dimension_numbers<[1], [1], [0], [0], [0, 0, 1, 0], [], []>} : vector<8x4xbf16>, vector<142x4xbf16>, vector<8x142xf32> -> vector<8x142xf32>
    %30 = arith.addf %24, %29 : vector<8x142xf32>
    %c0_33 = arith.constant 0 : index
    %c0_34 = arith.constant 0 : index
    %c20 = arith.constant 20 : index
    %c0_35 = arith.constant 0 : index
    %31 = vector.load %arg2[%c0_33, %c0_34, %c20, %c0_35] : memref<1x1x180x4xbf16, #tpu.memory_space<vmem>>, vector<1x1x142x4xbf16>
    %32 = vector.shape_cast %31 : vector<1x1x142x4xbf16> to vector<142x4xbf16>
    %c5 = arith.constant 5 : index
    %c0_36 = arith.constant 0 : index
    %c0_37 = arith.constant 0 : index
    %33 = vector.load %arg3[%c5, %c0_36, %c0_37] : memref<9x8x4xbf16, #tpu.memory_space<vmem>>, vector<1x8x4xbf16>
    %34 = vector.shape_cast %33 : vector<1x8x4xbf16> to vector<8x4xbf16>
    %cst_38 = arith.constant dense<0.000000e+00> : vector<8x142xf32>
    %35 = tpu.matmul %34, %32, %cst_38 {dimension_numbers = #tpu.dot_dimension_numbers<[1], [1], [0], [0], [0, 0, 1, 0], [], []>} : vector<8x4xbf16>, vector<142x4xbf16>, vector<8x142xf32> -> vector<8x142xf32>
    %36 = arith.addf %30, %35 : vector<8x142xf32>
    %c0_39 = arith.constant 0 : index
    %c0_40 = arith.constant 0 : index
    %c36 = arith.constant 36 : index
    %c0_41 = arith.constant 0 : index
    %37 = vector.load %arg2[%c0_39, %c0_40, %c36, %c0_41] : memref<1x1x180x4xbf16, #tpu.memory_space<vmem>>, vector<1x1x142x4xbf16>
    %38 = vector.shape_cast %37 : vector<1x1x142x4xbf16> to vector<142x4xbf16>
    %c6 = arith.constant 6 : index
    %c0_42 = arith.constant 0 : index
    %c0_43 = arith.constant 0 : index
    %39 = vector.load %arg3[%c6, %c0_42, %c0_43] : memref<9x8x4xbf16, #tpu.memory_space<vmem>>, vector<1x8x4xbf16>
    %40 = vector.shape_cast %39 : vector<1x8x4xbf16> to vector<8x4xbf16>
    %cst_44 = arith.constant dense<0.000000e+00> : vector<8x142xf32>
    %41 = tpu.matmul %40, %38, %cst_44 {dimension_numbers = #tpu.dot_dimension_numbers<[1], [1], [0], [0], [0, 0, 1, 0], [], []>} : vector<8x4xbf16>, vector<142x4xbf16>, vector<8x142xf32> -> vector<8x142xf32>
    %42 = arith.addf %36, %41 : vector<8x142xf32>
    %c0_45 = arith.constant 0 : index
    %c0_46 = arith.constant 0 : index
    %c37 = arith.constant 37 : index
    %c0_47 = arith.constant 0 : index
    %43 = vector.load %arg2[%c0_45, %c0_46, %c37, %c0_47] : memref<1x1x180x4xbf16, #tpu.memory_space<vmem>>, vector<1x1x142x4xbf16>
    %44 = vector.shape_cast %43 : vector<1x1x142x4xbf16> to vector<142x4xbf16>
    %c7 = arith.constant 7 : index
    %c0_48 = arith.constant 0 : index
    %c0_49 = arith.constant 0 : index
    %45 = vector.load %arg3[%c7, %c0_48, %c0_49] : memref<9x8x4xbf16, #tpu.memory_space<vmem>>, vector<1x8x4xbf16>
    %46 = vector.shape_cast %45 : vector<1x8x4xbf16> to vector<8x4xbf16>
    %cst_50 = arith.constant dense<0.000000e+00> : vector<8x142xf32>
    %47 = tpu.matmul %46, %44, %cst_50 {dimension_numbers = #tpu.dot_dimension_numbers<[1], [1], [0], [0], [0, 0, 1, 0], [], []>} : vector<8x4xbf16>, vector<142x4xbf16>, vector<8x142xf32> -> vector<8x142xf32>
    %48 = arith.addf %42, %47 : vector<8x142xf32>
    %c0_51 = arith.constant 0 : index
    %c0_52 = arith.constant 0 : index
    %c38 = arith.constant 38 : index
    %c0_53 = arith.constant 0 : index
    %49 = vector.load %arg2[%c0_51, %c0_52, %c38, %c0_53] : memref<1x1x180x4xbf16, #tpu.memory_space<vmem>>, vector<1x1x142x4xbf16>
    %50 = vector.shape_cast %49 : vector<1x1x142x4xbf16> to vector<142x4xbf16>
    %c8 = arith.constant 8 : index
    %c0_54 = arith.constant 0 : index
    %c0_55 = arith.constant 0 : index
    %51 = vector.load %arg3[%c8, %c0_54, %c0_55] : memref<9x8x4xbf16, #tpu.memory_space<vmem>>, vector<1x8x4xbf16>
    %52 = vector.shape_cast %51 : vector<1x8x4xbf16> to vector<8x4xbf16>
    %cst_56 = arith.constant dense<0.000000e+00> : vector<8x142xf32>
    %53 = tpu.matmul %52, %50, %cst_56 {dimension_numbers = #tpu.dot_dimension_numbers<[1], [1], [0], [0], [0, 0, 1, 0], [], []>} : vector<8x4xbf16>, vector<142x4xbf16>, vector<8x142xf32> -> vector<8x142xf32>
    %54 = arith.addf %48, %53 : vector<8x142xf32>
    %c0_57 = arith.constant 0 : index
    %c0_58 = arith.constant 0 : index
    %55 = vector.load %arg4[%c0_57, %c0_58] : memref<8x1xf32, #tpu.memory_space<vmem>>, vector<8x1xf32>
    %56 = vector.broadcast %55 : vector<8x1xf32> to vector<8x142xf32>
    %57 = arith.addf %54, %56 : vector<8x142xf32>
    %58 = vector.extract_strided_slice %57 {offsets = [0, 0], sizes = [8, 16], strides = [1, 1]} : vector<8x142xf32> to vector<8x16xf32>
    %c0_59 = arith.constant 0 : index
    %c0_60 = arith.constant 0 : index
    %c0_61 = arith.constant 0 : index
    %c0_62 = arith.constant 0 : index
    %59 = vector.load %arg5[%c0_59, %c0_60, %c0_61, %c0_62] : memref<1x8x8x16xf32, #tpu.memory_space<vmem>>, vector<1x8x1x16xf32>
    %60 = vector.shape_cast %59 : vector<1x8x1x16xf32> to vector<8x16xf32>
    %61 = vector.shape_cast %58 : vector<8x16xf32> to vector<1x8x1x16xf32>
    tpu.vector_store %arg5[%c0_59, %c0_60, %c0_61, %c0_62], %61 {strides = array<i32>} : memref<1x8x8x16xf32, #tpu.memory_space<vmem>>, vector<1x8x1x16xf32>,
    %62 = vector.extract_strided_slice %57 {offsets = [0, 18], sizes = [8, 16], strides = [1, 1]} : vector<8x142xf32> to vector<8x16xf32>
    %c0_63 = arith.constant 0 : index
    %c0_64 = arith.constant 0 : index
    %c1_65 = arith.constant 1 : index
    %c0_66 = arith.constant 0 : index
    %63 = vector.load %arg5[%c0_63, %c0_64, %c1_65, %c0_66] : memref<1x8x8x16xf32, #tpu.memory_space<vmem>>, vector<1x8x1x16xf32>
    %64 = vector.shape_cast %63 : vector<1x8x1x16xf32> to vector<8x16xf32>
    %65 = vector.shape_cast %62 : vector<8x16xf32> to vector<1x8x1x16xf32>
    tpu.vector_store %arg5[%c0_63, %c0_64, %c1_65, %c0_66], %65 {strides = array<i32>} : memref<1x8x8x16xf32, #tpu.memory_space<vmem>>, vector<1x8x1x16xf32>,
    %66 = vector.extract_strided_slice %57 {offsets = [0, 36], sizes = [8, 16], strides = [1, 1]} : vector<8x142xf32> to vector<8x16xf32>
    %c0_67 = arith.constant 0 : index
    %c0_68 = arith.constant 0 : index
    %c2_69 = arith.constant 2 : index
    %c0_70 = arith.constant 0 : index
    %67 = vector.load %arg5[%c0_67, %c0_68, %c2_69, %c0_70] : memref<1x8x8x16xf32, #tpu.memory_space<vmem>>, vector<1x8x1x16xf32>
    %68 = vector.shape_cast %67 : vector<1x8x1x16xf32> to vector<8x16xf32>
    %69 = vector.shape_cast %66 : vector<8x16xf32> to vector<1x8x1x16xf32>
    tpu.vector_store %arg5[%c0_67, %c0_68, %c2_69, %c0_70], %69 {strides = array<i32>} : memref<1x8x8x16xf32, #tpu.memory_space<vmem>>, vector<1x8x1x16xf32>,
    %70 = vector.extract_strided_slice %57 {offsets = [0, 54], sizes = [8, 16], strides = [1, 1]} : vector<8x142xf32> to vector<8x16xf32>
    %c0_71 = arith.constant 0 : index
    %c0_72 = arith.constant 0 : index
    %c3_73 = arith.constant 3 : index
    %c0_74 = arith.constant 0 : index
    %71 = vector.load %arg5[%c0_71, %c0_72, %c3_73, %c0_74] : memref<1x8x8x16xf32, #tpu.memory_space<vmem>>, vector<1x8x1x16xf32>
    %72 = vector.shape_cast %71 : vector<1x8x1x16xf32> to vector<8x16xf32>
    %73 = vector.shape_cast %70 : vector<8x16xf32> to vector<1x8x1x16xf32>
    tpu.vector_store %arg5[%c0_71, %c0_72, %c3_73, %c0_74], %73 {strides = array<i32>} : memref<1x8x8x16xf32, #tpu.memory_space<vmem>>, vector<1x8x1x16xf32>,
    %74 = vector.extract_strided_slice %57 {offsets = [0, 72], sizes = [8, 16], strides = [1, 1]} : vector<8x142xf32> to vector<8x16xf32>
    %c0_75 = arith.constant 0 : index
    %c0_76 = arith.constant 0 : index
    %c4_77 = arith.constant 4 : index
    %c0_78 = arith.constant 0 : index
    %75 = vector.load %arg5[%c0_75, %c0_76, %c4_77, %c0_78] : memref<1x8x8x16xf32, #tpu.memory_space<vmem>>, vector<1x8x1x16xf32>
    %76 = vector.shape_cast %75 : vector<1x8x1x16xf32> to vector<8x16xf32>
    %77 = vector.shape_cast %74 : vector<8x16xf32> to vector<1x8x1x16xf32>
    tpu.vector_store %arg5[%c0_75, %c0_76, %c4_77, %c0_78], %77 {strides = array<i32>} : memref<1x8x8x16xf32, #tpu.memory_space<vmem>>, vector<1x8x1x16xf32>,
    %78 = vector.extract_strided_slice %57 {offsets = [0, 90], sizes = [8, 16], strides = [1, 1]} : vector<8x142xf32> to vector<8x16xf32>
    %c0_79 = arith.constant 0 : index
    %c0_80 = arith.constant 0 : index
    %c5_81 = arith.constant 5 : index
    %c0_82 = arith.constant 0 : index
    %79 = vector.load %arg5[%c0_79, %c0_80, %c5_81, %c0_82] : memref<1x8x8x16xf32, #tpu.memory_space<vmem>>, vector<1x8x1x16xf32>
    %80 = vector.shape_cast %79 : vector<1x8x1x16xf32> to vector<8x16xf32>
    %81 = vector.shape_cast %78 : vector<8x16xf32> to vector<1x8x1x16xf32>
    tpu.vector_store %arg5[%c0_79, %c0_80, %c5_81, %c0_82], %81 {strides = array<i32>} : memref<1x8x8x16xf32, #tpu.memory_space<vmem>>, vector<1x8x1x16xf32>,
    %82 = vector.extract_strided_slice %57 {offsets = [0, 108], sizes = [8, 16], strides = [1, 1]} : vector<8x142xf32> to vector<8x16xf32>
    %c0_83 = arith.constant 0 : index
    %c0_84 = arith.constant 0 : index
    %c6_85 = arith.constant 6 : index
    %c0_86 = arith.constant 0 : index
    %83 = vector.load %arg5[%c0_83, %c0_84, %c6_85, %c0_86] : memref<1x8x8x16xf32, #tpu.memory_space<vmem>>, vector<1x8x1x16xf32>
    %84 = vector.shape_cast %83 : vector<1x8x1x16xf32> to vector<8x16xf32>
    %85 = vector.shape_cast %82 : vector<8x16xf32> to vector<1x8x1x16xf32>
    tpu.vector_store %arg5[%c0_83, %c0_84, %c6_85, %c0_86], %85 {strides = array<i32>} : memref<1x8x8x16xf32, #tpu.memory_space<vmem>>, vector<1x8x1x16xf32>,
    %86 = vector.extract_strided_slice %57 {offsets = [0, 126], sizes = [8, 16], strides = [1, 1]} : vector<8x142xf32> to vector<8x16xf32>
    %c0_87 = arith.constant 0 : index
    %c0_88 = arith.constant 0 : index
    %c7_89 = arith.constant 7 : index
    %c0_90 = arith.constant 0 : index
    %87 = vector.load %arg5[%c0_87, %c0_88, %c7_89, %c0_90] : memref<1x8x8x16xf32, #tpu.memory_space<vmem>>, vector<1x8x1x16xf32>
    %88 = vector.shape_cast %87 : vector<1x8x1x16xf32> to vector<8x16xf32>
    %89 = vector.shape_cast %86 : vector<8x16xf32> to vector<1x8x1x16xf32>
    tpu.vector_store %arg5[%c0_87, %c0_88, %c7_89, %c0_90], %89 {strides = array<i32>} : memref<1x8x8x16xf32, #tpu.memory_space<vmem>>, vector<1x8x1x16xf32>,
    return
  }
  func.func @transform_0(%arg0: i32, %arg1: i32) -> (i32, i32, i32, i32) {
    %c0_i32 = arith.constant 0 : i32
    %c0_i32_0 = arith.constant 0 : i32
    %c0_i32_1 = arith.constant 0 : i32
    return %arg0, %arg1, %c0_i32, %c0_i32_0 : i32, i32, i32, i32
  }
  func.func @transform_1(%arg0: i32, %arg1: i32) -> (i32, i32, i32) {
    %c0_i32 = arith.constant 0 : i32
    %c0_i32_0 = arith.constant 0 : i32
    %c0_i32_1 = arith.constant 0 : i32
    %c0_i32_2 = arith.constant 0 : i32
    return %c0_i32, %c0_i32_0, %c0_i32_1 : i32, i32, i32
  }
  func.func @transform_2(%arg0: i32, %arg1: i32) -> (i32, i32) {
    %c0_i32 = arith.constant 0 : i32
    %c0_i32_0 = arith.constant 0 : i32
    %c0_i32_1 = arith.constant 0 : i32
    return %c0_i32, %c0_i32_0 : i32, i32
  }
  func.func @transform_3(%arg0: i32, %arg1: i32) -> (i32, i32, i32, i32) {
    %c0_i32 = arith.constant 0 : i32
    %c0_i32_0 = arith.constant 0 : i32
    %c0_i32_1 = arith.constant 0 : i32
    return %arg0, %c0_i32, %arg1, %c0_i32_0 : i32, i32, i32, i32
  }
}

module attributes {stable_mosaic.version = 11 : i64} {
  func.func @kernel(%arg0: i32, %arg1: i32, %arg2: memref<1x1x180x4xbf16, #tpu.memory_space<vmem>>, %arg3: memref<9x8x4xbf16, #tpu.memory_space<vmem>>, %arg4: memref<8x1xf32, #tpu.memory_space<vmem>>, %arg5: memref<1x8x8x16xf32, #tpu.memory_space<vmem>>) attributes {dimension_semantics = [#tpu.dimension_semantics<parallel>, #tpu.dimension_semantics<parallel>], iteration_bounds = array<i64: 2, 2>, scalar_prefetch = 0 : i64, scratch_operands = 0 : i64, tpu.core_type = #tpu.core_type<tc>, window_params = [{transform_indices = @transform_0, window_bounds = array<i64: 1, 1, 180, 4>}, {pipeline_mode = #tpu.pipeline_mode<synchronous>, transform_indices = @transform_1, window_bounds = array<i64: 9, 8, 4>}, {pipeline_mode = #tpu.pipeline_mode<synchronous>, transform_indices = @transform_2, window_bounds = array<i64: 8, 1>}, {transform_indices = @transform_3, window_bounds = array<i64: 1, 8, 8, 16>}]} {
    %cst = arith.constant 0.000000e+00 : f32
    %0 = vector.broadcast %cst : f32 to vector<8x142xf32>
    %c0 = arith.constant 0 : index
    %c0_0 = arith.constant 0 : index
    %c0_1 = arith.constant 0 : index
    %c0_2 = arith.constant 0 : index
    %1 = vector.load %arg2[%c0, %c0_0, %c0_1, %c0_2] : memref<1x1x180x4xbf16, #tpu.memory_space<vmem>>, vector<1x1x142x4xbf16>
    %2 = vector.shape_cast %1 : vector<1x1x142x4xbf16> to vector<142x4xbf16>
    %c0_3 = arith.constant 0 : index
    %c0_4 = arith.constant 0 : index
    %c0_5 = arith.constant 0 : index
    %3 = vector.load %arg3[%c0_3, %c0_4, %c0_5] : memref<9x8x4xbf16, #tpu.memory_space<vmem>>, vector<1x8x4xbf16>
    %4 = vector.shape_cast %3 : vector<1x8x4xbf16> to vector<8x4xbf16>
    %cst_6 = arith.constant dense<0.000000e+00> : vector<8x142xf32>
    %5 = tpu.matmul %4, %2, %cst_6 {dimension_numbers = #tpu.dot_dimension_numbers<[1], [1], [0], [0], [0, 0, 1, 0], [], []>} : vector<8x4xbf16>, vector<142x4xbf16>, vector<8x142xf32> -> vector<8x142xf32>
    %6 = arith.addf %0, %5 : vector<8x142xf32>
    %c0_7 = arith.constant 0 : index
    %c0_8 = arith.constant 0 : index
    %c1 = arith.constant 1 : index
    %c0_9 = arith.constant 0 : index
    %7 = vector.load %arg2[%c0_7, %c0_8, %c1, %c0_9] : memref<1x1x180x4xbf16, #tpu.memory_space<vmem>>, vector<1x1x142x4xbf16>
    %8 = vector.shape_cast %7 : vector<1x1x142x4xbf16> to vector<142x4xbf16>
    %c1_10 = arith.constant 1 : index
    %c0_11 = arith.constant 0 : index
    %c0_12 = arith.constant 0 : index
    %9 = vector.load %arg3[%c1_10, %c0_11, %c0_12] : memref<9x8x4xbf16, #tpu.memory_space<vmem>>, vector<1x8x4xbf16>
    %10 = vector.shape_cast %9 : vector<1x8x4xbf16> to vector<8x4xbf16>
    %cst_13 = arith.constant dense<0.000000e+00> : vector<8x142xf32>
    %11 = tpu.matmul %10, %8, %cst_13 {dimension_numbers = #tpu.dot_dimension_numbers<[1], [1], [0], [0], [0, 0, 1, 0], [], []>} : vector<8x4xbf16>, vector<142x4xbf16>, vector<8x142xf32> -> vector<8x142xf32>
    %12 = arith.addf %6, %11 : vector<8x142xf32>
    %c0_14 = arith.constant 0 : index
    %c0_15 = arith.constant 0 : index
    %c2 = arith.constant 2 : index
    %c0_16 = arith.constant 0 : index
    %13 = vector.load %arg2[%c0_14, %c0_15, %c2, %c0_16] : memref<1x1x180x4xbf16, #tpu.memory_space<vmem>>, vector<1x1x142x4xbf16>
    %14 = vector.shape_cast %13 : vector<1x1x142x4xbf16> to vector<142x4xbf16>
    %c2_17 = arith.constant 2 : index
    %c0_18 = arith.constant 0 : index
    %c0_19 = arith.constant 0 : index
    %15 = vector.load %arg3[%c2_17, %c0_18, %c0_19] : memref<9x8x4xbf16, #tpu.memory_space<vmem>>, vector<1x8x4xbf16>
    %16 = vector.shape_cast %15 : vector<1x8x4xbf16> to vector<8x4xbf16>
    %cst_20 = arith.constant dense<0.000000e+00> : vector<8x142xf32>
    %17 = tpu.matmul %16, %14, %cst_20 {dimension_numbers = #tpu.dot_dimension_numbers<[1], [1], [0], [0], [0, 0, 1, 0], [], []>} : vector<8x4xbf16>, vector<142x4xbf16>, vector<8x142xf32> -> vector<8x142xf32>
    %18 = arith.addf %12, %17 : vector<8x142xf32>
    %c0_21 = arith.constant 0 : index
    %c0_22 = arith.constant 0 : index
    %c18 = arith.constant 18 : index
    %c0_23 = arith.constant 0 : index
    %19 = vector.load %arg2[%c0_21, %c0_22, %c18, %c0_23] : memref<1x1x180x4xbf16, #tpu.memory_space<vmem>>, vector<1x1x142x4xbf16>
    %20 = vector.shape_cast %19 : vector<1x1x142x4xbf16> to vector<142x4xbf16>
    %c3 = arith.constant 3 : index
    %c0_24 = arith.constant 0 : index
    %c0_25 = arith.constant 0 : index
    %21 = vector.load %arg3[%c3, %c0_24, %c0_25] : memref<9x8x4xbf16, #tpu.memory_space<vmem>>, vector<1x8x4xbf16>
    %22 = vector.shape_cast %21 : vector<1x8x4xbf16> to vector<8x4xbf16>
    %cst_26 = arith.constant dense<0.000000e+00> : vector<8x142xf32>
    %23 = tpu.matmul %22, %20, %cst_26 {dimension_numbers = #tpu.dot_dimension_numbers<[1], [1], [0], [0], [0, 0, 1, 0], [], []>} : vector<8x4xbf16>, vector<142x4xbf16>, vector<8x142xf32> -> vector<8x142xf32>
    %24 = arith.addf %18, %23 : vector<8x142xf32>
    %c0_27 = arith.constant 0 : index
    %c0_28 = arith.constant 0 : index
    %c19 = arith.constant 19 : index
    %c0_29 = arith.constant 0 : index
    %25 = vector.load %arg2[%c0_27, %c0_28, %c19, %c0_29] : memref<1x1x180x4xbf16, #tpu.memory_space<vmem>>, vector<1x1x142x4xbf16>
    %26 = vector.shape_cast %25 : vector<1x1x142x4xbf16> to vector<142x4xbf16>
    %c4 = arith.constant 4 : index
    %c0_30 = arith.constant 0 : index
    %c0_31 = arith.constant 0 : index
    %27 = vector.load %arg3[%c4, %c0_30, %c0_31] : memref<9x8x4xbf16, #tpu.memory_space<vmem>>, vector<1x8x4xbf16>
    %28 = vector.shape_cast %27 : vector<1x8x4xbf16> to vector<8x4xbf16>
    %cst_32 = arith.constant dense<0.000000e+00> : vector<8x142xf32>
    %29 = tpu.matmul %28, %26, %cst_32 {dimension_numbers = #tpu.dot_dimension_numbers<[1], [1], [0], [0], [0, 0, 1, 0], [], []>} : vector<8x4xbf16>, vector<142x4xbf16>, vector<8x142xf32> -> vector<8x142xf32>
    %30 = arith.addf %24, %29 : vector<8x142xf32>
    %c0_33 = arith.constant 0 : index
    %c0_34 = arith.constant 0 : index
    %c20 = arith.constant 20 : index
    %c0_35 = arith.constant 0 : index
    %31 = vector.load %arg2[%c0_33, %c0_34, %c20, %c0_35] : memref<1x1x180x4xbf16, #tpu.memory_space<vmem>>, vector<1x1x142x4xbf16>
    %32 = vector.shape_cast %31 : vector<1x1x142x4xbf16> to vector<142x4xbf16>
    %c5 = arith.constant 5 : index
    %c0_36 = arith.constant 0 : index
    %c0_37 = arith.constant 0 : index
    %33 = vector.load %arg3[%c5, %c0_36, %c0_37] : memref<9x8x4xbf16, #tpu.memory_space<vmem>>, vector<1x8x4xbf16>
    %34 = vector.shape_cast %33 : vector<1x8x4xbf16> to vector<8x4xbf16>
    %cst_38 = arith.constant dense<0.000000e+00> : vector<8x142xf32>
    %35 = tpu.matmul %34, %32, %cst_38 {dimension_numbers = #tpu.dot_dimension_numbers<[1], [1], [0], [0], [0, 0, 1, 0], [], []>} : vector<8x4xbf16>, vector<142x4xbf16>, vector<8x142xf32> -> vector<8x142xf32>
    %36 = arith.addf %30, %35 : vector<8x142xf32>
    %c0_39 = arith.constant 0 : index
    %c0_40 = arith.constant 0 : index
    %c36 = arith.constant 36 : index
    %c0_41 = arith.constant 0 : index
    %37 = vector.load %arg2[%c0_39, %c0_40, %c36, %c0_41] : memref<1x1x180x4xbf16, #tpu.memory_space<vmem>>, vector<1x1x142x4xbf16>
    %38 = vector.shape_cast %37 : vector<1x1x142x4xbf16> to vector<142x4xbf16>
    %c6 = arith.constant 6 : index
    %c0_42 = arith.constant 0 : index
    %c0_43 = arith.constant 0 : index
    %39 = vector.load %arg3[%c6, %c0_42, %c0_43] : memref<9x8x4xbf16, #tpu.memory_space<vmem>>, vector<1x8x4xbf16>
    %40 = vector.shape_cast %39 : vector<1x8x4xbf16> to vector<8x4xbf16>
    %cst_44 = arith.constant dense<0.000000e+00> : vector<8x142xf32>
    %41 = tpu.matmul %40, %38, %cst_44 {dimension_numbers = #tpu.dot_dimension_numbers<[1], [1], [0], [0], [0, 0, 1, 0], [], []>} : vector<8x4xbf16>, vector<142x4xbf16>, vector<8x142xf32> -> vector<8x142xf32>
    %42 = arith.addf %36, %41 : vector<8x142xf32>
    %c0_45 = arith.constant 0 : index
    %c0_46 = arith.constant 0 : index
    %c37 = arith.constant 37 : index
    %c0_47 = arith.constant 0 : index
    %43 = vector.load %arg2[%c0_45, %c0_46, %c37, %c0_47] : memref<1x1x180x4xbf16, #tpu.memory_space<vmem>>, vector<1x1x142x4xbf16>
    %44 = vector.shape_cast %43 : vector<1x1x142x4xbf16> to vector<142x4xbf16>
    %c7 = arith.constant 7 : index
    %c0_48 = arith.constant 0 : index
    %c0_49 = arith.constant 0 : index
    %45 = vector.load %arg3[%c7, %c0_48, %c0_49] : memref<9x8x4xbf16, #tpu.memory_space<vmem>>, vector<1x8x4xbf16>
    %46 = vector.shape_cast %45 : vector<1x8x4xbf16> to vector<8x4xbf16>
    %cst_50 = arith.constant dense<0.000000e+00> : vector<8x142xf32>
    %47 = tpu.matmul %46, %44, %cst_50 {dimension_numbers = #tpu.dot_dimension_numbers<[1], [1], [0], [0], [0, 0, 1, 0], [], []>} : vector<8x4xbf16>, vector<142x4xbf16>, vector<8x142xf32> -> vector<8x142xf32>
    %48 = arith.addf %42, %47 : vector<8x142xf32>
    %c0_51 = arith.constant 0 : index
    %c0_52 = arith.constant 0 : index
    %c38 = arith.constant 38 : index
    %c0_53 = arith.constant 0 : index
    %49 = vector.load %arg2[%c0_51, %c0_52, %c38, %c0_53] : memref<1x1x180x4xbf16, #tpu.memory_space<vmem>>, vector<1x1x142x4xbf16>
    %50 = vector.shape_cast %49 : vector<1x1x142x4xbf16> to vector<142x4xbf16>
    %c8 = arith.constant 8 : index
    %c0_54 = arith.constant 0 : index
    %c0_55 = arith.constant 0 : index
    %51 = vector.load %arg3[%c8, %c0_54, %c0_55] : memref<9x8x4xbf16, #tpu.memory_space<vmem>>, vector<1x8x4xbf16>
    %52 = vector.shape_cast %51 : vector<1x8x4xbf16> to vector<8x4xbf16>
    %cst_56 = arith.constant dense<0.000000e+00> : vector<8x142xf32>
    %53 = tpu.matmul %52, %50, %cst_56 {dimension_numbers = #tpu.dot_dimension_numbers<[1], [1], [0], [0], [0, 0, 1, 0], [], []>} : vector<8x4xbf16>, vector<142x4xbf16>, vector<8x142xf32> -> vector<8x142xf32>
    %54 = arith.addf %48, %53 : vector<8x142xf32>
    %c0_57 = arith.constant 0 : index
    %c0_58 = arith.constant 0 : index
    %55 = vector.load %arg4[%c0_57, %c0_58] : memref<8x1xf32, #tpu.memory_space<vmem>>, vector<8x1xf32>
    %56 = vector.broadcast %55 : vector<8x1xf32> to vector<8x142xf32>
    %57 = arith.addf %54, %56 : vector<8x142xf32>
    %58 = vector.extract_strided_slice %57 {offsets = [0, 0], sizes = [8, 16], strides = [1, 1]} : vector<8x142xf32> to vector<8x16xf32>
    %c0_59 = arith.constant 0 : index
    %c0_60 = arith.constant 0 : index
    %c0_61 = arith.constant 0 : index
    %c0_62 = arith.constant 0 : index
    %59 = vector.load %arg5[%c0_59, %c0_60, %c0_61, %c0_62] : memref<1x8x8x16xf32, #tpu.memory_space<vmem>>, vector<1x8x1x16xf32>
    %60 = vector.shape_cast %59 : vector<1x8x1x16xf32> to vector<8x16xf32>
    %61 = vector.shape_cast %58 : vector<8x16xf32> to vector<1x8x1x16xf32>
    tpu.vector_store %arg5[%c0_59, %c0_60, %c0_61, %c0_62], %61 {strides = array<i32>} : memref<1x8x8x16xf32, #tpu.memory_space<vmem>>, vector<1x8x1x16xf32>,
    %62 = vector.extract_strided_slice %57 {offsets = [0, 18], sizes = [8, 16], strides = [1, 1]} : vector<8x142xf32> to vector<8x16xf32>
    %c0_63 = arith.constant 0 : index
    %c0_64 = arith.constant 0 : index
    %c1_65 = arith.constant 1 : index
    %c0_66 = arith.constant 0 : index
    %63 = vector.load %arg5[%c0_63, %c0_64, %c1_65, %c0_66] : memref<1x8x8x16xf32, #tpu.memory_space<vmem>>, vector<1x8x1x16xf32>
    %64 = vector.shape_cast %63 : vector<1x8x1x16xf32> to vector<8x16xf32>
    %65 = vector.shape_cast %62 : vector<8x16xf32> to vector<1x8x1x16xf32>
    tpu.vector_store %arg5[%c0_63, %c0_64, %c1_65, %c0_66], %65 {strides = array<i32>} : memref<1x8x8x16xf32, #tpu.memory_space<vmem>>, vector<1x8x1x16xf32>,
    %66 = vector.extract_strided_slice %57 {offsets = [0, 36], sizes = [8, 16], strides = [1, 1]} : vector<8x142xf32> to vector<8x16xf32>
    %c0_67 = arith.constant 0 : index
    %c0_68 = arith.constant 0 : index
    %c2_69 = arith.constant 2 : index
    %c0_70 = arith.constant 0 : index
    %67 = vector.load %arg5[%c0_67, %c0_68, %c2_69, %c0_70] : memref<1x8x8x16xf32, #tpu.memory_space<vmem>>, vector<1x8x1x16xf32>
    %68 = vector.shape_cast %67 : vector<1x8x1x16xf32> to vector<8x16xf32>
    %69 = vector.shape_cast %66 : vector<8x16xf32> to vector<1x8x1x16xf32>
    tpu.vector_store %arg5[%c0_67, %c0_68, %c2_69, %c0_70], %69 {strides = array<i32>} : memref<1x8x8x16xf32, #tpu.memory_space<vmem>>, vector<1x8x1x16xf32>,
    %70 = vector.extract_strided_slice %57 {offsets = [0, 54], sizes = [8, 16], strides = [1, 1]} : vector<8x142xf32> to vector<8x16xf32>
    %c0_71 = arith.constant 0 : index
    %c0_72 = arith.constant 0 : index
    %c3_73 = arith.constant 3 : index
    %c0_74 = arith.constant 0 : index
    %71 = vector.load %arg5[%c0_71, %c0_72, %c3_73, %c0_74] : memref<1x8x8x16xf32, #tpu.memory_space<vmem>>, vector<1x8x1x16xf32>
    %72 = vector.shape_cast %71 : vector<1x8x1x16xf32> to vector<8x16xf32>
    %73 = vector.shape_cast %70 : vector<8x16xf32> to vector<1x8x1x16xf32>
    tpu.vector_store %arg5[%c0_71, %c0_72, %c3_73, %c0_74], %73 {strides = array<i32>} : memref<1x8x8x16xf32, #tpu.memory_space<vmem>>, vector<1x8x1x16xf32>,
    %74 = vector.extract_strided_slice %57 {offsets = [0, 72], sizes = [8, 16], strides = [1, 1]} : vector<8x142xf32> to vector<8x16xf32>
    %c0_75 = arith.constant 0 : index
    %c0_76 = arith.constant 0 : index
    %c4_77 = arith.constant 4 : index
    %c0_78 = arith.constant 0 : index
    %75 = vector.load %arg5[%c0_75, %c0_76, %c4_77, %c0_78] : memref<1x8x8x16xf32, #tpu.memory_space<vmem>>, vector<1x8x1x16xf32>
    %76 = vector.shape_cast %75 : vector<1x8x1x16xf32> to vector<8x16xf32>
    %77 = vector.shape_cast %74 : vector<8x16xf32> to vector<1x8x1x16xf32>
    tpu.vector_store %arg5[%c0_75, %c0_76, %c4_77, %c0_78], %77 {strides = array<i32>} : memref<1x8x8x16xf32, #tpu.memory_space<vmem>>, vector<1x8x1x16xf32>,
    %78 = vector.extract_strided_slice %57 {offsets = [0, 90], sizes = [8, 16], strides = [1, 1]} : vector<8x142xf32> to vector<8x16xf32>
    %c0_79 = arith.constant 0 : index
    %c0_80 = arith.constant 0 : index
    %c5_81 = arith.constant 5 : index
    %c0_82 = arith.constant 0 : index
    %79 = vector.load %arg5[%c0_79, %c0_80, %c5_81, %c0_82] : memref<1x8x8x16xf32, #tpu.memory_space<vmem>>, vector<1x8x1x16xf32>
    %80 = vector.shape_cast %79 : vector<1x8x1x16xf32> to vector<8x16xf32>
    %81 = vector.shape_cast %78 : vector<8x16xf32> to vector<1x8x1x16xf32>
    tpu.vector_store %arg5[%c0_79, %c0_80, %c5_81, %c0_82], %81 {strides = array<i32>} : memref<1x8x8x16xf32, #tpu.memory_space<vmem>>, vector<1x8x1x16xf32>,
    %82 = vector.extract_strided_slice %57 {offsets = [0, 108], sizes = [8, 16], strides = [1, 1]} : vector<8x142xf32> to vector<8x16xf32>
    %c0_83 = arith.constant 0 : index
    %c0_84 = arith.constant 0 : index
    %c6_85 = arith.constant 6 : index
    %c0_86 = arith.constant 0 : index
    %83 = vector.load %arg5[%c0_83, %c0_84, %c6_85, %c0_86] : memref<1x8x8x16xf32, #tpu.memory_space<vmem>>, vector<1x8x1x16xf32>
    %84 = vector.shape_cast %83 : vector<1x8x1x16xf32> to vector<8x16xf32>
    %85 = vector.shape_cast %82 : vector<8x16xf32> to vector<1x8x1x16xf32>
    tpu.vector_store %arg5[%c0_83, %c0_84, %c6_85, %c0_86], %85 {strides = array<i32>} : memref<1x8x8x16xf32, #tpu.memory_space<vmem>>, vector<1x8x1x16xf32>,
    %86 = vector.extract_strided_slice %57 {offsets = [0, 126], sizes = [8, 16], strides = [1, 1]} : vector<8x142xf32> to vector<8x16xf32>
    %c0_87 = arith.constant 0 : index
    %c0_88 = arith.constant 0 : index
    %c7_89 = arith.constant 7 : index
    %c0_90 = arith.constant 0 : index
    %87 = vector.load %arg5[%c0_87, %c0_88, %c7_89, %c0_90] : memref<1x8x8x16xf32, #tpu.memory_space<vmem>>, vector<1x8x1x16xf32>
    %88 = vector.shape_cast %87 : vector<1x8x1x16xf32> to vector<8x16xf32>
    %89 = vector.shape_cast %86 : vector<8x16xf32> to vector<1x8x1x16xf32>
    tpu.vector_store %arg5[%c0_87, %c0_88, %c7_89, %c0_90], %89 {strides = array<i32>} : memref<1x8x8x16xf32, #tpu.memory_space<vmem>>, vector<1x8x1x16xf32>,
    return
  }
  func.func @transform_0(%arg0: i32, %arg1: i32) -> (i32, i32, i32, i32) {
    %c0_i32 = arith.constant 0 : i32
    %c0_i32_0 = arith.constant 0 : i32
    %c0_i32_1 = arith.constant 0 : i32
    return %arg0, %arg1, %c0_i32, %c0_i32_0 : i32, i32, i32, i32
  }
  func.func @transform_1(%arg0: i32, %arg1: i32) -> (i32, i32, i32) {
    %c0_i32 = arith.constant 0 : i32
    %c0_i32_0 = arith.constant 0 : i32
    %c0_i32_1 = arith.constant 0 : i32
    %c0_i32_2 = arith.constant 0 : i32
    return %c0_i32, %c0_i32_0, %c0_i32_1 : i32, i32, i32
  }
  func.func @transform_2(%arg0: i32, %arg1: i32) -> (i32, i32) {
    %c0_i32 = arith.constant 0 : i32
    %c0_i32_0 = arith.constant 0 : i32
    %c0_i32_1 = arith.constant 0 : i32
    return %c0_i32, %c0_i32_0 : i32, i32
  }
  func.func @transform_3(%arg0: i32, %arg1: i32) -> (i32, i32, i32, i32) {
    %c0_i32 = arith.constant 0 : i32
    %c0_i32_0 = arith.constant 0 : i32
    %c0_i32_1 = arith.constant 0 : i32
    return %arg0, %c0_i32, %arg1, %c0_i32_0 : i32, i32, i32, i32
  }
}

</mosaic_0001>

<bundles_post_ra>
// kernel: tpu_custom_call.1
= control target key start
LH: loop header
LB: loop body
LE: loop exit
PB: predicated region body
PF: predicated region fallthrough
CT: control target
= control target key end

     0   :  { %8 = vsyncpa [#allocation3], 0  ;;  %s3011_s0 = inlined_call_operand.vmem [shape: bf16[2,2,180,4], index: 0, kind: input, shape index: {}]   ;;  %s3012_s1 = inlined_call_operand.vmem [shape: bf16[9,8,4], index: 1, kind: input, shape index: {}]   ;;  %s3013_s2 = inlined_call_operand.vmem [shape: f32[8,1], index: 2, kind: input, shape index: {}]   ;;  %s3014_s3 = inlined_call_operand.hbm [shape: f32[2,8,16,16], index: 3, kind: output, shape index: {}]  }
   0x1   :  { %10 = vsyncpa [#allocation3 + $0x1], 0  ;;  %s2206_s12 = smov 0   ;;  %s2208_s13 = smov 0  }
   0x2   :  { %s2210_s14 = smov 0   ;;  %s2212_s15 = smov 0  }
   0x3   :  { %s2214_s16 = smov 0   ;;  %s2216_s17 = smov 0  }
   0x4   :  { %s2218_s18 = smov 0   ;;  %s2220_s19 = smov 0  }
   0x5 LB: > { %s1779_s20 = sadd.s32 4294967295, %s2173_s19   ;;  %s1780_s21 = sadd.s32 4294967294, %s2173_s19   ;;  %s2173_s19 = sphi %s2220_s19, %s16_s19   ;;  %s2169_s18 = sphi %s2218_s18, %s3023_s18   ;;  %s2165_s17 = sphi %s2216_s17, %s3022_s17   ;;  %s2161_s16 = sphi %s2214_s16, %s3021_s16   ;;  %s2157_s15 = sphi %s2212_s15, %s3020_s15   ;;  %s2153_s14 = sphi %s2210_s14, %s3019_s14   ;;  %s2149_s13 = sphi %s2208_s13, %s3018_s13   ;;  %s2145_s12 = sphi %s2206_s12, %s3017_s12  }
   0x6   : > { %s25_s22 = sadd.s32 1, %s2165_s17  ;;  %s28_s23 = sadd.s32 1, %s2169_s18 }
   0x7   : > { %p26_p0 = scmp.ge.s32.totalorder %s25_s22, 2  ;;  %p117_p1 = scmp.ne.s32.totalorder %s2153_s14, %s2149_s13 }
   0x8   : > { %p118_p2 = scmp.eq.s32.totalorder %s1779_s20, 3  ;;  %p123_p5 = scmp.ne.s32.totalorder %s2149_s13, %s2145_s12 }
   0x9   : > { %s3025_s22 = smov (%p26_p0, %s25_s22), 0  ;;  %s3027_s23 = smov (!%p26_p0, %s28_s23), %s2169_s18 }
   0xa   : > { %s103_s24 = ssub.s32 %s2165_s17, %s3025_s22  ;;  %p2257_p3 = por %p118_p2, %p117_p1 }
   0xb   : > { %p30_p4 = scmp.ge.s32.totalorder %s3027_s23, 2  ;;  %p124_p6 = scmp.eq.s32.totalorder %s1780_s21, 3 }
   0xc   : > { %p1783_p7 = scmp.ge.s32.totalorder %s2173_s19, 1  ;;  %p160_p9 = scmp.lt.s32.totalorder %s2173_s19, 5 }
   0xd   : > { %s3029_s23 = smov (%p30_p4, %s3027_s23), 0  ;;  %p2266_p8 = por %p124_p6, %p123_p5 }
   0xe   : > { %s102_s27 = ssub.s32 %s2169_s18, %s3029_s23  ;;  %s107_s28 = sadd.s32 1, %s2153_s14 }
   0xf   : > { %s104_s29 = sor.u32 %s103_s24, %s102_s27  ;;  %p161_p10 = pnand %p1783_p7, %p160_p9 }
  0x10   : > { %p105_p11 = scmp.eq.s32.totalorder %s104_s29, 0  ;;  %p188_p12 = scmp.lt.s32.totalorder (!%p161_p10), %s2161_s16, 1 }
  0x11   : > { %164 = sbr.rel (%p161_p10) target bundleno = 652 (0x28c), region = 32  ;;  %p190_p13 = scmp.lt.s32.totalorder (!%p161_p10), %s2157_s15, 1 }
  0x12   : > { %s2275_s30 = scalar_select %p105_p11, %s2153_s14, %s107_s28  }
  0x13   : > { %s2178_s10 = smov (!%p161_p10), 110   ;;  %s2179_s11 = smov (!%p161_p10), 2  }
  0x14   : > { %s2180_s21 = smov (!%p161_p10), 20   ;;  %s2181_s24 = smov (!%p161_p10), 92  }
  0x15   : > { %s2182_s27 = smov (!%p161_p10), 38   ;;  %s1941_s28 = sshll.u32 (!%p161_p10), %s2161_s16, 4 }
  0x16   : > { %s189_s4 = scalar_select %p188_p12, %s2161_s16, 1  ;;  %vm337_vm0 = vcmask 31744   ;;  %vm451_vm1 = vcmask 1046528   ;;  %vm265_vm2 = vsmask.f32 7424  ;;  %vm886_vm4 = vcmask 1045504  }
  0x17   : > { %s191_s5 = scalar_select %p190_p13, %s2157_s15, 1  ;;  %v2314_v35 = vld [vmem:[%s3012_s1] sm:$0xf]  ;;  %v2341_v61 = vld [vmem:[%s3012_s1 + $0x4] sm:$0xf]  ;;  %vm1270_vm6 = vcmask 1044480  }
  0x18   : > { %s1995_s6 = smul.u32 46, %s189_s4  ;;  %vm736_vm3 = vsmask.f32 6400  ;;  %vm1116_vm5 = vsmask.f32 5376  ;;  %vm1371_vm7 = vcmask 122880   ;;  %s1689_s29 = sadd.s32 %s2157_s15, %s1941_s28 }
  0x19   : > { %s1994_s7 = smul.u32 23, %s191_s5  ;;  %vm1582_vm8 = vcmask 1040384   ;;  %vm1584_vm9 = vcmask 1041409   ;;  %vm1587_vm10 = vcmask 1042434   ;;  %vm1590_vm11 = vcmask 1043459   ;;  %s1942_s4 = sshll.u32 %s1689_s29, 3 }
  0x1a   : > { %vm1593_vm12 = vcmask 1044484   ;;  %vm1596_vm13 = vcmask 1045509   ;;  %vm1599_vm14 = vcmask 1046534   ;;  %vm1653_vm15 = vcmask 15360   ;;  %s1691_s16 = scalar_lea.hbm %s3014_s3, %s1942_s4 }
  0x1b   : > { %s194_s8 = sadd.s32 %s1995_s6, %s1994_s7 }
  0x1c   : > { %s1785_s9 = sshll.u32 %s194_s8, 2  ;;  %s2176_s8 = smov 56  }
  0x1d   : > { %s2284_s20 = scalar_lea.vmem %s3011_s0, %s1785_s9  ;;  %s2177_s9 = smov 74  }
  0x1e   : > { %v1951_v0 = vld [vmem:[%s2284_s20 + $0x38] sm:$0xff]  ;;  %v1988_v1 = vld [vmem:[%s2284_s20 + $0x40] sm:$0xf]   ;;  %v1993_v2 = vld [vmem:[%s2284_s20 + $0x40] sm:$0x70] }
  0x1f   : > { %v1989_v3 = vor.u32 %v1993_v2, %v1988_v1  ;;  %v1985_v4 = vld [vmem:[%s2284_s20 + $0x40] sm:$0xff]   ;;  %v414_v6 = vsel %vm337_vm0, %v1951_v0, 0  ;;  %v465_v9 = vrot.slane %v1951_v0, 1  ;;  %v1950_v10 = vld [vmem:[%s2284_s20 + $0x30] sm:$0xff]  ;;  %v2294_v11 = vld [vmem:[%s2284_s20 + $0x48] sm:$0xff]  ;;  %v322_v14 = vshll.u32 %v1951_v0, 16 }
  0x20   : > { %v1959_v5 = vld [vmem:[%s2284_s20 + $0x40] sm:$0xff]  ;;  %v330_v7 = vshll.u32 %v1985_v4, 16  ;;  %v334_v8 = vshrl.u32 %v1985_v4, 16  ;;  %419 = vmatpush.bf16.xpose.msra.mxu2 %v414_v6  ;;  %v467_v13 = vrot.slane %v1985_v4, 1  ;;  %v326_v15 = vshrl.u32 %v1951_v0, 16  ;;  %v2301_v22 = vld [vmem:[%s2284_s20 + $0x28] sm:$0xff] }
  0x21   : > { %v417_v12 = vsel %vm337_vm0, %v1989_v3, 0  ;;  %v605_v17 = vrot.slane %v1959_v5, 1  ;;  %v607_v18 = vrot.slane %v2294_v11, 1  ;;  %v324_v20 = vrot.slane %v322_v14, 1  ;;  %v1958_v29 = vld [vmem:[%s2284_s20 + $0x38] sm:$0xff]  ;;  %v1948_v45 = vld [vmem:[%s2284_s20 + $0x20] sm:$0xff] }
  0x22   : > { %439 = vmatpush.bf16.xpose.msra.mxu3 %v417_v12  ;;  %v332_v16 = vrot.slane %v330_v7, 1  ;;  %v468_v19 = vsel %vm451_vm1, %v465_v9, %v467_v13  ;;  %v497_v21 = vsel %vm337_vm0, %v467_v13, 0  ;;  %v314_v24 = vshll.u32 %v1950_v10, 16  ;;  %v1957_v48 = vld [vmem:[%s2284_s20 + $0x30] sm:$0xff]  ;;  %v2336_v60 = vld [vmem:[%s2284_s20 + $0x18] sm:$0xff]  ;;  %v1956_v0 = vld [vmem:[%s2284_s20 + $0x28] sm:$0xff] }
  0x23   : > { %v494_v25 = vsel %vm337_vm0, %v468_v19, 0  ;;  %v328_v26 = vor.u32 %v326_v15, %v324_v20  ;;  %v608_v27 = vsel %vm451_vm1, %v605_v17, %v607_v18  ;;  %v318_v28 = vshrl.u32 %v1950_v10, 16  ;;  %v2354_v6 = vld [vmem:[%s3012_s1 + $0x8] sm:$0xf]  ;;  %v2363_v14 = vld [vmem:[%s2284_s20 + $0x10] sm:$0xff]  ;;  %v1955_v15 = vld [vmem:[%s2284_s20 + $0x20] sm:$0xff] }
  0x24   : > { %v336_v23 = vor.u32 %v334_v8, %v332_v16  ;;  %v412_v31 = vsel %vm337_vm0, %v1950_v10, 0  ;;  %v463_v32 = vrot.slane %v1950_v10, 1  ;;  %v316_v33 = vrot.slane %v314_v24, 1 }
  0x25   : > { %v333_v34 = vsel %vm265_vm2, %v328_v26, %v332_v16  ;;  %v306_v36 = vshll.u32 %v2301_v22, 16  ;;  %v634_v38 = vsel %vm337_vm0, %v608_v27, 0  ;;  %v603_v40 = vrot.slane %v1958_v29, 1 }
  0x26   : > { %v366_v30 = vsel %vm337_vm0, %v336_v23, 0  ;;  %v363_v37 = vsel %vm337_vm0, %v333_v34, 0  ;;  %v320_v39 = vor.u32 %v318_v28, %v316_v33  ;;  %v466_v41 = vsel %vm451_vm1, %v463_v32, %v465_v9  ;;  %v2388_v34 = vld [vmem:[%s2284_s20 + $0x48] sm:$0xff] }
  0x27   : > { %388 = vmatpush.bf16.xpose.msra.mxu1 %v366_v30  ;;  %368 = vmatpush.bf16.xpose.msra.mxu0 %v363_v37  ;;  %v308_v43 = vrot.slane %v306_v36, 1  ;;  %v310_v44 = vshrl.u32 %v2301_v22, 16  ;;  %v491_v46 = vsel %vm337_vm0, %v466_v41, 0  ;;  %v606_v47 = vsel %vm451_vm1, %v603_v40, %v605_v17  ;;  %v2378_v30 = vld [vmem:[%s2284_s20 + $0x8] sm:$0xff] }
  0x28   : > { %420 = vmatpush.bf16.xpose.msra.mxu2 %v412_v31  ;;  %v325_v42 = vsel %vm265_vm2, %v320_v39, %v324_v20  ;;  %v410_v50 = vsel %vm337_vm0, %v2301_v22, 0  ;;  %v461_v51 = vrot.slane %v2301_v22, 1  ;;  %v298_v53 = vshll.u32 %v1948_v45, 16  ;;  %v2381_v31 = vld [vmem:[%s2284_s20 + $0x18] sm:$0xff] }
  0x29   : > { %1818 = vmatmul.msk.bf16.vlgmr.msra.gmra.mxu3 %vm337_vm0, %v2314_v35  ;;  %v360_v49 = vsel %vm337_vm0, %v325_v42, 0  ;;  %v312_v52 = vor.u32 %v310_v44, %v308_v43  ;;  %v631_v54 = vsel %vm337_vm0, %v606_v47, 0  ;;  %v601_v55 = vrot.slane %v1957_v48, 1  ;;  %v685_v48 = vld [vmem:[%s2284_s20 + $0x50] sm:$0x1] }
  0x2a   : > { %519 = vmatpush.bf16.xpose.msrb.mxu3 %v497_v21  ;;  %v464_v56 = vsel %vm451_vm1, %v461_v51, %v463_v32  ;;  %v300_v58 = vrot.slane %v298_v53, 1  ;;  %v302_v59 = vshrl.u32 %v1948_v45, 16  ;;  %v408_v2 = vsel %vm337_vm0, %v1948_v45, 0 }
  0x2b   : > { %v317_v57 = vsel %vm265_vm2, %v312_v52, %v316_v33  ;;  %v488_v62 = vsel %vm337_vm0, %v464_v56, 0  ;;  %v604_v63 = vsel %vm451_vm1, %v601_v55, %v603_v40  ;;  %v459_v3 = vrot.slane %v1948_v45, 1  ;;  %v2385_v33 = vld [vmem:[%s2284_s20 + $0x40] sm:$0xff] }
  0x2c   : > { %v357_v1 = vsel %vm337_vm0, %v317_v57, 0  ;;  %v304_v4 = vor.u32 %v302_v59, %v300_v58  ;;  %v290_v5 = vshll.u32 %v2336_v60, 16  ;;  %v628_v7 = vsel %vm337_vm0, %v604_v63, 0  ;;  %v2415_v63 = vld [vmem:[%s2284_s20 + $0x10] sm:$0xff] }
  0x2d   : > { %v599_v8 = vrot.slane %v1956_v0, 1  ;;  %v462_v9 = vsel %vm451_vm1, %v459_v3, %v461_v51  ;;  %v294_v13 = vshrl.u32 %v2336_v60, 16  ;;  %v406_v20 = vsel %vm337_vm0, %v2336_v60, 0 }
  0x2e   : > { %1816 = vmatmul.msk.bf16.vlgmr.msra.gmra.mxu1 %vm337_vm0, %v2341_v61  ;;  %v309_v10 = vsel %vm265_vm2, %v304_v4, %v308_v43  ;;  %v292_v12 = vrot.slane %v290_v5, 1  ;;  %v485_v16 = vsel %vm337_vm0, %v462_v9, 0  ;;  %v457_v21 = vrot.slane %v2336_v60, 1  ;;  %v2411_v60 = vld [vmem:[%s2284_s20 + $0x38] sm:$0xff] }
  0x2f   : > { %499 = vmatpush.bf16.xpose.msrb.mxu1 %v494_v25  ;;  %369 = vmatpush.bf16.xpose.msra.mxu0 %v360_v49  ;;  %v602_v17 = vsel %vm451_vm1, %v599_v8, %v601_v55  ;;  %v354_v19 = vsel %vm337_vm0, %v309_v10, 0  ;;  %v282_v23 = vshll.u32 %v2363_v14, 16  ;;  %v597_v25 = vrot.slane %v1955_v15, 1  ;;  %v1978_v55 = vld [vmem:[%s2284_s20] sm:$0xff]  }
  0x30   : > { %421 = vmatpush.bf16.xpose.msra.mxu2 %v410_v50  ;;  %v296_v22 = vor.u32 %v294_v13, %v292_v12  ;;  %v625_v24 = vsel %vm337_vm0, %v602_v17, 0  ;;  %v460_v26 = vsel %vm451_vm1, %v457_v21, %v459_v3  ;;  %v286_v29 = vshrl.u32 %v2363_v14, 16 }
  0x31   : > { %v284_v28 = vrot.slane %v282_v23, 1  ;;  %v600_v32 = vsel %vm451_vm1, %v597_v25, %v599_v8  ;;  %v482_v36 = vsel %vm337_vm0, %v460_v26, 0  ;;  %v455_v39 = vrot.slane %v2363_v14, 1  ;;  %v1991_v8 = vld [vmem:[%s2284_s20] sm:$0xe] }
  0x32   : > { %639 = vmatpush.bf16.xpose.msra.mxu3 %v634_v38  ;;  %v301_v27 = vsel %vm265_vm2, %v296_v22, %v300_v58  ;;  %v404_v38 = vsel %vm337_vm0, %v2363_v14, 0  ;;  %v622_v40 = vsel %vm337_vm0, %v600_v32, 0  ;;  %v595_v42 = vrot.slane %v2381_v31, 1  ;;  %v2439_v32 = vld [vmem:[%s2284_s20 + $0x30] sm:$0xff] }
  0x33   : > { %v351_v37 = vsel %vm337_vm0, %v301_v27, 0  ;;  %v288_v41 = vor.u32 %v286_v29, %v284_v28  ;;  %v274_v43 = vshll.u32 %v2378_v30, 16  ;;  %v800_v44 = vshrl.u32 %v2385_v33, 16 }
  0x34   : > { %v803_v45 = vshll.u32 %v2385_v33, 16  ;;  %v812_v47 = vshll.u32 %v2388_v34, 16  ;;  %v458_v49 = vsel %vm451_vm1, %v455_v39, %v457_v21  ;;  %v278_v50 = vshrl.u32 %v2378_v30, 16 }
  0x35   : > { %v293_v51 = vsel %vm265_vm2, %v288_v41, %v292_v12  ;;  %v598_v52 = vsel %vm451_vm1, %v595_v42, %v597_v25  ;;  %v2407_v53 = vrot.slane %v274_v43, 1  ;;  %v802_v56 = vrot.slane %v800_v44, 1 }
  0x36   : > { %v805_v57 = vrot.slane %v803_v45, 2  ;;  %v814_v59 = vrot.slane %v812_v47, 2  ;;  %v348_v0 = vsel %vm337_vm0, %v293_v51, 0  ;;  %v619_v3 = vsel %vm337_vm0, %v598_v52, 0  ;;  %v2456_v51 = vld [vmem:[%s2284_s20 + $0x48] sm:$0xff]  ;;  %v2459_v52 = vld [vmem:[%s2284_s20 + $0x50] sm:$0xff] }
  0x37   : > { %500 = vmatpush.bf16.xpose.msrb.mxu1 %v491_v46  ;;  %370 = vmatpush.bf16.xpose.msra.mxu0 %v357_v1  ;;  %v809_v46 = vshrl.u32 %v2388_v34, 16  ;;  %v402_v1 = vsel %vm337_vm0, %v2378_v30, 0  ;;  %v280_v4 = vor.u32 %v278_v50, %v2407_v53  ;;  %v269_v5 = vshll.u32 %v1978_v55, 16 }
  0x38   : > { %422 = vmatpush.bf16.xpose.msra.mxu2 %v408_v2  ;;  %v453_v2 = vrot.slane %v2378_v30, 1  ;;  %v806_v10 = vor.u32 %v805_v57, %v802_v56  ;;  %v791_v13 = vshrl.u32 %v2411_v60, 16  ;;  %v794_v14 = vshll.u32 %v2411_v60, 16 }
  0x39   : > { %1821 = vmatmul.msk.bf16.vlgmr.msrb.gmra.mxu3 %vm337_vm0, %v2354_v6  ;;  %v811_v58 = vrot.slane %v809_v46, 1  ;;  %v593_v15 = vrot.slane %v2415_v63, 1  ;;  %v285_v21 = vsel %vm265_vm2, %v280_v4, %v284_v28  ;;  %v267_v22 = vshrl.u32 %v1978_v55, 16 }
  0x3a   : > { %640 = vmatpush.bf16.xpose.msra.mxu3 %v631_v54  ;;  %v725_v54 = vunpack.c.l.b16 %v685_v48  ;;  %v271_v23 = vrot.slane %v269_v5, 1  ;;  %v793_v26 = vrot.slane %v791_v13, 1  ;;  %v796_v27 = vrot.slane %v794_v14, 2  ;;  %v2491_v13 = vld [vmem:[%s2284_s20 + $0x40] sm:$0xff] }
  0x3b   : > { %v815_v12 = vor.u32 %v814_v59, %v811_v58  ;;  %v596_v30 = vsel %vm451_vm1, %v593_v15, %v595_v42  ;;  %v900_v43 = vrot.slane %v2385_v33, 2  ;;  %v902_v42 = vrot.slane %v2388_v34, 2  ;;  %v2464_v58 = vld [vmem:[%s2284_s20 + $0x28] sm:$0xff] }
  0x3c   : > { %v2425_v9 = vpack.c.b16 %v725_v54, %v725_v54  ;;  %v616_v41 = vsel %vm337_vm0, %v596_v30, 0  ;;  %v797_v44 = vor.u32 %v796_v27, %v793_v26  ;;  %v782_v46 = vshrl.u32 %v2439_v32, 16  ;;  %v2514_v30 = vld [vmem:[%s2284_s20 + $0x38] sm:$0xff] }
  0x3d   : > { %v816_v25 = vsel %vm736_vm3, %v806_v10, %v815_v12  ;;  %v785_v47 = vshll.u32 %v2439_v32, 16  ;;  %v1048_v4 = vrot.slane %v2459_v52, 2  ;;  %v637_v5 = vsel %vm337_vm0, %v607_v18, 0 }
  0x3e   : > { %v807_v50 = vsel %vm736_vm3, %v797_v44, %v806_v10  ;;  %v784_v56 = vrot.slane %v782_v46, 1  ;;  %v2484_v10 = vld [vmem:[%s2284_s20 + $0x20] sm:$0xff] }
  0x3f   : > { %501 = vmatpush.bf16.xpose.msrb.mxu1 %v488_v62  ;;  %371 = vmatpush.bf16.xpose.msra.mxu0 %v354_v19  ;;  %v479_v62 = vsel %vm337_vm0, %v458_v49, 0  ;;  %v1825_v19 = vld [vmem:[%s2284_s20 + $0x8] sm:$0xe]  ;;  %v903_v49 = vsel %vm886_vm4, %v900_v43, %v902_v42  ;;  %v787_v57 = vrot.slane %v785_v47, 2  ;;  %v2532_v47 = vld [vmem:[%s3012_s1 + $0x10] sm:$0xf] }
  0x40   : > { %423 = vmatpush.bf16.xpose.msra.mxu2 %v406_v20  ;;  %v1952_v20 = vld [vmem:[%s2284_s20 + $0x8] sm:$0xf0]  ;;  %v931_v63 = vsel %vm337_vm0, %v903_v49, 0 }
  0x41   : > { %v1826_v31 = vor.u32 %v1952_v20, %v1825_v19  ;;  %v2499_v19 = vld [vmem:[%s3012_s1 + $0xc] sm:$0xf] }
  0x42   : > { %641 = vmatpush.bf16.xpose.msra.mxu3 %v628_v7  ;;  %v1990_v7 = vld [vmem:[%s2284_s20] sm:$0xf0] }
  0x43   : > { %v1992_v17 = vor.u32 %v1991_v8, %v1990_v7  ;;  %v592_v45 = vrot.slane %v1826_v31, 1  ;;  %v788_v7 = vor.u32 %v787_v57, %v784_v56  ;;  %v773_v8 = vshrl.u32 %v2464_v58, 16 }
  0x44   : > { %v1180_v56 = vshrl.u32 %v2456_v51, 16  ;;  %v1183_v57 = vshll.u32 %v2456_v51, 16 }
  0x45   : > { %v452_v28 = vrot.slane %v1992_v17, 1  ;;  %v798_v18 = vsel %vm736_vm3, %v788_v7, %v797_v44  ;;  %v775_v14 = vrot.slane %v773_v8, 1 }
  0x47   : > { %502 = vmatpush.bf16.xpose.msrb.mxu1 %v485_v16  ;;  %372 = vmatpush.bf16.xpose.msra.mxu0 %v351_v37  ;;  %v456_v16 = vsel %vm451_vm1, %v453_v2, %v455_v39  ;;  %v400_v37 = vsel %vm337_vm0, %v1978_v55, 0  ;;  %v272_v39 = vor.u32 %v271_v23, %v267_v22  ;;  %v454_v48 = vsel %vm451_vm1, %v452_v28, %v453_v2 }
  0x48   : > { %424 = vmatpush.bf16.xpose.msra.mxu2 %v404_v38  ;;  %v476_v29 = vsel %vm337_vm0, %v456_v16, 0  ;;  %v847_v38 = vsel %vm337_vm0, %v816_v25, 0  ;;  %v473_v54 = vsel %vm337_vm0, %v454_v48, 0  ;;  %v594_v55 = vsel %vm451_vm1, %v592_v45, %v593_v15 }
  0x49   : > { %v277_v33 = vsel %vm265_vm2, %v272_v39, %v2407_v53  ;;  %v898_v2 = vrot.slane %v2411_v60, 2  ;;  %v764_v22 = vshrl.u32 %v2484_v10, 16  ;;  %v767_v23 = vshll.u32 %v2484_v10, 16 }
  0x4a   : > { %642 = vmatpush.bf16.xpose.msra.mxu3 %v625_v24  ;;  %v818_v24 = vshll.u32 %v2425_v9, 16  ;;  %v342_v53 = vsel %vm337_vm0, %v277_v33, 0  ;;  %v841_v25 = vsel %vm337_vm0, %v798_v18, 0  ;;  %v894_v39 = vrot.slane %v2464_v58, 2 }
  0x4b   : > { %v901_v11 = vsel %vm886_vm4, %v898_v2, %v900_v43  ;;  %v766_v31 = vrot.slane %v764_v22, 1 }
  0x4c   : > { %v928_v20 = vsel %vm337_vm0, %v901_v11, 0  ;;  %v1182_v11 = vrot.slane %v1180_v56, 2 }
  0x4f   : > { %503 = vmatpush.bf16.xpose.msrb.mxu1 %v482_v36  ;;  %373 = vmatpush.bf16.xpose.msra.mxu0 %v348_v0  ;;  %v345_v36 = vsel %vm337_vm0, %v285_v21, 0  ;;  %v844_v0 = vsel %vm337_vm0, %v807_v50, 0  ;;  %v896_v21 = vrot.slane %v2439_v32, 2  ;;  %v769_v32 = vrot.slane %v767_v23, 2  ;;  %v2538_v50 = vld [vmem:[%s2284_s20 + $0x10] sm:$0xff] }
  0x50   : > { %425 = vmatpush.bf16.xpose.msra.mxu2 %v402_v1  ;;  %v613_v1 = vsel %vm337_vm0, %v594_v55, 0 }
  0x51   : > { %v897_v48 = vsel %vm886_vm4, %v894_v39, %v896_v21 }
  0x52   : > { %643 = vmatpush.bf16.xpose.msra.mxu3 %v622_v40  ;;  %v820_v40 = vrot.slane %v818_v24, 2 }
  0x54   : > { %v821_v34 = vsel %vm736_vm3, %v815_v12, %v820_v40  ;;  %v1042_v40 = vrot.slane %v2514_v30, 2 }
  0x55   : > { %v850_v59 = vsel %vm337_vm0, %v821_v34, 0 }
  0x57   : > { %504 = vmatpush.bf16.xpose.msrb.mxu1 %v479_v62  ;;  %374 = vmatpush.bf16.xpose.msra.mxu0 %v345_v36  ;;  %v904_v62 = vrot.slane %v2425_v9, 2  ;;  %v776_v9 = vshll.u32 %v2464_v58, 16  ;;  %v2517_v36 = vld [vmem:[%s2284_s20 + $0x18] sm:$0xff]  ;;  %v1189_v58 = vshrl.u32 %v2459_v52, 16 }
  0x58   : > { %426 = vmatpush.bf16.xpose.msra.mxu2 %v400_v37  ;;  %v755_v43 = vshrl.u32 %v2517_v36, 16  ;;  %v758_v45 = vshll.u32 %v2517_v36, 16 }
  0x59   : > { %v905_v60 = vsel %vm886_vm4, %v902_v42, %v904_v62  ;;  %v778_v15 = vrot.slane %v776_v9, 2  ;;  %v667_v62 = vld [vmem:[%s2284_s20 + $0x8] sm:$0xe]  ;;  %v1191_v18 = vrot.slane %v1189_v58, 2 }
  0x5a   : > { %644 = vmatpush.bf16.xpose.msra.mxu3 %v619_v3  ;;  %v1046_v3 = vrot.slane %v2456_v51, 2  ;;  %v934_v16 = vsel %vm337_vm0, %v905_v60, 0  ;;  %v757_v49 = vrot.slane %v755_v43, 1  ;;  %v760_v55 = vrot.slane %v758_v45, 2 }
  0x5b   : > { %v779_v26 = vor.u32 %v778_v15, %v775_v14  ;;  %v707_v60 = vunpack.c.l.b16 %v667_v62  ;;  %v2566_v15 = vld [vmem:[%s2284_s20 + $0x28] sm:$0xff] }
  0x5c   : > { %v1049_v12 = vsel %vm886_vm4, %v1046_v3, %v1048_v4  ;;  %v761_v9 = vor.u32 %v760_v55, %v757_v49  ;;  %v1162_v49 = vshrl.u32 %v2514_v30, 16  ;;  %v1165_v55 = vshll.u32 %v2514_v30, 16 }
  0x5d   : > { %v1077_v24 = vsel %vm337_vm0, %v1049_v12, 0  ;;  %v789_v37 = vsel %vm736_vm3, %v779_v26, %v788_v7  ;;  %v1110_v7 = vld [vmem:[%s2284_s20 + $0x58] sm:$0x3]  ;;  %v1185_v12 = vrot.slane %v1183_v57, 3  ;;  %v880_v57 = vld [vmem:[%s2284_s20 + $0x8] sm:$0xc] }
  0x5e   : > { %v838_v44 = vsel %vm337_vm0, %v789_v37, 0 }
  0x5f   : > { %505 = vmatpush.bf16.xpose.msrb.mxu1 %v476_v29  ;;  %1817 = vmatmul.msk.bf16.vlgmr.msra.gmra.mxu2 %vm337_vm0, %v2314_v35  ;;  %v982_v35 = vld [vmem:[%s2284_s20 + $0x58] sm:$0x1]  ;;  %v899_v29 = vsel %vm886_vm4, %v896_v21, %v898_v2 }
  0x60   : > { %852 = vmatpush.bf16.xpose.msrb.mxu2 %v847_v38  ;;  %375 = vmatpush.bf16.xpose.msra.mxu0 %v342_v53  ;;  %v1022_v17 = vunpack.c.l.b16 %v982_v35  ;;  %v925_v28 = vsel %vm337_vm0, %v899_v29, 0  ;;  %v890_v29 = vrot.slane %v2517_v36, 2 }
  0x62   : > { %645 = vmatpush.bf16.xpose.msra.mxu3 %v616_v41  ;;  %v1032_v27 = vpack.c.b16 %v1022_v17, %v1022_v17  ;;  %v770_v41 = vor.u32 %v769_v32, %v766_v31  ;;  %v1038_v31 = vrot.slane %v2566_v15, 2 }
  0x64   : > { %v1050_v38 = vrot.slane %v1032_v27, 2  ;;  %v780_v34 = vsel %vm736_vm3, %v770_v41, %v779_v26  ;;  %v771_v23 = vsel %vm736_vm3, %v761_v9, %v770_v41 }
  0x65   : > { %v835_v2 = vsel %vm337_vm0, %v780_v34, 0  ;;  %v832_v37 = vsel %vm337_vm0, %v771_v23, 0 }
  0x66   : > { %v1051_v46 = vsel %vm886_vm4, %v1048_v4, %v1050_v38  ;;  %v746_v4 = vshrl.u32 %v2538_v50, 16 }
  0x67   : > { %506 = vmatpush.bf16.xpose.msrb.mxu1 %v473_v54  ;;  %1815 = vmatmul.msk.bf16.vlgmr.msra.gmra.mxu0 %vm337_vm0, %v2341_v61  ;;  %v2541_v54 = vld [vmem:[%s2284_s20 + $0x30] sm:$0xff]  ;;  %v1080_v53 = vsel %vm337_vm0, %v1051_v46, 0  ;;  %v2592_v46 = vld [vmem:[%s2284_s20 + $0x20] sm:$0xff] }
  0x68   : > { %936 = vmatpush.bf16.xpose.msrb.mxu0 %v931_v63  ;;  %853 = vmatpush.bf16.xpose.msrb.mxu2 %v844_v0  ;;  %v2550_v63 = vld [vmem:[%s2284_s20 + $0xc] sm:$0xf]  ;;  %v922_v0 = vsel %vm337_vm0, %v897_v48, 0  ;;  %v1040_v8 = vrot.slane %v2541_v54, 2  ;;  %v2597_v48 = vld [vmem:[%s3012_s1 + $0x14] sm:$0xf] }
  0x69   : > { %v708_v35 = vunpack.c.l.b16 %v2550_v63 }
  0x6a   : > { %646 = vmatpush.bf16.xpose.msra.mxu3 %v613_v1  ;;  %v1043_v22 = vsel %vm886_vm4, %v1040_v8, %v1042_v40 }
  0x6b   : > { %v726_v21 = vpack.c.b16 %v708_v35, %v707_v60 }
  0x6d   : > { %v741_v38 = vshll.u32 %v726_v21, 16 }
  0x6e   : > { %1820 = vmatmul.msk.bf16.vlgmr.msrb.gmra.mxu1 %vm337_vm0, %v2354_v6  ;;  %v1044_v6 = vrot.slane %v2491_v13, 2 }
  0x6f   : > { %872 = vmatpush.bf16.xpose.msra.mxu1 %v850_v59  ;;  %v1192_v59 = vshll.u32 %v2459_v52, 16  ;;  %v743_v34 = vrot.slane %v741_v38, 2 }
  0x70   : > { %937 = vmatpush.bf16.xpose.msrb.mxu0 %v928_v20  ;;  %854 = vmatpush.bf16.xpose.msrb.mxu2 %v841_v25  ;;  %v1047_v61 = vsel %vm886_vm4, %v1044_v6, %v1046_v3  ;;  %v1045_v33 = vsel %vm886_vm4, %v1042_v40, %v1044_v6  ;;  %v892_v3 = vrot.slane %v2484_v10, 2  ;;  %v1114_v10 = vunpack.c.l.b16 %v1110_v7 }
  0x71   : > { %1859 = vmatmul.msk.bf16.vlgmr.msra.gmra.mxu3 %vm337_vm0, %v2499_v19  ;;  %v1074_v42 = vsel %vm337_vm0, %v1047_v61, 0  ;;  %v1071_v1 = vsel %vm337_vm0, %v1045_v33, 0  ;;  %v1194_v14 = vrot.slane %v1192_v59, 3  ;;  %v1174_v6 = vshll.u32 %v2491_v13, 16 }
  0x72   : > { %659 = vmatpush.bf16.xpose.msrb.mxu3 %v637_v5  ;;  %v749_v5 = vshll.u32 %v2538_v50, 16  ;;  %v895_v20 = vsel %vm886_vm4, %v892_v3, %v894_v39  ;;  %v2577_v26 = vpack.c.b16 %v1114_v10, %v1114_v10  ;;  %v1068_v61 = vsel %vm337_vm0, %v1043_v22, 0  ;;  %v2617_v10 = vld [vmem:[%s2284_s20 + $0x18] sm:$0xff]  ;;  %v2624_v22 = vld [vmem:[%s2284_s20 + $0x14] sm:$0xf] }
  0x73   : > { %v2573_v25 = vor.u32 %v1194_v14, %v1191_v18  ;;  %v919_v27 = vsel %vm337_vm0, %v895_v20, 0  ;;  %v1176_v41 = vrot.slane %v1174_v6, 3  ;;  %v1167_v7 = vrot.slane %v1165_v55, 3 }
  0x74   : > { %v751_v17 = vrot.slane %v749_v5, 2  ;;  %v1198_v43 = vshrl.u32 %v2577_v26, 16  ;;  %v1201_v36 = vshll.u32 %v2577_v26, 16  ;;  %v1164_v5 = vrot.slane %v1162_v49, 2 }
  0x75   : > { %v1156_v20 = vshll.u32 %v2541_v54, 16  ;;  %v1288_v38 = vrot.slane %v2577_v26, 3  ;;  %v1282_v55 = vrot.slane %v2491_v13, 3 }
  0x76   : > { %v1200_v59 = vrot.slane %v1198_v43, 2  ;;  %v1203_v62 = vrot.slane %v1201_v36, 3  ;;  %v1168_v18 = vor.u32 %v1167_v7, %v1164_v5  ;;  %v1144_v36 = vshrl.u32 %v2566_v15, 16 }
  0x77   : > { %956 = vmatpush.bf16.xpose.msrb.mxu1 %v934_v16  ;;  %v748_v16 = vrot.slane %v746_v4, 1 }
  0x78   : > { %938 = vmatpush.bf16.xpose.msrb.mxu0 %v925_v28  ;;  %855 = vmatpush.bf16.xpose.msrb.mxu2 %v838_v44  ;;  %v738_v28 = vshrl.u32 %v726_v21, 16  ;;  %v1041_v44 = vsel %vm886_vm4, %v1038_v31, %v1040_v8  ;;  %v884_v8 = vunpack.c.l.b16 %v880_v57  ;;  %v1204_v60 = vor.u32 %v1203_v62, %v1200_v59  ;;  %v964_v21 = vld [vmem:[%s2284_s20 + $0x10] sm:$0xc] }
  0x79   : > { %v752_v32 = vor.u32 %v751_v17, %v748_v16  ;;  %v1153_v17 = vshrl.u32 %v2541_v54, 16 }
  0x7a   : > { %1082 = vmatpush.bf16.xpose.msra.mxu3 %v1077_v24  ;;  %v1186_v24 = vor.u32 %v1185_v12, %v1182_v11  ;;  %v740_v33 = vrot.slane %v738_v28, 1  ;;  %v885_v14 = vpack.c.b16 %v708_v35, %v884_v8  ;;  %v1205_v23 = vsel %vm1116_vm5, %v2573_v25, %v1204_v60 }
  0x7b   : > { %v762_v45 = vsel %vm736_vm3, %v752_v32, %v761_v9  ;;  %v1158_v28 = vrot.slane %v1156_v20, 3  ;;  %v1348_v20 = vld [vmem:[%s3013_s2] sm:$0xff] }
  0x7c   : > { %v1196_v39 = vsel %vm1116_vm5, %v1186_v24, %v2573_v25  ;;  %v744_v4 = vor.u32 %v743_v34, %v740_v33  ;;  %v887_v6 = vrot.slane %v885_v14, 2  ;;  %v1234_v25 = vsel %vm337_vm0, %v1205_v23, 0 }
  0x7d   : > { %v1231_v56 = vsel %vm337_vm0, %v1196_v39, 0  ;;  %v1899_v39 = vld [vmem:[%s3012_s1 + $0x18] sm:$0xf] }
  0x7e   : > { %1895 = vmatmul.msk.bf16.vlgmr.msra.gmra.mxu1 %vm337_vm0, %v2532_v47  ;;  %v753_v12 = vsel %vm736_vm3, %v744_v4, %v752_v32  ;;  %v1004_v32 = vunpack.c.l.b16 %v964_v21  ;;  %v1280_v4 = vrot.slane %v2514_v30, 3  ;;  %v2175_v21 = vmov 0  }
  0x7f   : > { %1102 = vmatpush.bf16.xpose.msra.mxu1 %v1080_v53  ;;  %v826_v63 = vsel %vm337_vm0, %v753_v12, 0  ;;  %v1129_v12 = vshll.u32 %v2617_v10, 16  ;;  %2078 = vset.pattern.permute.xlu0 %v2175_v21 }
  0x80   : > { %939 = vmatpush.bf16.xpose.msrb.mxu0 %v922_v0  ;;  %856 = vmatpush.bf16.xpose.msrb.mxu2 %v835_v2  ;;  %v1065_v0 = vsel %vm337_vm0, %v1041_v44, 0  ;;  %v888_v2 = vrot.slane %v2538_v50, 2  ;;  %v1283_v60 = vsel %vm1270_vm6, %v1280_v4, %v1282_v55 }
  0x81   : > { %1860 = vmatmul.msk.bf16.vlgmr.msrb.gmra.mxu3 %vm337_vm0, %v2499_v19  ;;  %v1171_v19 = vshrl.u32 %v2491_v13, 16  ;;  %v1309_v30 = vsel %vm337_vm0, %v1283_v60, 0  ;;  %1351 = vperm.xlu0 %2078, %v1348_v20  }
  0x82   : > { %1083 = vmatpush.bf16.xpose.msra.mxu3 %v1074_v42  ;;  %v893_v42 = vsel %vm886_vm4, %v890_v29, %v892_v3  ;;  %v1036_v3 = vrot.slane %v2592_v46, 2  ;;  %v891_v11 = vsel %vm886_vm4, %v888_v2, %v890_v29  ;;  %v1284_v29 = vrot.slane %v2456_v51, 3 }
  0x83   : > { %v1173_v40 = vrot.slane %v1171_v19, 2  ;;  %v916_v58 = vsel %vm337_vm0, %v893_v42, 0  ;;  %v889_v51 = vsel %vm886_vm4, %v887_v6, %v888_v2  ;;  %v1147_v42 = vshll.u32 %v2566_v15, 16 }
  0x84   : > { %v1039_v50 = vsel %vm886_vm4, %v1036_v3, %v1038_v31  ;;  %v1286_v31 = vrot.slane %v2459_v52, 3  ;;  %v1138_v2 = vshll.u32 %v2592_v46, 16 }
  0x85   : > { %v1177_v53 = vor.u32 %v1176_v41, %v1173_v40  ;;  %v1062_v19 = vsel %vm337_vm0, %v1039_v50, 0  ;;  %v1126_v50 = vshrl.u32 %v2617_v10, 16 }
  0x86   : > { %v1287_v41 = vsel %vm1270_vm6, %v1284_v29, %v1286_v31  ;;  %v1289_v44 = vsel %vm1270_vm6, %v1286_v31, %v1288_v38  ;;  %v1140_v8 = vrot.slane %v1138_v2, 3 }
  0x87   : > { %v1187_v9 = vsel %vm1116_vm5, %v1177_v53, %v1186_v24  ;;  %v913_v24 = vsel %vm337_vm0, %v891_v11, 0  ;;  %v1178_v35 = vsel %vm1116_vm5, %v1168_v18, %v1177_v53  ;;  %v1315_v34 = vsel %vm337_vm0, %v1287_v41, 0 }
  0x88   : > { %940 = vmatpush.bf16.xpose.msrb.mxu0 %v919_v27  ;;  %857 = vmatpush.bf16.xpose.msrb.mxu2 %v832_v37  ;;  %v1228_v16 = vsel %vm337_vm0, %v1187_v9, 0  ;;  %v1034_v27 = vrot.slane %v2617_v10, 2  ;;  %v1155_v37 = vrot.slane %v1153_v17, 2  ;;  %v1225_v52 = vsel %vm337_vm0, %v1178_v35, 0 }
  0x89   : > { %v1149_v53 = vrot.slane %v1147_v42, 3  ;;  %v1131_v17 = vrot.slane %v1129_v12, 3 }
  0x8a   : > { %1084 = vmatpush.bf16.xpose.msra.mxu3 %v1071_v1  ;;  %v829_v1 = vsel %vm337_vm0, %v762_v45, 0  ;;  %v1037_v40 = vsel %vm886_vm4, %v1034_v27, %v1036_v3  ;;  %v1159_v26 = vor.u32 %v1158_v28, %v1155_v37  ;;  %v910_v45 = vsel %vm337_vm0, %v889_v51, 0 }
  0x8b   : > { %v1059_v33 = vsel %vm337_vm0, %v1037_v40, 0  ;;  %v1274_v40 = vrot.slane %v2592_v46, 3 }
  0x8c   : > { %v1169_v57 = vsel %vm1116_vm5, %v1159_v26, %v1168_v18  ;;  %v1278_v18 = vrot.slane %v2541_v54, 3 }
  0x8d   : > { %v1222_v59 = vsel %vm337_vm0, %v1169_v57, 0 }
  0x8e   : > { %1898 = vmatmul.msk.bf16.vlgmr.msrb.gmra.mxu1 %vm337_vm0, %v2597_v48 }
  0x8f   : > { %1236 = vmatpush.bf16.xpose.msrb.mxu1 %v1231_v56  ;;  %v1318_v56 = vsel %vm337_vm0, %v1289_v44, 0  ;;  %v1264_v44 = vld [vmem:[%s2284_s20 + $0x10] sm:$0x8]  ;;  %s185_s20 = sand.u32 1, %s2149_s13  }
  0x90   : > { %941 = vmatpush.bf16.xpose.msrb.mxu0 %v916_v58  ;;  %858 = vmatpush.bf16.xpose.msrb.mxu2 %v829_v1  ;;  %v1146_v58 = vrot.slane %v1144_v36, 2  ;;  %v1135_v1 = vshrl.u32 %v2592_v46, 16  ;;  %s1784_s6 = sshll.u32 %s185_s20, 6  ;;  %s1679_s15 = scalar_lea.sflag [#allocation3], %s185_s20 }
  0x91   : > { %s2722_s7 = scalar_lea.vmem [#allocation2], %s1784_s6 }
  0x92   : > { %1085 = vmatpush.bf16.xpose.msra.mxu3 %v1068_v61  ;;  %v1005_v61 = vunpack.c.l.b16 %v2624_v22  ;;  %v1150_v13 = vor.u32 %v1149_v53, %v1146_v58  ;;  %v1137_v7 = vrot.slane %v1135_v1, 2 }
  0x94   : > { %v2647_v43 = vpack.c.b16 %v1005_v61, %v1004_v32  ;;  %v1160_v5 = vsel %vm1116_vm5, %v1150_v13, %v1159_v26  ;;  %v1141_v11 = vor.u32 %v1140_v8, %v1137_v7 }
  0x95   : > { %v1219_v9 = vsel %vm337_vm0, %v1160_v5, 0 }
  0x96   : > { %v1033_v49 = vrot.slane %v2647_v43, 2  ;;  %v1151_v14 = vsel %vm1116_vm5, %v1141_v11, %v1150_v13  ;;  %v1121_v35 = vshll.u32 %v2647_v43, 16 }
  0x97   : > { %1237 = vmatpush.bf16.xpose.msrb.mxu1 %v1228_v16  ;;  %v1128_v16 = vrot.slane %v1126_v50, 2  ;;  %v1216_v23 = vsel %vm337_vm0, %v1151_v14, 0 }
  0x98   : > { %942 = vmatpush.bf16.xpose.msrb.mxu0 %v913_v24  ;;  %859 = vmatpush.bf16.xpose.msrb.mxu2 %v826_v63  ;;  %v1035_v62 = vsel %vm886_vm4, %v1033_v49, %v1034_v27  ;;  %v1281_v24 = vsel %vm1270_vm6, %v1278_v18, %v1280_v4  ;;  %v1118_v63 = vshrl.u32 %v2647_v43, 16  ;;  %v1276_v27 = vrot.slane %v2566_v15, 3 }
  0x99   : > { %v1306_v6 = vsel %vm337_vm0, %v1281_v24, 0  ;;  %v1268_v49 = vunpack.c.l.b16 %v1264_v44 }
  0x9a   : > { %1086 = vmatpush.bf16.xpose.msra.mxu3 %v1065_v0  ;;  %v1285_v0 = vsel %vm1270_vm6, %v1282_v55, %v1284_v29  ;;  %v1120_v32 = vrot.slane %v1118_v63, 2  ;;  %v1279_v38 = vsel %vm1270_vm6, %v1276_v27, %v1278_v18  ;;  %v1277_v36 = vsel %vm1270_vm6, %v1274_v40, %v1276_v27 }
  0x9b   : > { %v1312_v3 = vsel %vm337_vm0, %v1285_v0, 0  ;;  %v1303_v15 = vsel %vm337_vm0, %v1279_v38, 0  ;;  %v1269_v55 = vpack.c.b16 %v1005_v61, %v1268_v49 }
  0x9d   : > { %v1271_v58 = vrot.slane %v1269_v55, 3 }
  0x9e   : > { %1933 = vmatmul.msk.bf16.vlgmr.msra.gmra.mxu1 %vm337_vm0, %v1899_v39 }
  0x9f   : > { %1238 = vmatpush.bf16.xpose.msrb.mxu1 %v1225_v52  ;;  %1894 = vmatmul.msk.bf16.vlgmr.msrb.gmra.mxu2 %vm337_vm0, %v2532_v47  ;;  %v1056_v47 = vsel %vm337_vm0, %v1035_v62, 0  ;;  %v1937_v52 = vld [vmem:[%s3012_s1 + $0x20] sm:$0xf] }
  0xa0   : > { %1256 = vmatpush.bf16.xpose.msra.mxu2 %v1234_v25  ;;  %943 = vmatpush.bf16.xpose.msrb.mxu0 %v910_v45  ;;  %v1123_v25 = vrot.slane %v1121_v35, 3 }
  0xa2   : > { %1087 = vmatpush.bf16.xpose.msra.mxu3 %v1062_v19  ;;  %v1132_v19 = vor.u32 %v1131_v17, %v1128_v16  ;;  %v1124_v51 = vor.u32 %v1123_v25, %v1120_v32 }
  0xa4   : > { %v1142_v31 = vsel %vm1116_vm5, %v1132_v19, %v1141_v11  ;;  %v1133_v43 = vsel %vm1116_vm5, %v1124_v51, %v1132_v19 }
  0xa5   : > { %v1213_v28 = vsel %vm337_vm0, %v1142_v31, 0  ;;  %v1210_v26 = vsel %vm337_vm0, %v1133_v43, 0 }
  0xa7   : > { %1239 = vmatpush.bf16.xpose.msrb.mxu1 %v1222_v59  ;;  %1897 = vmatmul.msk.bf16.vlgmr.msrb.gmra.mxu0 %vm337_vm0, %v2597_v48  ;;  %v1934_v48 = vld [vmem:[%s3012_s1 + $0x1c] sm:$0xf] }
  0xa8   : > { %1320 = vmatpush.bf16.xpose.msra.mxu0 %v1315_v34  ;;  %1340 = vmatpush.bf16.xpose.msrb.mxu2 %v1318_v56  ;;  %v1272_v34 = vrot.slane %v2617_v10, 3 }
  0xaa   : > { %1088 = vmatpush.bf16.xpose.msra.mxu3 %v1059_v33  ;;  %v1300_v33 = vsel %vm337_vm0, %v1277_v36, 0  ;;  %v1275_v46 = vsel %vm1270_vm6, %v1272_v34, %v1274_v40  ;;  %v1273_v53 = vsel %vm1270_vm6, %v1271_v58, %v1272_v34 }
  0xab   : > { %v390_v29 = vpop.f32.mrf.mxu1  ;;  %v1297_v57 = vsel %vm337_vm0, %v1275_v46, 0  ;;  %v1294_v59 = vsel %vm337_vm0, %v1273_v53, 0 }
  0xac   : > { %v441_v54 = vpop.f32.mrf.mxu3 }
  0xad   : > { %v442_v37 = vadd.f32 %v441_v54, %v390_v29 }
  0xaf   : > { %1240 = vmatpush.bf16.xpose.msrb.mxu1 %v1219_v9  ;;  %1936 = vmatmul.msk.bf16.vlgmr.msra.gmra.mxu2 %vm337_vm0, %v1934_v48 }
  0xb0   : > { %1321 = vmatpush.bf16.xpose.msra.mxu0 %v1312_v3 }
  0xb2   : > { %1089 = vmatpush.bf16.xpose.msra.mxu3 %v1056_v47 }
  0xb3   : > { %v392_v41 = vpop.f32.mrf.mxu1 }
  0xb7   : > { %1241 = vmatpush.bf16.xpose.msrb.mxu1 %v1216_v23 }
  0xb8   : > { %1322 = vmatpush.bf16.xpose.msra.mxu0 %v1309_v30 }
  0xb9   : > { %1932 = vmatmul.msk.bf16.vlgmr.msra.gmra.mxu3 %vm337_vm0, %v1899_v39  ;;  %v443_v39 = vpop.f32.mrf.mxu3 }
  0xbf   : > { %1242 = vmatpush.bf16.xpose.msrb.mxu1 %v1213_v28  ;;  %1939 = vmatmul.msk.bf16.vlgmr.msrb.gmra.mxu2 %vm337_vm0, %v1937_v52 }
  0xc0   : > { %1323 = vmatpush.bf16.xpose.msra.mxu0 %v1306_v6 }
  0xc1   : > { %v521_v42 = vpop.f32.mrf.mxu3 }
  0xc2   : > { %v526_v45 = vadd.f32 %v521_v42, %v442_v37 }
  0xc7   : > { %1243 = vmatpush.bf16.xpose.msrb.mxu1 %v1210_v26 }
  0xc8   : > { %1324 = vmatpush.bf16.xpose.msra.mxu0 %v1303_v15 }
  0xc9   : > { %v523_v56 = vpop.f32.mrf.mxu3 }
  0xce   : > { %1935 = vmatmul.msk.bf16.vlgmr.msrb.gmra.mxu1 %vm337_vm0, %v1934_v48 }
  0xd0   : > { %1325 = vmatpush.bf16.xpose.msra.mxu0 %v1300_v33 }
  0xd8   : > { %1326 = vmatpush.bf16.xpose.msra.mxu0 %v1297_v57 }
  0xe0   : > { %1327 = vmatpush.bf16.xpose.msra.mxu0 %v1294_v59 }
  0xe2   : > { %v428_v10 = vpop.f32.mrf.mxu2 }
  0xe4   : > { %v377_v0 = vpop.f32.mrf.mxu0 }
  0xe5   : > { %v429_v13 = vadd.f32 %v428_v10, %v377_v0 }
  0xe7   : > { %1938 = vmatmul.msk.bf16.vlgmr.msra.gmra.mxu0 %vm337_vm0, %v1937_v52 }
  0xea   : > { %v430_v61 = vpop.f32.mrf.mxu2 }
  0xeb   : > { %v508_v62 = vpop.f32.mrf.mxu1 }
  0xec   : > { %v525_v22 = vadd.f32 %v508_v62, %v429_v13  ;;  %v379_v47 = vpop.f32.mrf.mxu0 }
  0xf3   : > { %v510_v1 = vpop.f32.mrf.mxu1  ;;  %v1352_v37 = vpop.permute.xlu0 %1351 }
  0xf4   : > { %v648_v2 = vpop.f32.mrf.mxu3 }
  0xf5   : > { %v665_v3 = vadd.f32 %v648_v2, %v525_v22 }
  0xfb   : > { %v874_v4 = vpop.f32.mrf.mxu1 }
  0xfc   : > { %v650_v5 = vpop.f32.mrf.mxu3 }
 0x103   : > { %v876_v7 = vpop.f32.mrf.mxu1 }
 0x104   : > { %v661_v8 = vpop.f32.mrf.mxu3 }
 0x105   : > { %v666_v9 = vadd.f32 %v661_v8, %v526_v45 }
 0x107   : > { %v879_v60 = vadd.f32 %v874_v4, %v666_v9 }
 0x10b   : > { %v958_v11 = vpop.f32.mrf.mxu1 }
 0x10c   : > { %v963_v50 = vadd.f32 %v958_v11, %v879_v60  ;;  %v663_v12 = vpop.f32.mrf.mxu3 }
 0x113   : > { %v960_v48 = vpop.f32.mrf.mxu1 }
 0x11b   : > { %v1104_v30 = vpop.f32.mrf.mxu1 }
 0x11c   : > { %v1109_v18 = vadd.f32 %v1104_v30, %v963_v50 }
 0x122   : > { %v861_v16 = vpop.f32.mrf.mxu2 }
 0x123   : > { %v1106_v14 = vpop.f32.mrf.mxu1  ;;  %v878_v29 = vadd.f32 %v861_v16, %v665_v3 }
 0x124   : > { %v945_v17 = vpop.f32.mrf.mxu0 }
 0x125   : > { %v962_v32 = vadd.f32 %v945_v17, %v878_v29 }
 0x12a   : > { %v863_v20 = vpop.f32.mrf.mxu2 }
 0x12c   : > { %v947_v21 = vpop.f32.mrf.mxu0 }
 0x132   : > { %v1258_v24 = vpop.f32.mrf.mxu2 }
 0x133   : > { %v1263_v31 = vadd.f32 %v1258_v24, %v1109_v18 }
 0x13a   : > { %v1260_v54 = vpop.f32.mrf.mxu2 }
 0x13c   : > { %v1091_v23 = vpop.f32.mrf.mxu3 }
 0x13d   : > { %v1108_v28 = vadd.f32 %v1091_v23, %v962_v32 }
 0x142   : > { %v1342_v63 = vpop.f32.mrf.mxu2 }
 0x143   : > { %v1347_v25 = vadd.f32 %v1342_v63, %v1263_v31 }
 0x144   : > { %v1093_v19 = vpop.f32.mrf.mxu3 }
 0x145   : > { %v1355_v38 = vadd.f32 %v1352_v37, %v1347_v25 }
 0x147   : > { %v1581_v15 = vrot.slane %v1355_v38, 7 }
 0x14a   : > { %v1344_v6 = vpop.f32.mrf.mxu2 }
 0x14b   : > { %v1245_v35 = vpop.f32.mrf.mxu1 }
 0x14c   : > { %v1262_v39 = vadd.f32 %v1245_v35, %v1108_v28 }
 0x153   : > { %v1247_v27 = vpop.f32.mrf.mxu1 }
 0x164   : > { %v1329_v51 = vpop.f32.mrf.mxu0 }
 0x165   : > { %v1346_v52 = vadd.f32 %v1329_v51, %v1262_v39 }
 0x167   : > { %v2720_v40 = vadd.f32 %v1352_v37, %v1346_v52 }
 0x169   : > { %1372 = vst.msk [vmem:[%s2722_s7] sm:$0x1] %vm1371_vm7, %v2720_v40  ;;  %v1380_v41 = vperm.slane %v2720_v40, 0  ;;  %v1583_v43 = vsel %vm1582_vm8, %v2720_v40, %v1581_v15  ;;  %v1357_v26 = vrot.slane %v2720_v40, 1  ;;  %v1361_v36 = vrot.slane %v2720_v40, 5 }
 0x16a   : > { %v1359_v42 = vrot.slane %v2720_v40, 3  ;;  %v1358_v44 = vrot.slane %v2720_v40, 2  ;;  %v1360_v45 = vrot.slane %v2720_v40, 4  ;;  %v1362_v34 = vrot.slane %v2720_v40, 6 }
 0x16b   : > { %1484 = vrot.lane.b32.xlu1 %v1380_v41, %s2176_s8  ;;  %1452 = vrot.lane.b32.xlu2 %v1380_v41, %s2177_s9  ;;  %1373 = vst.msk [vmem:[%s2722_s7 + $0x8] sm:$0x1] %vm1371_vm7, %v1357_v26  ;;  %v2744_v49 = vsel %vm1584_vm9, %v2720_v40, %v1581_v15  ;;  %v1363_v46 = vrot.slane %v2720_v40, 7  ;;  %v2751_v55 = vsel %vm1587_vm10, %v2720_v40, %v1581_v15  ;;  %v1605_v59 = vperm.slane %v1583_v43, 0 }
 0x16c   : > { %1388 = vrot.lane.b32.xlu0 %v1380_v41, %s2178_s10  ;;  %v1331_v33 = vpop.f32.mrf.mxu0  ;;  %1377 = vst.msk [vmem:[%s2722_s7 + $0x28] sm:$0x1] %vm1371_vm7, %v1361_v36  ;;  %v2756_v56 = vsel %vm1590_vm11, %v2720_v40, %v1581_v15  ;;  %v2759_v57 = vsel %vm1593_vm12, %v2720_v40, %v1581_v15  ;;  %v2766_v58 = vsel %vm1596_vm13, %v2720_v40, %v1581_v15  ;;  %v1606_v62 = vperm.slane %v1583_v43, 1 }
 0x16d   : > { %1375 = vst.msk [vmem:[%s2722_s7 + $0x18] sm:$0x1] %vm1371_vm7, %v1359_v42  ;;  %v2769_v53 = vsel %vm1599_vm14, %v2720_v40, %v1581_v15  ;;  %v2775_v10 = vsel %vm451_vm1, %v1581_v15, %v2720_v40  ;;  %v1381_v0 = vperm.slane %v1357_v26, 0  ;;  %v1383_v13 = vperm.slane %v1359_v42, 0 }
 0x16e   : > { %1374 = vst.msk [vmem:[%s2722_s7 + $0x10] sm:$0x1] %vm1371_vm7, %v1358_v44  ;;  %v1382_v22 = vperm.slane %v1358_v44, 0  ;;  %v2782_v61 = vperm.slane %v1361_v36, 0  ;;  %v1384_v1 = vperm.slane %v1360_v45, 0  ;;  %v1386_v2 = vperm.slane %v1362_v34, 0 }
 0x16f   : > { %1376 = vst.msk [vmem:[%s2722_s7 + $0x20] sm:$0x1] %vm1371_vm7, %v1360_v45  ;;  %v1387_v47 = vperm.slane %v1363_v46, 0  ;;  %v1586_v48 = vrot.slane %v2744_v49, 1  ;;  %v1589_v16 = vrot.slane %v2751_v55, 2  ;;  %v1592_v19 = vrot.slane %v2756_v56, 3 }
 0x170   : > { %1378 = vst.msk [vmem:[%s2722_s7 + $0x30] sm:$0x1] %vm1371_vm7, %v1362_v34  ;;  %v1595_v35 = vrot.slane %v2759_v57, 4  ;;  %v1598_v25 = vrot.slane %v2766_v58, 5  ;;  %v1601_v15 = vrot.slane %v2769_v53, 6 }
 0x171   : > { %1379 = vst.msk [vmem:[%s2722_s7 + $0x38] sm:$0x1] %vm1371_vm7, %v1363_v46  ;;  %v1607_v30 = vperm.slane %v1586_v48, 0  ;;  %v1609_v20 = vperm.slane %v1589_v16, 0  ;;  %v1608_v21 = vperm.slane %v1586_v48, 1  ;;  %v1610_v23 = vperm.slane %v1589_v16, 1 }
 0x172   : > { %v1612_v6 = vperm.slane %v1592_v19, 1  ;;  %v1611_v27 = vperm.slane %v1592_v19, 0  ;;  %v1613_v29 = vperm.slane %v1595_v35, 0  ;;  %v1615_v28 = vperm.slane %v1598_v25, 0 }
 0x173   : > { %1621 = vrot.lane.b32.xlu1 %v1605_v59, %s2179_s11  ;;  %1548 = vrot.lane.b32.xlu2 %v1380_v41, %s2180_s21  ;;  %v1614_v38 = vperm.slane %v1595_v35, 1  ;;  %v1616_v39 = vperm.slane %v1598_v25, 1  ;;  %v1618_v43 = vperm.slane %v1601_v15, 1  ;;  %v1617_v26 = vperm.slane %v1601_v15, 0 }
 0x174   : > { %1420 = vrot.lane.b32.xlu0 %v1380_v41, %s2181_s24 }
 0x17b   : > { %1623 = vrot.lane.b32.xlu2 %v1606_v62, %s2179_s11  ;;  %1390 = vrot.lane.b32.xlu1 %v1381_v0, %s2178_s10 }
 0x17c   : > { %1516 = vrot.lane.b32.xlu0 %v1380_v41, %s2182_s27  ;;  %v1604_v41 = vrot.slane %v2775_v10, 7 }
 0x17e   : > { %v1619_v36 = vperm.slane %v1604_v41, 0  ;;  %v1620_v33 = vperm.slane %v1604_v41, 1 }
 0x183   : > { %1394 = vrot.lane.b32.xlu2 %v1383_v13, %s2178_s10  ;;  %1392 = vrot.lane.b32.xlu1 %v1382_v22, %s2178_s10 }
 0x184   : > { %1398 = vrot.lane.b32.xlu0 %v2782_v61, %s2178_s10 }
 0x18b   : > { %1396 = vrot.lane.b32.xlu2 %v1384_v1, %s2178_s10  ;;  %1400 = vrot.lane.b32.xlu1 %v1386_v2, %s2178_s10 }
 0x18c   : > { %1426 = vrot.lane.b32.xlu0 %v1383_v13, %s2181_s24 }
 0x193   : > { %1402 = vrot.lane.b32.xlu2 %v1387_v47, %s2178_s10  ;;  %1422 = vrot.lane.b32.xlu1 %v1381_v0, %s2181_s24 }
 0x194   : > { %1432 = vrot.lane.b32.xlu0 %v1386_v2, %s2181_s24 }
 0x19b   : > { %1424 = vrot.lane.b32.xlu2 %v1382_v22, %s2181_s24  ;;  %1428 = vrot.lane.b32.xlu1 %v1384_v1, %s2181_s24 }
 0x19c   : > { %1454 = vrot.lane.b32.xlu0 %v1381_v0, %s2177_s9 }
 0x1a3   : > { %1430 = vrot.lane.b32.xlu2 %v2782_v61, %s2181_s24  ;;  %1434 = vrot.lane.b32.xlu1 %v1387_v47, %s2181_s24 }
 0x1a4   : > { %1460 = vrot.lane.b32.xlu0 %v1384_v1, %s2177_s9 }
 0x1ab   : > { %1458 = vrot.lane.b32.xlu2 %v1383_v13, %s2177_s9  ;;  %1456 = vrot.lane.b32.xlu1 %v1382_v22, %s2177_s9 }
 0x1ac   : > { %1466 = vrot.lane.b32.xlu0 %v1387_v47, %s2177_s9 }
 0x1b3   : > { %1464 = vrot.lane.b32.xlu2 %v1386_v2, %s2177_s9  ;;  %1462 = vrot.lane.b32.xlu1 %v2782_v61, %s2177_s9  ;;  %s1694_s9 = sshll.u32 %s1691_s16, 4  ;;  %s1695_s9 = int_to_ptr.hbm [resolvable:$true] %s1694_s9 }
 0x1b4   : > { %1488 = vrot.lane.b32.xlu0 %v1382_v22, %s2176_s8  ;;  %s2093_s10 = sshra.s32 %s1695_s9, 4  ;;  %s2094_s10 = int_to_ptr.hbm [resolvable:$true] %s2093_s10 }
 0x1b5   : > { %p2100_p4 = scmp.lt.s32.totalorder %s2094_s10, %s3014_s3 }
 0x1bb   : > { %1486 = vrot.lane.b32.xlu2 %v1381_v0, %s2176_s8  ;;  %1490 = vrot.lane.b32.xlu1 %v1383_v13, %s2176_s8 }
 0x1bc   : > { %1494 = vrot.lane.b32.xlu0 %v2782_v61, %s2176_s8 }
 0x1c3   : > { %1492 = vrot.lane.b32.xlu2 %v1384_v1, %s2176_s8  ;;  %1496 = vrot.lane.b32.xlu1 %v1386_v2, %s2176_s8 }
 0x1c4   : > { %1522 = vrot.lane.b32.xlu0 %v1383_v13, %s2182_s27 }
 0x1c5   : > { %v1453_v3 = vpop.permute.xlu2 %1452 }
 0x1c6   : > { %1476 = vst.msk [vmem:[%s2722_s7 + $0x3] sm:$0x1] %vm1371_vm7, %v1453_v3 }
 0x1cb   : > { %1498 = vrot.lane.b32.xlu2 %v1387_v47, %s2176_s8  ;;  %1518 = vrot.lane.b32.xlu1 %v1381_v0, %s2182_s27  ;;  %s1692_s8 = sshll.u32 %s2722_s7, 4  ;;  %s1693_s8 = int_to_ptr.vmem [resolvable:$true] %s1692_s8 }
 0x1cc   : > { %1528 = vrot.lane.b32.xlu0 %v1386_v2, %s2182_s27 }
 0x1cd   : > { %v1549_v4 = vpop.permute.xlu2 %1548 }
 0x1ce   : > { %1572 = vst.msk [vmem:[%s2722_s7 + $0x6] sm:$0x1] %vm1371_vm7, %v1549_v4 }
 0x1d3   : > { %1520 = vrot.lane.b32.xlu2 %v1382_v22, %s2182_s27  ;;  %1524 = vrot.lane.b32.xlu1 %v1384_v1, %s2182_s27 }
 0x1d4   : > { %1550 = vrot.lane.b32.xlu0 %v1381_v0, %s2180_s21 }
 0x1d5   : > { %v1624_v5 = vpop.permute.xlu2 %1623 }
 0x1db   : > { %1526 = vrot.lane.b32.xlu2 %v2782_v61, %s2182_s27  ;;  %1530 = vrot.lane.b32.xlu1 %v1387_v47, %s2182_s27  ;;  %s2099_s27 = scalar_lea.hbm %s3014_s3, 256 }
 0x1dc   : > { %1556 = vrot.lane.b32.xlu0 %v1384_v1, %s2180_s21 }
 0x1dd   : > { %v1485_v7 = vpop.permute.xlu1 %1484  ;;  %v1395_v8 = vpop.permute.xlu2 %1394 }
 0x1de   : > { %1508 = vst.msk [vmem:[%s2722_s7 + $0x4] sm:$0x1] %vm1371_vm7, %v1485_v7  ;;  %v1389_v9 = vpop.permute.xlu0 %1388 }
 0x1df   : > { %1412 = vst.msk [vmem:[%s2722_s7 + $0x1] sm:$0x1] %vm1371_vm7, %v1389_v9 }
 0x1e0   : > { %1415 = vst.msk [vmem:[%s2722_s7 + $0x19] sm:$0x1] %vm1371_vm7, %v1395_v8 }
 0x1e3   : > { %1554 = vrot.lane.b32.xlu2 %v1383_v13, %s2180_s21  ;;  %1552 = vrot.lane.b32.xlu1 %v1382_v22, %s2180_s21 }
 0x1e4   : > { %1562 = vrot.lane.b32.xlu0 %v1387_v47, %s2180_s21 }
 0x1e5   : > { %v1622_v60 = vpop.permute.xlu1 %1621  ;;  %v1397_v11 = vpop.permute.xlu2 %1396 }
 0x1e6   : > { %v1654_v50 = vsel %vm1653_vm15, %v1622_v60, %v1624_v5  ;;  %v1421_v12 = vpop.permute.xlu0 %1420  ;;  %1416 = vst.msk [vmem:[%s2722_s7 + $0x21] sm:$0x1] %vm1371_vm7, %v1397_v11 }
 0x1e7   : > { %1670 = vst.msk [vmem:[%s2722_s7 + $0x7] sm:$0x1] %vm1371_vm7, %v1654_v50 }
 0x1e8   : > { %1444 = vst.msk [vmem:[%s2722_s7 + $0x2] sm:$0x1] %vm1371_vm7, %v1421_v12 }
 0x1eb   : > { %1560 = vrot.lane.b32.xlu2 %v1386_v2, %s2180_s21  ;;  %1558 = vrot.lane.b32.xlu1 %v2782_v61, %s2180_s21 }
 0x1ec   : > { %1625 = vrot.lane.b32.xlu0 %v1607_v30, %s2179_s11 }
 0x1ed   : > { %v1403_v18 = vpop.permute.xlu2 %1402  ;;  %v1391_v14 = vpop.permute.xlu1 %1390 }
 0x1ee   : > { %v1517_v17 = vpop.permute.xlu0 %1516  ;;  %1419 = vst.msk [vmem:[%s2722_s7 + $0x39] sm:$0x1] %vm1371_vm7, %v1403_v18 }
 0x1ef   : > { %1540 = vst.msk [vmem:[%s2722_s7 + $0x5] sm:$0x1] %vm1371_vm7, %v1517_v17 }
 0x1f0   : > { %1413 = vst.msk [vmem:[%s2722_s7 + $0x9] sm:$0x1] %vm1371_vm7, %v1391_v14 }
 0x1f3   : > { %1629 = vrot.lane.b32.xlu2 %v1609_v20, %s2179_s11  ;;  %1627 = vrot.lane.b32.xlu1 %v1608_v21, %s2179_s11 }
 0x1f4   : > { %1631 = vrot.lane.b32.xlu0 %v1610_v23, %s2179_s11 }
 0x1f5   : > { %v1425_v24 = vpop.permute.xlu2 %1424  ;;  %v1393_v54 = vpop.permute.xlu1 %1392 }
 0x1f6   : > { %v1399_v63 = vpop.permute.xlu0 %1398  ;;  %1446 = vst.msk [vmem:[%s2722_s7 + $0x12] sm:$0x1] %vm1371_vm7, %v1425_v24 }
 0x1f7   : > { %1417 = vst.msk [vmem:[%s2722_s7 + $0x29] sm:$0x1] %vm1371_vm7, %v1399_v63 }
 0x1f8   : > { %1414 = vst.msk [vmem:[%s2722_s7 + $0x11] sm:$0x1] %vm1371_vm7, %v1393_v54 }
 0x1fb   : > { %1635 = vrot.lane.b32.xlu2 %v1612_v6, %s2179_s11  ;;  %1633 = vrot.lane.b32.xlu1 %v1611_v27, %s2179_s11 }
 0x1fc   : > { %1637 = vrot.lane.b32.xlu0 %v1613_v29, %s2179_s11 }
 0x1fd   : > { %v1431_v31 = vpop.permute.xlu2 %1430  ;;  %v1401_v32 = vpop.permute.xlu1 %1400 }
 0x1fe   : > { %v1427_v37 = vpop.permute.xlu0 %1426  ;;  %1449 = vst.msk [vmem:[%s2722_s7 + $0x2a] sm:$0x1] %vm1371_vm7, %v1431_v31 }
 0x1ff   : > { %1447 = vst.msk [vmem:[%s2722_s7 + $0x1a] sm:$0x1] %vm1371_vm7, %v1427_v37 }
 0x200   : > { %1418 = vst.msk [vmem:[%s2722_s7 + $0x31] sm:$0x1] %vm1371_vm7, %v1401_v32 }
 0x203   : > { %1641 = vrot.lane.b32.xlu2 %v1615_v28, %s2179_s11  ;;  %1639 = vrot.lane.b32.xlu1 %v1614_v38, %s2179_s11 }
 0x204   : > { %1643 = vrot.lane.b32.xlu0 %v1616_v39, %s2179_s11 }
 0x205   : > { %v1459_v51 = vpop.permute.xlu2 %1458  ;;  %v1423_v52 = vpop.permute.xlu1 %1422 }
 0x206   : > { %v1433_v40 = vpop.permute.xlu0 %1432  ;;  %1479 = vst.msk [vmem:[%s2722_s7 + $0x1b] sm:$0x1] %vm1371_vm7, %v1459_v51 }
 0x207   : > { %1450 = vst.msk [vmem:[%s2722_s7 + $0x32] sm:$0x1] %vm1371_vm7, %v1433_v40 }
 0x208   : > { %1445 = vst.msk [vmem:[%s2722_s7 + $0xa] sm:$0x1] %vm1371_vm7, %v1423_v52 }
 0x20b   : > { %1647 = vrot.lane.b32.xlu2 %v1618_v43, %s2179_s11  ;;  %1645 = vrot.lane.b32.xlu1 %v1617_v26, %s2179_s11 }
 0x20c   : > { %1649 = vrot.lane.b32.xlu0 %v1619_v36, %s2179_s11 }
 0x20d   : > { %v1465_v42 = vpop.permute.xlu2 %1464  ;;  %v1429_v44 = vpop.permute.xlu1 %1428 }
 0x20e   : > { %1482 = vst.msk [vmem:[%s2722_s7 + $0x33] sm:$0x1] %vm1371_vm7, %v1465_v42  ;;  %v1455_v45 = vpop.permute.xlu0 %1454 }
 0x20f   : > { %1477 = vst.msk [vmem:[%s2722_s7 + $0xb] sm:$0x1] %vm1371_vm7, %v1455_v45 }
 0x210   : > { %1448 = vst.msk [vmem:[%s2722_s7 + $0x22] sm:$0x1] %vm1371_vm7, %v1429_v44 }
 0x213   : > { %1651 = vrot.lane.b32.xlu1 %v1620_v33, %s2179_s11  ;;  %s2095_s11 = scalar_lea.hbm %s2094_s10, 64 }
 0x214   : > { %p2096_p0 = scmp.ne.s32.totalorder %s2094_s10, %s2095_s11  ;;  %p2101_p5 = scmp.lt.s32.totalorder %s2099_s27, %s2095_s11 }
 0x215   : > { %v1487_v34 = vpop.permute.xlu2 %1486  ;;  %v1435_v49 = vpop.permute.xlu1 %1434 }
 0x216   : > { %1509 = vst.msk [vmem:[%s2722_s7 + $0xc] sm:$0x1] %vm1371_vm7, %v1487_v34  ;;  %v1461_v46 = vpop.permute.xlu0 %1460  ;;  %p2097_p1 = pnand %p2096_p0, %p2257_p3  ;;  %p2102_p6 = por %p2101_p5, %p2100_p4 }
 0x217   : > { %1480 = vst.msk [vmem:[%s2722_s7 + $0x23] sm:$0x1] %vm1371_vm7, %v1461_v46 }
 0x218   : > { %1451 = vst.msk [vmem:[%s2722_s7 + $0x3a] sm:$0x1] %vm1371_vm7, %v1435_v49  ;;  %p2098_p2 = pneg %p2097_p1 }
 0x21a   : > { %p2103_p7 = pnand %p2102_p6, %p2098_p2 }
 0x21d   : > { %v1493_v55 = vpop.permute.xlu2 %1492  ;;  %v1457_v56 = vpop.permute.xlu1 %1456 }
 0x21e   : > { %1512 = vst.msk [vmem:[%s2722_s7 + $0x24] sm:$0x1] %vm1371_vm7, %v1493_v55  ;;  %v1467_v57 = vpop.permute.xlu0 %1466 }
 0x21f   : > { %1483 = vst.msk [vmem:[%s2722_s7 + $0x3b] sm:$0x1] %vm1371_vm7, %v1467_v57 }
 0x220   : > { %1478 = vst.msk [vmem:[%s2722_s7 + $0x13] sm:$0x1] %vm1371_vm7, %v1457_v56 }
 0x225   : > { %v1499_v58 = vpop.permute.xlu2 %1498  ;;  %v1463_v53 = vpop.permute.xlu1 %1462 }
 0x226   : > { %1515 = vst.msk [vmem:[%s2722_s7 + $0x3c] sm:$0x1] %vm1371_vm7, %v1499_v58  ;;  %v1489_v59 = vpop.permute.xlu0 %1488 }
 0x227   : > { %1510 = vst.msk [vmem:[%s2722_s7 + $0x14] sm:$0x1] %vm1371_vm7, %v1489_v59 }
 0x228   : > { %1481 = vst.msk [vmem:[%s2722_s7 + $0x2b] sm:$0x1] %vm1371_vm7, %v1463_v53 }
 0x22d   : > { %v1521_v10 = vpop.permute.xlu2 %1520  ;;  %v1491_v62 = vpop.permute.xlu1 %1490 }
 0x22e   : > { %1542 = vst.msk [vmem:[%s2722_s7 + $0x15] sm:$0x1] %vm1371_vm7, %v1521_v10  ;;  %v1495_v0 = vpop.permute.xlu0 %1494 }
 0x22f   : > { %1513 = vst.msk [vmem:[%s2722_s7 + $0x2c] sm:$0x1] %vm1371_vm7, %v1495_v0 }
 0x230   : > { %1511 = vst.msk [vmem:[%s2722_s7 + $0x1c] sm:$0x1] %vm1371_vm7, %v1491_v62 }
 0x235   : > { %v1527_v13 = vpop.permute.xlu2 %1526  ;;  %v1497_v22 = vpop.permute.xlu1 %1496 }
 0x236   : > { %1545 = vst.msk [vmem:[%s2722_s7 + $0x2d] sm:$0x1] %vm1371_vm7, %v1527_v13  ;;  %v1523_v61 = vpop.permute.xlu0 %1522 }
 0x237   : > { %1543 = vst.msk [vmem:[%s2722_s7 + $0x1d] sm:$0x1] %vm1371_vm7, %v1523_v61 }
 0x238   : > { %1514 = vst.msk [vmem:[%s2722_s7 + $0x34] sm:$0x1] %vm1371_vm7, %v1497_v22 }
 0x23d   : > { %v1555_v1 = vpop.permute.xlu2 %1554  ;;  %v1519_v2 = vpop.permute.xlu1 %1518 }
 0x23e   : > { %1575 = vst.msk [vmem:[%s2722_s7 + $0x1e] sm:$0x1] %vm1371_vm7, %v1555_v1  ;;  %v1529_v47 = vpop.permute.xlu0 %1528 }
 0x23f   : > { %1546 = vst.msk [vmem:[%s2722_s7 + $0x35] sm:$0x1] %vm1371_vm7, %v1529_v47 }
 0x240   : > { %1541 = vst.msk [vmem:[%s2722_s7 + $0xd] sm:$0x1] %vm1371_vm7, %v1519_v2 }
 0x245   : > { %v1561_v3 = vpop.permute.xlu2 %1560  ;;  %v1525_v4 = vpop.permute.xlu1 %1524 }
 0x246   : > { %1578 = vst.msk [vmem:[%s2722_s7 + $0x36] sm:$0x1] %vm1371_vm7, %v1561_v3  ;;  %v1551_v5 = vpop.permute.xlu0 %1550 }
 0x247   : > { %1573 = vst.msk [vmem:[%s2722_s7 + $0xe] sm:$0x1] %vm1371_vm7, %v1551_v5 }
 0x248   : > { %1544 = vst.msk [vmem:[%s2722_s7 + $0x25] sm:$0x1] %vm1371_vm7, %v1525_v4 }
 0x24d   : > { %v1531_v7 = vpop.permute.xlu1 %1530  ;;  %v1630_v12 = vpop.permute.xlu2 %1629 }
 0x24e   : > { %v1557_v8 = vpop.permute.xlu0 %1556  ;;  %1547 = vst.msk [vmem:[%s2722_s7 + $0x3d] sm:$0x1] %vm1371_vm7, %v1531_v7 }
 0x24f   : > { %1576 = vst.msk [vmem:[%s2722_s7 + $0x26] sm:$0x1] %vm1371_vm7, %v1557_v8 }
 0x255   : > { %v1553_v9 = vpop.permute.xlu1 %1552  ;;  %v1636_v16 = vpop.permute.xlu2 %1635 }
 0x256   : > { %v1563_v60 = vpop.permute.xlu0 %1562  ;;  %1574 = vst.msk [vmem:[%s2722_s7 + $0x16] sm:$0x1] %vm1371_vm7, %v1553_v9 }
 0x257   : > { %1579 = vst.msk [vmem:[%s2722_s7 + $0x3e] sm:$0x1] %vm1371_vm7, %v1563_v60 }
 0x25d   : > { %v1559_v11 = vpop.permute.xlu1 %1558  ;;  %v1642_v23 = vpop.permute.xlu2 %1641 }
 0x25e   : > { %v1626_v50 = vpop.permute.xlu0 %1625  ;;  %1577 = vst.msk [vmem:[%s2722_s7 + $0x2e] sm:$0x1] %vm1371_vm7, %v1559_v11 }
 0x265   : > { %v1628_v48 = vpop.permute.xlu1 %1627  ;;  %v1648_v35 = vpop.permute.xlu2 %1647 }
 0x266   : > { %v1632_v30 = vpop.permute.xlu0 %1631  ;;  %v1655_v18 = vsel %vm1653_vm15, %v1626_v50, %v1628_v48 }
 0x267   : > { %v1656_v14 = vsel %vm1653_vm15, %v1630_v12, %v1632_v30  ;;  %1671 = vst.msk [vmem:[%s2722_s7 + $0xf] sm:$0x1] %vm1371_vm7, %v1655_v18 }
 0x268   : > { %1672 = vst.msk [vmem:[%s2722_s7 + $0x17] sm:$0x1] %vm1371_vm7, %v1656_v14 }
 0x26d   : > { %v1634_v17 = vpop.permute.xlu1 %1633 }
 0x26e   : > { %v1638_v20 = vpop.permute.xlu0 %1637  ;;  %v1657_v21 = vsel %vm1653_vm15, %v1634_v17, %v1636_v16 }
 0x26f   : > { %1673 = vst.msk [vmem:[%s2722_s7 + $0x1f] sm:$0x1] %vm1371_vm7, %v1657_v21 }
 0x275   : > { %v1640_v24 = vpop.permute.xlu1 %1639 }
 0x276   : > { %v1644_v54 = vpop.permute.xlu0 %1643  ;;  %v1658_v19 = vsel %vm1653_vm15, %v1638_v20, %v1640_v24 }
 0x277   : > { %v1659_v63 = vsel %vm1653_vm15, %v1642_v23, %v1644_v54  ;;  %1674 = vst.msk [vmem:[%s2722_s7 + $0x27] sm:$0x1] %vm1371_vm7, %v1658_v19 }
 0x278   : > { %1675 = vst.msk [vmem:[%s2722_s7 + $0x2f] sm:$0x1] %vm1371_vm7, %v1659_v63 }
 0x27d   : > { %v1646_v6 = vpop.permute.xlu1 %1645 }
 0x27e   : > { %v1660_v27 = vsel %vm1653_vm15, %v1646_v6, %v1648_v35  ;;  %v1650_v29 = vpop.permute.xlu0 %1649 }
 0x27f   : > { %1676 = vst.msk [vmem:[%s2722_s7 + $0x37] sm:$0x1] %vm1371_vm7, %v1660_v27 }
 0x285   : > { %v1652_v31 = vpop.permute.xlu1 %1651 }
 0x286   : > { %v1661_v32 = vsel %vm1653_vm15, %v1650_v29, %v1652_v31 }
 0x287   : > { %1677 = vst.msk [vmem:[%s2722_s7 + $0x3f] sm:$0x1] %vm1371_vm7, %v1661_v32 }
 0x288   : > { %2106 = shalt.err (!%p2103_p7)
}
 0x289   : > { %s2183_s20 = smov 128   ;;  %s2184_s7 = smov 256  }
 0x28a   : > { %s2185_s4 = smov 8  }
 0x28b   : > { %1996 = dma.vmem_to_hbm [thread:$0]  (%p2257_p3), %s1693_s8, 1024, %s1695_s9, %s1679_s15, %s2183_s20, %s2184_s7, %s2185_s4  }
 0x28c PF: > { %p2002_p9 = scmp.ge.s32.totalorder %s2173_s19, 2  ;;  %s1709_s5 = sand.u32 1, %s2145_s12  }
 0x28d   : > { %s1710_s6 = scalar_lea.sflag [#allocation3], %s1709_s5 }
 0x28e   : > { %p1999_p10 = pnand %p2002_p9, %p2266_p8 }
 0x290   : > { %p2000_p11 = pneg %p1999_p10 }
 0x292   : > { %2140 = dma.done.wait (%p2000_p11), %s1710_s6, 1024  }
 0x293   : > { %2142 = vsyncadd (%p2000_p11), %s1710_s6, 4294966272  ;;  %s16_s19 = sadd.s32 1, %s2173_s19   ;;  %s3017_s12 = smov %s2149_s13 }
 0x294   : > { %p13_p12 = scmp.ge.s32.totalorder %s16_s19, 6   ;;  %s3018_s13 = smov %s2153_s14 }
 0x295   : > { %s3019_s14 = smov %s2275_s30  ;;  %s3020_s15 = smov %s2165_s17 }
 0x296   : > { %s3021_s16 = smov %s2169_s18  ;;  %s3022_s17 = smov %s3025_s22 }
 0x297   : > { %s3023_s18 = smov %s3029_s23  ;;  %15 = sbr.rel (!%p13_p12) target bundleno = 5 (0x5), region = 75 }
 0x29c   :  { %1716 = vsyncpa [#allocation3], 1 }
 0x29d   :  { %1718 = vsyncpa [#allocation3 + $0x1], 1 }

// kernel: tpu_custom_call.1
= control target key start
LH: loop header
LB: loop body
LE: loop exit
PB: predicated region body
PF: predicated region fallthrough
CT: control target
= control target key end

     0   :  { %8 = vsyncpa [#allocation3], 0  ;;  %s3011_s0 = inlined_call_operand.vmem [shape: bf16[2,2,180,4], index: 0, kind: input, shape index: {}]   ;;  %s3012_s1 = inlined_call_operand.vmem [shape: bf16[9,8,4], index: 1, kind: input, shape index: {}]   ;;  %s3013_s2 = inlined_call_operand.vmem [shape: f32[8,1], index: 2, kind: input, shape index: {}]   ;;  %s3014_s3 = inlined_call_operand.hbm [shape: f32[2,8,16,16], index: 3, kind: output, shape index: {}]  }
   0x1   :  { %10 = vsyncpa [#allocation3 + $0x1], 0  ;;  %s2206_s12 = smov 0   ;;  %s2208_s13 = smov 0  }
   0x2   :  { %s2210_s14 = smov 0   ;;  %s2212_s15 = smov 0  }
   0x3   :  { %s2214_s16 = smov 0   ;;  %s2216_s17 = smov 0  }
   0x4   :  { %s2218_s18 = smov 0   ;;  %s2220_s19 = smov 0  }
   0x5 LB: > { %s1779_s20 = sadd.s32 4294967295, %s2173_s19   ;;  %s1780_s21 = sadd.s32 4294967294, %s2173_s19   ;;  %s2173_s19 = sphi %s2220_s19, %s16_s19   ;;  %s2169_s18 = sphi %s2218_s18, %s3023_s18   ;;  %s2165_s17 = sphi %s2216_s17, %s3022_s17   ;;  %s2161_s16 = sphi %s2214_s16, %s3021_s16   ;;  %s2157_s15 = sphi %s2212_s15, %s3020_s15   ;;  %s2153_s14 = sphi %s2210_s14, %s3019_s14   ;;  %s2149_s13 = sphi %s2208_s13, %s3018_s13   ;;  %s2145_s12 = sphi %s2206_s12, %s3017_s12  }
   0x6   : > { %s25_s22 = sadd.s32 1, %s2165_s17  ;;  %s28_s23 = sadd.s32 1, %s2169_s18 }
   0x7   : > { %p26_p0 = scmp.ge.s32.totalorder %s25_s22, 2  ;;  %p117_p1 = scmp.ne.s32.totalorder %s2153_s14, %s2149_s13 }
   0x8   : > { %p118_p2 = scmp.eq.s32.totalorder %s1779_s20, 3  ;;  %p123_p5 = scmp.ne.s32.totalorder %s2149_s13, %s2145_s12 }
   0x9   : > { %s3025_s22 = smov (%p26_p0, %s25_s22), 0  ;;  %s3027_s23 = smov (!%p26_p0, %s28_s23), %s2169_s18 }
   0xa   : > { %s103_s24 = ssub.s32 %s2165_s17, %s3025_s22  ;;  %p2257_p3 = por %p118_p2, %p117_p1 }
   0xb   : > { %p30_p4 = scmp.ge.s32.totalorder %s3027_s23, 2  ;;  %p124_p6 = scmp.eq.s32.totalorder %s1780_s21, 3 }
   0xc   : > { %p1783_p7 = scmp.ge.s32.totalorder %s2173_s19, 1  ;;  %p160_p9 = scmp.lt.s32.totalorder %s2173_s19, 5 }
   0xd   : > { %s3029_s23 = smov (%p30_p4, %s3027_s23), 0  ;;  %p2266_p8 = por %p124_p6, %p123_p5 }
   0xe   : > { %s102_s27 = ssub.s32 %s2169_s18, %s3029_s23  ;;  %s107_s28 = sadd.s32 1, %s2153_s14 }
   0xf   : > { %s104_s29 = sor.u32 %s103_s24, %s102_s27  ;;  %p161_p10 = pnand %p1783_p7, %p160_p9 }
  0x10   : > { %p105_p11 = scmp.eq.s32.totalorder %s104_s29, 0  ;;  %p188_p12 = scmp.lt.s32.totalorder (!%p161_p10), %s2161_s16, 1 }
  0x11   : > { %164 = sbr.rel (%p161_p10) target bundleno = 652 (0x28c), region = 32  ;;  %p190_p13 = scmp.lt.s32.totalorder (!%p161_p10), %s2157_s15, 1 }
  0x12   : > { %s2275_s30 = scalar_select %p105_p11, %s2153_s14, %s107_s28  }
  0x13   : > { %s2178_s10 = smov (!%p161_p10), 110   ;;  %s2179_s11 = smov (!%p161_p10), 2  }
  0x14   : > { %s2180_s21 = smov (!%p161_p10), 20   ;;  %s2181_s24 = smov (!%p161_p10), 92  }
  0x15   : > { %s2182_s27 = smov (!%p161_p10), 38   ;;  %s1941_s28 = sshll.u32 (!%p161_p10), %s2161_s16, 4 }
  0x16   : > { %s189_s4 = scalar_select %p188_p12, %s2161_s16, 1  ;;  %vm337_vm0 = vcmask 31744   ;;  %vm451_vm1 = vcmask 1046528   ;;  %vm265_vm2 = vsmask.f32 7424  ;;  %vm886_vm4 = vcmask 1045504  }
  0x17   : > { %s191_s5 = scalar_select %p190_p13, %s2157_s15, 1  ;;  %v2314_v35 = vld [vmem:[%s3012_s1] sm:$0xf]  ;;  %v2341_v61 = vld [vmem:[%s3012_s1 + $0x4] sm:$0xf]  ;;  %vm1270_vm6 = vcmask 1044480  }
  0x18   : > { %s1995_s6 = smul.u32 46, %s189_s4  ;;  %vm736_vm3 = vsmask.f32 6400  ;;  %vm1116_vm5 = vsmask.f32 5376  ;;  %vm1371_vm7 = vcmask 122880   ;;  %s1689_s29 = sadd.s32 %s2157_s15, %s1941_s28 }
  0x19   : > { %s1994_s7 = smul.u32 23, %s191_s5  ;;  %vm1582_vm8 = vcmask 1040384   ;;  %vm1584_vm9 = vcmask 1041409   ;;  %vm1587_vm10 = vcmask 1042434   ;;  %vm1590_vm11 = vcmask 1043459   ;;  %s1942_s4 = sshll.u32 %s1689_s29, 3 }
  0x1a   : > { %vm1593_vm12 = vcmask 1044484   ;;  %vm1596_vm13 = vcmask 1045509   ;;  %vm1599_vm14 = vcmask 1046534   ;;  %vm1653_vm15 = vcmask 15360   ;;  %s1691_s16 = scalar_lea.hbm %s3014_s3, %s1942_s4 }
  0x1b   : > { %s194_s8 = sadd.s32 %s1995_s6, %s1994_s7 }
  0x1c   : > { %s1785_s9 = sshll.u32 %s194_s8, 2  ;;  %s2176_s8 = smov 56  }
  0x1d   : > { %s2284_s20 = scalar_lea.vmem %s3011_s0, %s1785_s9  ;;  %s2177_s9 = smov 74  }
  0x1e   : > { %v1951_v0 = vld [vmem:[%s2284_s20 + $0x38] sm:$0xff]  ;;  %v1988_v1 = vld [vmem:[%s2284_s20 + $0x40] sm:$0xf]   ;;  %v1993_v2 = vld [vmem:[%s2284_s20 + $0x40] sm:$0x70] }
  0x1f   : > { %v1989_v3 = vor.u32 %v1993_v2, %v1988_v1  ;;  %v1985_v4 = vld [vmem:[%s2284_s20 + $0x40] sm:$0xff]   ;;  %v414_v6 = vsel %vm337_vm0, %v1951_v0, 0  ;;  %v465_v9 = vrot.slane %v1951_v0, 1  ;;  %v1950_v10 = vld [vmem:[%s2284_s20 + $0x30] sm:$0xff]  ;;  %v2294_v11 = vld [vmem:[%s2284_s20 + $0x48] sm:$0xff]  ;;  %v322_v14 = vshll.u32 %v1951_v0, 16 }
  0x20   : > { %v1959_v5 = vld [vmem:[%s2284_s20 + $0x40] sm:$0xff]  ;;  %v330_v7 = vshll.u32 %v1985_v4, 16  ;;  %v334_v8 = vshrl.u32 %v1985_v4, 16  ;;  %419 = vmatpush.bf16.xpose.msra.mxu2 %v414_v6  ;;  %v467_v13 = vrot.slane %v1985_v4, 1  ;;  %v326_v15 = vshrl.u32 %v1951_v0, 16  ;;  %v2301_v22 = vld [vmem:[%s2284_s20 + $0x28] sm:$0xff] }
  0x21   : > { %v417_v12 = vsel %vm337_vm0, %v1989_v3, 0  ;;  %v605_v17 = vrot.slane %v1959_v5, 1  ;;  %v607_v18 = vrot.slane %v2294_v11, 1  ;;  %v324_v20 = vrot.slane %v322_v14, 1  ;;  %v1958_v29 = vld [vmem:[%s2284_s20 + $0x38] sm:$0xff]  ;;  %v1948_v45 = vld [vmem:[%s2284_s20 + $0x20] sm:$0xff] }
  0x22   : > { %439 = vmatpush.bf16.xpose.msra.mxu3 %v417_v12  ;;  %v332_v16 = vrot.slane %v330_v7, 1  ;;  %v468_v19 = vsel %vm451_vm1, %v465_v9, %v467_v13  ;;  %v497_v21 = vsel %vm337_vm0, %v467_v13, 0  ;;  %v314_v24 = vshll.u32 %v1950_v10, 16  ;;  %v1957_v48 = vld [vmem:[%s2284_s20 + $0x30] sm:$0xff]  ;;  %v2336_v60 = vld [vmem:[%s2284_s20 + $0x18] sm:$0xff]  ;;  %v1956_v0 = vld [vmem:[%s2284_s20 + $0x28] sm:$0xff] }
  0x23   : > { %v494_v25 = vsel %vm337_vm0, %v468_v19, 0  ;;  %v328_v26 = vor.u32 %v326_v15, %v324_v20  ;;  %v608_v27 = vsel %vm451_vm1, %v605_v17, %v607_v18  ;;  %v318_v28 = vshrl.u32 %v1950_v10, 16  ;;  %v2354_v6 = vld [vmem:[%s3012_s1 + $0x8] sm:$0xf]  ;;  %v2363_v14 = vld [vmem:[%s2284_s20 + $0x10] sm:$0xff]  ;;  %v1955_v15 = vld [vmem:[%s2284_s20 + $0x20] sm:$0xff] }
  0x24   : > { %v336_v23 = vor.u32 %v334_v8, %v332_v16  ;;  %v412_v31 = vsel %vm337_vm0, %v1950_v10, 0  ;;  %v463_v32 = vrot.slane %v1950_v10, 1  ;;  %v316_v33 = vrot.slane %v314_v24, 1 }
  0x25   : > { %v333_v34 = vsel %vm265_vm2, %v328_v26, %v332_v16  ;;  %v306_v36 = vshll.u32 %v2301_v22, 16  ;;  %v634_v38 = vsel %vm337_vm0, %v608_v27, 0  ;;  %v603_v40 = vrot.slane %v1958_v29, 1 }
  0x26   : > { %v366_v30 = vsel %vm337_vm0, %v336_v23, 0  ;;  %v363_v37 = vsel %vm337_vm0, %v333_v34, 0  ;;  %v320_v39 = vor.u32 %v318_v28, %v316_v33  ;;  %v466_v41 = vsel %vm451_vm1, %v463_v32, %v465_v9  ;;  %v2388_v34 = vld [vmem:[%s2284_s20 + $0x48] sm:$0xff] }
  0x27   : > { %388 = vmatpush.bf16.xpose.msra.mxu1 %v366_v30  ;;  %368 = vmatpush.bf16.xpose.msra.mxu0 %v363_v37  ;;  %v308_v43 = vrot.slane %v306_v36, 1  ;;  %v310_v44 = vshrl.u32 %v2301_v22, 16  ;;  %v491_v46 = vsel %vm337_vm0, %v466_v41, 0  ;;  %v606_v47 = vsel %vm451_vm1, %v603_v40, %v605_v17  ;;  %v2378_v30 = vld [vmem:[%s2284_s20 + $0x8] sm:$0xff] }
  0x28   : > { %420 = vmatpush.bf16.xpose.msra.mxu2 %v412_v31  ;;  %v325_v42 = vsel %vm265_vm2, %v320_v39, %v324_v20  ;;  %v410_v50 = vsel %vm337_vm0, %v2301_v22, 0  ;;  %v461_v51 = vrot.slane %v2301_v22, 1  ;;  %v298_v53 = vshll.u32 %v1948_v45, 16  ;;  %v2381_v31 = vld [vmem:[%s2284_s20 + $0x18] sm:$0xff] }
  0x29   : > { %1818 = vmatmul.msk.bf16.vlgmr.msra.gmra.mxu3 %vm337_vm0, %v2314_v35  ;;  %v360_v49 = vsel %vm337_vm0, %v325_v42, 0  ;;  %v312_v52 = vor.u32 %v310_v44, %v308_v43  ;;  %v631_v54 = vsel %vm337_vm0, %v606_v47, 0  ;;  %v601_v55 = vrot.slane %v1957_v48, 1  ;;  %v685_v48 = vld [vmem:[%s2284_s20 + $0x50] sm:$0x1] }
  0x2a   : > { %519 = vmatpush.bf16.xpose.msrb.mxu3 %v497_v21  ;;  %v464_v56 = vsel %vm451_vm1, %v461_v51, %v463_v32  ;;  %v300_v58 = vrot.slane %v298_v53, 1  ;;  %v302_v59 = vshrl.u32 %v1948_v45, 16  ;;  %v408_v2 = vsel %vm337_vm0, %v1948_v45, 0 }
  0x2b   : > { %v317_v57 = vsel %vm265_vm2, %v312_v52, %v316_v33  ;;  %v488_v62 = vsel %vm337_vm0, %v464_v56, 0  ;;  %v604_v63 = vsel %vm451_vm1, %v601_v55, %v603_v40  ;;  %v459_v3 = vrot.slane %v1948_v45, 1  ;;  %v2385_v33 = vld [vmem:[%s2284_s20 + $0x40] sm:$0xff] }
  0x2c   : > { %v357_v1 = vsel %vm337_vm0, %v317_v57, 0  ;;  %v304_v4 = vor.u32 %v302_v59, %v300_v58  ;;  %v290_v5 = vshll.u32 %v2336_v60, 16  ;;  %v628_v7 = vsel %vm337_vm0, %v604_v63, 0  ;;  %v2415_v63 = vld [vmem:[%s2284_s20 + $0x10] sm:$0xff] }
  0x2d   : > { %v599_v8 = vrot.slane %v1956_v0, 1  ;;  %v462_v9 = vsel %vm451_vm1, %v459_v3, %v461_v51  ;;  %v294_v13 = vshrl.u32 %v2336_v60, 16  ;;  %v406_v20 = vsel %vm337_vm0, %v2336_v60, 0 }
  0x2e   : > { %1816 = vmatmul.msk.bf16.vlgmr.msra.gmra.mxu1 %vm337_vm0, %v2341_v61  ;;  %v309_v10 = vsel %vm265_vm2, %v304_v4, %v308_v43  ;;  %v292_v12 = vrot.slane %v290_v5, 1  ;;  %v485_v16 = vsel %vm337_vm0, %v462_v9, 0  ;;  %v457_v21 = vrot.slane %v2336_v60, 1  ;;  %v2411_v60 = vld [vmem:[%s2284_s20 + $0x38] sm:$0xff] }
  0x2f   : > { %499 = vmatpush.bf16.xpose.msrb.mxu1 %v494_v25  ;;  %369 = vmatpush.bf16.xpose.msra.mxu0 %v360_v49  ;;  %v602_v17 = vsel %vm451_vm1, %v599_v8, %v601_v55  ;;  %v354_v19 = vsel %vm337_vm0, %v309_v10, 0  ;;  %v282_v23 = vshll.u32 %v2363_v14, 16  ;;  %v597_v25 = vrot.slane %v1955_v15, 1  ;;  %v1978_v55 = vld [vmem:[%s2284_s20] sm:$0xff]  }
  0x30   : > { %421 = vmatpush.bf16.xpose.msra.mxu2 %v410_v50  ;;  %v296_v22 = vor.u32 %v294_v13, %v292_v12  ;;  %v625_v24 = vsel %vm337_vm0, %v602_v17, 0  ;;  %v460_v26 = vsel %vm451_vm1, %v457_v21, %v459_v3  ;;  %v286_v29 = vshrl.u32 %v2363_v14, 16 }
  0x31   : > { %v284_v28 = vrot.slane %v282_v23, 1  ;;  %v600_v32 = vsel %vm451_vm1, %v597_v25, %v599_v8  ;;  %v482_v36 = vsel %vm337_vm0, %v460_v26, 0  ;;  %v455_v39 = vrot.slane %v2363_v14, 1  ;;  %v1991_v8 = vld [vmem:[%s2284_s20] sm:$0xe] }
  0x32   : > { %639 = vmatpush.bf16.xpose.msra.mxu3 %v634_v38  ;;  %v301_v27 = vsel %vm265_vm2, %v296_v22, %v300_v58  ;;  %v404_v38 = vsel %vm337_vm0, %v2363_v14, 0  ;;  %v622_v40 = vsel %vm337_vm0, %v600_v32, 0  ;;  %v595_v42 = vrot.slane %v2381_v31, 1  ;;  %v2439_v32 = vld [vmem:[%s2284_s20 + $0x30] sm:$0xff] }
  0x33   : > { %v351_v37 = vsel %vm337_vm0, %v301_v27, 0  ;;  %v288_v41 = vor.u32 %v286_v29, %v284_v28  ;;  %v274_v43 = vshll.u32 %v2378_v30, 16  ;;  %v800_v44 = vshrl.u32 %v2385_v33, 16 }
  0x34   : > { %v803_v45 = vshll.u32 %v2385_v33, 16  ;;  %v812_v47 = vshll.u32 %v2388_v34, 16  ;;  %v458_v49 = vsel %vm451_vm1, %v455_v39, %v457_v21  ;;  %v278_v50 = vshrl.u32 %v2378_v30, 16 }
  0x35   : > { %v293_v51 = vsel %vm265_vm2, %v288_v41, %v292_v12  ;;  %v598_v52 = vsel %vm451_vm1, %v595_v42, %v597_v25  ;;  %v2407_v53 = vrot.slane %v274_v43, 1  ;;  %v802_v56 = vrot.slane %v800_v44, 1 }
  0x36   : > { %v805_v57 = vrot.slane %v803_v45, 2  ;;  %v814_v59 = vrot.slane %v812_v47, 2  ;;  %v348_v0 = vsel %vm337_vm0, %v293_v51, 0  ;;  %v619_v3 = vsel %vm337_vm0, %v598_v52, 0  ;;  %v2456_v51 = vld [vmem:[%s2284_s20 + $0x48] sm:$0xff]  ;;  %v2459_v52 = vld [vmem:[%s2284_s20 + $0x50] sm:$0xff] }
  0x37   : > { %500 = vmatpush.bf16.xpose.msrb.mxu1 %v491_v46  ;;  %370 = vmatpush.bf16.xpose.msra.mxu0 %v357_v1  ;;  %v809_v46 = vshrl.u32 %v2388_v34, 16  ;;  %v402_v1 = vsel %vm337_vm0, %v2378_v30, 0  ;;  %v280_v4 = vor.u32 %v278_v50, %v2407_v53  ;;  %v269_v5 = vshll.u32 %v1978_v55, 16 }
  0x38   : > { %422 = vmatpush.bf16.xpose.msra.mxu2 %v408_v2  ;;  %v453_v2 = vrot.slane %v2378_v30, 1  ;;  %v806_v10 = vor.u32 %v805_v57, %v802_v56  ;;  %v791_v13 = vshrl.u32 %v2411_v60, 16  ;;  %v794_v14 = vshll.u32 %v2411_v60, 16 }
  0x39   : > { %1821 = vmatmul.msk.bf16.vlgmr.msrb.gmra.mxu3 %vm337_vm0, %v2354_v6  ;;  %v811_v58 = vrot.slane %v809_v46, 1  ;;  %v593_v15 = vrot.slane %v2415_v63, 1  ;;  %v285_v21 = vsel %vm265_vm2, %v280_v4, %v284_v28  ;;  %v267_v22 = vshrl.u32 %v1978_v55, 16 }
  0x3a   : > { %640 = vmatpush.bf16.xpose.msra.mxu3 %v631_v54  ;;  %v725_v54 = vunpack.c.l.b16 %v685_v48  ;;  %v271_v23 = vrot.slane %v269_v5, 1  ;;  %v793_v26 = vrot.slane %v791_v13, 1  ;;  %v796_v27 = vrot.slane %v794_v14, 2  ;;  %v2491_v13 = vld [vmem:[%s2284_s20 + $0x40] sm:$0xff] }
  0x3b   : > { %v815_v12 = vor.u32 %v814_v59, %v811_v58  ;;  %v596_v30 = vsel %vm451_vm1, %v593_v15, %v595_v42  ;;  %v900_v43 = vrot.slane %v2385_v33, 2  ;;  %v902_v42 = vrot.slane %v2388_v34, 2  ;;  %v2464_v58 = vld [vmem:[%s2284_s20 + $0x28] sm:$0xff] }
  0x3c   : > { %v2425_v9 = vpack.c.b16 %v725_v54, %v725_v54  ;;  %v616_v41 = vsel %vm337_vm0, %v596_v30, 0  ;;  %v797_v44 = vor.u32 %v796_v27, %v793_v26  ;;  %v782_v46 = vshrl.u32 %v2439_v32, 16  ;;  %v2514_v30 = vld [vmem:[%s2284_s20 + $0x38] sm:$0xff] }
  0x3d   : > { %v816_v25 = vsel %vm736_vm3, %v806_v10, %v815_v12  ;;  %v785_v47 = vshll.u32 %v2439_v32, 16  ;;  %v1048_v4 = vrot.slane %v2459_v52, 2  ;;  %v637_v5 = vsel %vm337_vm0, %v607_v18, 0 }
  0x3e   : > { %v807_v50 = vsel %vm736_vm3, %v797_v44, %v806_v10  ;;  %v784_v56 = vrot.slane %v782_v46, 1  ;;  %v2484_v10 = vld [vmem:[%s2284_s20 + $0x20] sm:$0xff] }
  0x3f   : > { %501 = vmatpush.bf16.xpose.msrb.mxu1 %v488_v62  ;;  %371 = vmatpush.bf16.xpose.msra.mxu0 %v354_v19  ;;  %v479_v62 = vsel %vm337_vm0, %v458_v49, 0  ;;  %v1825_v19 = vld [vmem:[%s2284_s20 + $0x8] sm:$0xe]  ;;  %v903_v49 = vsel %vm886_vm4, %v900_v43, %v902_v42  ;;  %v787_v57 = vrot.slane %v785_v47, 2  ;;  %v2532_v47 = vld [vmem:[%s3012_s1 + $0x10] sm:$0xf] }
  0x40   : > { %423 = vmatpush.bf16.xpose.msra.mxu2 %v406_v20  ;;  %v1952_v20 = vld [vmem:[%s2284_s20 + $0x8] sm:$0xf0]  ;;  %v931_v63 = vsel %vm337_vm0, %v903_v49, 0 }
  0x41   : > { %v1826_v31 = vor.u32 %v1952_v20, %v1825_v19  ;;  %v2499_v19 = vld [vmem:[%s3012_s1 + $0xc] sm:$0xf] }
  0x42   : > { %641 = vmatpush.bf16.xpose.msra.mxu3 %v628_v7  ;;  %v1990_v7 = vld [vmem:[%s2284_s20] sm:$0xf0] }
  0x43   : > { %v1992_v17 = vor.u32 %v1991_v8, %v1990_v7  ;;  %v592_v45 = vrot.slane %v1826_v31, 1  ;;  %v788_v7 = vor.u32 %v787_v57, %v784_v56  ;;  %v773_v8 = vshrl.u32 %v2464_v58, 16 }
  0x44   : > { %v1180_v56 = vshrl.u32 %v2456_v51, 16  ;;  %v1183_v57 = vshll.u32 %v2456_v51, 16 }
  0x45   : > { %v452_v28 = vrot.slane %v1992_v17, 1  ;;  %v798_v18 = vsel %vm736_vm3, %v788_v7, %v797_v44  ;;  %v775_v14 = vrot.slane %v773_v8, 1 }
  0x47   : > { %502 = vmatpush.bf16.xpose.msrb.mxu1 %v485_v16  ;;  %372 = vmatpush.bf16.xpose.msra.mxu0 %v351_v37  ;;  %v456_v16 = vsel %vm451_vm1, %v453_v2, %v455_v39  ;;  %v400_v37 = vsel %vm337_vm0, %v1978_v55, 0  ;;  %v272_v39 = vor.u32 %v271_v23, %v267_v22  ;;  %v454_v48 = vsel %vm451_vm1, %v452_v28, %v453_v2 }
  0x48   : > { %424 = vmatpush.bf16.xpose.msra.mxu2 %v404_v38  ;;  %v476_v29 = vsel %vm337_vm0, %v456_v16, 0  ;;  %v847_v38 = vsel %vm337_vm0, %v816_v25, 0  ;;  %v473_v54 = vsel %vm337_vm0, %v454_v48, 0  ;;  %v594_v55 = vsel %vm451_vm1, %v592_v45, %v593_v15 }
  0x49   : > { %v277_v33 = vsel %vm265_vm2, %v272_v39, %v2407_v53  ;;  %v898_v2 = vrot.slane %v2411_v60, 2  ;;  %v764_v22 = vshrl.u32 %v2484_v10, 16  ;;  %v767_v23 = vshll.u32 %v2484_v10, 16 }
  0x4a   : > { %642 = vmatpush.bf16.xpose.msra.mxu3 %v625_v24  ;;  %v818_v24 = vshll.u32 %v2425_v9, 16  ;;  %v342_v53 = vsel %vm337_vm0, %v277_v33, 0  ;;  %v841_v25 = vsel %vm337_vm0, %v798_v18, 0  ;;  %v894_v39 = vrot.slane %v2464_v58, 2 }
  0x4b   : > { %v901_v11 = vsel %vm886_vm4, %v898_v2, %v900_v43  ;;  %v766_v31 = vrot.slane %v764_v22, 1 }
  0x4c   : > { %v928_v20 = vsel %vm337_vm0, %v901_v11, 0  ;;  %v1182_v11 = vrot.slane %v1180_v56, 2 }
  0x4f   : > { %503 = vmatpush.bf16.xpose.msrb.mxu1 %v482_v36  ;;  %373 = vmatpush.bf16.xpose.msra.mxu0 %v348_v0  ;;  %v345_v36 = vsel %vm337_vm0, %v285_v21, 0  ;;  %v844_v0 = vsel %vm337_vm0, %v807_v50, 0  ;;  %v896_v21 = vrot.slane %v2439_v32, 2  ;;  %v769_v32 = vrot.slane %v767_v23, 2  ;;  %v2538_v50 = vld [vmem:[%s2284_s20 + $0x10] sm:$0xff] }
  0x50   : > { %425 = vmatpush.bf16.xpose.msra.mxu2 %v402_v1  ;;  %v613_v1 = vsel %vm337_vm0, %v594_v55, 0 }
  0x51   : > { %v897_v48 = vsel %vm886_vm4, %v894_v39, %v896_v21 }
  0x52   : > { %643 = vmatpush.bf16.xpose.msra.mxu3 %v622_v40  ;;  %v820_v40 = vrot.slane %v818_v24, 2 }
  0x54   : > { %v821_v34 = vsel %vm736_vm3, %v815_v12, %v820_v40  ;;  %v1042_v40 = vrot.slane %v2514_v30, 2 }
  0x55   : > { %v850_v59 = vsel %vm337_vm0, %v821_v34, 0 }
  0x57   : > { %504 = vmatpush.bf16.xpose.msrb.mxu1 %v479_v62  ;;  %374 = vmatpush.bf16.xpose.msra.mxu0 %v345_v36  ;;  %v904_v62 = vrot.slane %v2425_v9, 2  ;;  %v776_v9 = vshll.u32 %v2464_v58, 16  ;;  %v2517_v36 = vld [vmem:[%s2284_s20 + $0x18] sm:$0xff]  ;;  %v1189_v58 = vshrl.u32 %v2459_v52, 16 }
  0x58   : > { %426 = vmatpush.bf16.xpose.msra.mxu2 %v400_v37  ;;  %v755_v43 = vshrl.u32 %v2517_v36, 16  ;;  %v758_v45 = vshll.u32 %v2517_v36, 16 }
  0x59   : > { %v905_v60 = vsel %vm886_vm4, %v902_v42, %v904_v62  ;;  %v778_v15 = vrot.slane %v776_v9, 2  ;;  %v667_v62 = vld [vmem:[%s2284_s20 + $0x8] sm:$0xe]  ;;  %v1191_v18 = vrot.slane %v1189_v58, 2 }
  0x5a   : > { %644 = vmatpush.bf16.xpose.msra.mxu3 %v619_v3  ;;  %v1046_v3 = vrot.slane %v2456_v51, 2  ;;  %v934_v16 = vsel %vm337_vm0, %v905_v60, 0  ;;  %v757_v49 = vrot.slane %v755_v43, 1  ;;  %v760_v55 = vrot.slane %v758_v45, 2 }
  0x5b   : > { %v779_v26 = vor.u32 %v778_v15, %v775_v14  ;;  %v707_v60 = vunpack.c.l.b16 %v667_v62  ;;  %v2566_v15 = vld [vmem:[%s2284_s20 + $0x28] sm:$0xff] }
  0x5c   : > { %v1049_v12 = vsel %vm886_vm4, %v1046_v3, %v1048_v4  ;;  %v761_v9 = vor.u32 %v760_v55, %v757_v49  ;;  %v1162_v49 = vshrl.u32 %v2514_v30, 16  ;;  %v1165_v55 = vshll.u32 %v2514_v30, 16 }
  0x5d   : > { %v1077_v24 = vsel %vm337_vm0, %v1049_v12, 0  ;;  %v789_v37 = vsel %vm736_vm3, %v779_v26, %v788_v7  ;;  %v1110_v7 = vld [vmem:[%s2284_s20 + $0x58] sm:$0x3]  ;;  %v1185_v12 = vrot.slane %v1183_v57, 3  ;;  %v880_v57 = vld [vmem:[%s2284_s20 + $0x8] sm:$0xc] }
  0x5e   : > { %v838_v44 = vsel %vm337_vm0, %v789_v37, 0 }
  0x5f   : > { %505 = vmatpush.bf16.xpose.msrb.mxu1 %v476_v29  ;;  %1817 = vmatmul.msk.bf16.vlgmr.msra.gmra.mxu2 %vm337_vm0, %v2314_v35  ;;  %v982_v35 = vld [vmem:[%s2284_s20 + $0x58] sm:$0x1]  ;;  %v899_v29 = vsel %vm886_vm4, %v896_v21, %v898_v2 }
  0x60   : > { %852 = vmatpush.bf16.xpose.msrb.mxu2 %v847_v38  ;;  %375 = vmatpush.bf16.xpose.msra.mxu0 %v342_v53  ;;  %v1022_v17 = vunpack.c.l.b16 %v982_v35  ;;  %v925_v28 = vsel %vm337_vm0, %v899_v29, 0  ;;  %v890_v29 = vrot.slane %v2517_v36, 2 }
  0x62   : > { %645 = vmatpush.bf16.xpose.msra.mxu3 %v616_v41  ;;  %v1032_v27 = vpack.c.b16 %v1022_v17, %v1022_v17  ;;  %v770_v41 = vor.u32 %v769_v32, %v766_v31  ;;  %v1038_v31 = vrot.slane %v2566_v15, 2 }
  0x64   : > { %v1050_v38 = vrot.slane %v1032_v27, 2  ;;  %v780_v34 = vsel %vm736_vm3, %v770_v41, %v779_v26  ;;  %v771_v23 = vsel %vm736_vm3, %v761_v9, %v770_v41 }
  0x65   : > { %v835_v2 = vsel %vm337_vm0, %v780_v34, 0  ;;  %v832_v37 = vsel %vm337_vm0, %v771_v23, 0 }
  0x66   : > { %v1051_v46 = vsel %vm886_vm4, %v1048_v4, %v1050_v38  ;;  %v746_v4 = vshrl.u32 %v2538_v50, 16 }
  0x67   : > { %506 = vmatpush.bf16.xpose.msrb.mxu1 %v473_v54  ;;  %1815 = vmatmul.msk.bf16.vlgmr.msra.gmra.mxu0 %vm337_vm0, %v2341_v61  ;;  %v2541_v54 = vld [vmem:[%s2284_s20 + $0x30] sm:$0xff]  ;;  %v1080_v53 = vsel %vm337_vm0, %v1051_v46, 0  ;;  %v2592_v46 = vld [vmem:[%s2284_s20 + $0x20] sm:$0xff] }
  0x68   : > { %936 = vmatpush.bf16.xpose.msrb.mxu0 %v931_v63  ;;  %853 = vmatpush.bf16.xpose.msrb.mxu2 %v844_v0  ;;  %v2550_v63 = vld [vmem:[%s2284_s20 + $0xc] sm:$0xf]  ;;  %v922_v0 = vsel %vm337_vm0, %v897_v48, 0  ;;  %v1040_v8 = vrot.slane %v2541_v54, 2  ;;  %v2597_v48 = vld [vmem:[%s3012_s1 + $0x14] sm:$0xf] }
  0x69   : > { %v708_v35 = vunpack.c.l.b16 %v2550_v63 }
  0x6a   : > { %646 = vmatpush.bf16.xpose.msra.mxu3 %v613_v1  ;;  %v1043_v22 = vsel %vm886_vm4, %v1040_v8, %v1042_v40 }
  0x6b   : > { %v726_v21 = vpack.c.b16 %v708_v35, %v707_v60 }
  0x6d   : > { %v741_v38 = vshll.u32 %v726_v21, 16 }
  0x6e   : > { %1820 = vmatmul.msk.bf16.vlgmr.msrb.gmra.mxu1 %vm337_vm0, %v2354_v6  ;;  %v1044_v6 = vrot.slane %v2491_v13, 2 }
  0x6f   : > { %872 = vmatpush.bf16.xpose.msra.mxu1 %v850_v59  ;;  %v1192_v59 = vshll.u32 %v2459_v52, 16  ;;  %v743_v34 = vrot.slane %v741_v38, 2 }
  0x70   : > { %937 = vmatpush.bf16.xpose.msrb.mxu0 %v928_v20  ;;  %854 = vmatpush.bf16.xpose.msrb.mxu2 %v841_v25  ;;  %v1047_v61 = vsel %vm886_vm4, %v1044_v6, %v1046_v3  ;;  %v1045_v33 = vsel %vm886_vm4, %v1042_v40, %v1044_v6  ;;  %v892_v3 = vrot.slane %v2484_v10, 2  ;;  %v1114_v10 = vunpack.c.l.b16 %v1110_v7 }
  0x71   : > { %1859 = vmatmul.msk.bf16.vlgmr.msra.gmra.mxu3 %vm337_vm0, %v2499_v19  ;;  %v1074_v42 = vsel %vm337_vm0, %v1047_v61, 0  ;;  %v1071_v1 = vsel %vm337_vm0, %v1045_v33, 0  ;;  %v1194_v14 = vrot.slane %v1192_v59, 3  ;;  %v1174_v6 = vshll.u32 %v2491_v13, 16 }
  0x72   : > { %659 = vmatpush.bf16.xpose.msrb.mxu3 %v637_v5  ;;  %v749_v5 = vshll.u32 %v2538_v50, 16  ;;  %v895_v20 = vsel %vm886_vm4, %v892_v3, %v894_v39  ;;  %v2577_v26 = vpack.c.b16 %v1114_v10, %v1114_v10  ;;  %v1068_v61 = vsel %vm337_vm0, %v1043_v22, 0  ;;  %v2617_v10 = vld [vmem:[%s2284_s20 + $0x18] sm:$0xff]  ;;  %v2624_v22 = vld [vmem:[%s2284_s20 + $0x14] sm:$0xf] }
  0x73   : > { %v2573_v25 = vor.u32 %v1194_v14, %v1191_v18  ;;  %v919_v27 = vsel %vm337_vm0, %v895_v20, 0  ;;  %v1176_v41 = vrot.slane %v1174_v6, 3  ;;  %v1167_v7 = vrot.slane %v1165_v55, 3 }
  0x74   : > { %v751_v17 = vrot.slane %v749_v5, 2  ;;  %v1198_v43 = vshrl.u32 %v2577_v26, 16  ;;  %v1201_v36 = vshll.u32 %v2577_v26, 16  ;;  %v1164_v5 = vrot.slane %v1162_v49, 2 }
  0x75   : > { %v1156_v20 = vshll.u32 %v2541_v54, 16  ;;  %v1288_v38 = vrot.slane %v2577_v26, 3  ;;  %v1282_v55 = vrot.slane %v2491_v13, 3 }
  0x76   : > { %v1200_v59 = vrot.slane %v1198_v43, 2  ;;  %v1203_v62 = vrot.slane %v1201_v36, 3  ;;  %v1168_v18 = vor.u32 %v1167_v7, %v1164_v5  ;;  %v1144_v36 = vshrl.u32 %v2566_v15, 16 }
  0x77   : > { %956 = vmatpush.bf16.xpose.msrb.mxu1 %v934_v16  ;;  %v748_v16 = vrot.slane %v746_v4, 1 }
  0x78   : > { %938 = vmatpush.bf16.xpose.msrb.mxu0 %v925_v28  ;;  %855 = vmatpush.bf16.xpose.msrb.mxu2 %v838_v44  ;;  %v738_v28 = vshrl.u32 %v726_v21, 16  ;;  %v1041_v44 = vsel %vm886_vm4, %v1038_v31, %v1040_v8  ;;  %v884_v8 = vunpack.c.l.b16 %v880_v57  ;;  %v1204_v60 = vor.u32 %v1203_v62, %v1200_v59  ;;  %v964_v21 = vld [vmem:[%s2284_s20 + $0x10] sm:$0xc] }
  0x79   : > { %v752_v32 = vor.u32 %v751_v17, %v748_v16  ;;  %v1153_v17 = vshrl.u32 %v2541_v54, 16 }
  0x7a   : > { %1082 = vmatpush.bf16.xpose.msra.mxu3 %v1077_v24  ;;  %v1186_v24 = vor.u32 %v1185_v12, %v1182_v11  ;;  %v740_v33 = vrot.slane %v738_v28, 1  ;;  %v885_v14 = vpack.c.b16 %v708_v35, %v884_v8  ;;  %v1205_v23 = vsel %vm1116_vm5, %v2573_v25, %v1204_v60 }
  0x7b   : > { %v762_v45 = vsel %vm736_vm3, %v752_v32, %v761_v9  ;;  %v1158_v28 = vrot.slane %v1156_v20, 3  ;;  %v1348_v20 = vld [vmem:[%s3013_s2] sm:$0xff] }
  0x7c   : > { %v1196_v39 = vsel %vm1116_vm5, %v1186_v24, %v2573_v25  ;;  %v744_v4 = vor.u32 %v743_v34, %v740_v33  ;;  %v887_v6 = vrot.slane %v885_v14, 2  ;;  %v1234_v25 = vsel %vm337_vm0, %v1205_v23, 0 }
  0x7d   : > { %v1231_v56 = vsel %vm337_vm0, %v1196_v39, 0  ;;  %v1899_v39 = vld [vmem:[%s3012_s1 + $0x18] sm:$0xf] }
  0x7e   : > { %1895 = vmatmul.msk.bf16.vlgmr.msra.gmra.mxu1 %vm337_vm0, %v2532_v47  ;;  %v753_v12 = vsel %vm736_vm3, %v744_v4, %v752_v32  ;;  %v1004_v32 = vunpack.c.l.b16 %v964_v21  ;;  %v1280_v4 = vrot.slane %v2514_v30, 3  ;;  %v2175_v21 = vmov 0  }
  0x7f   : > { %1102 = vmatpush.bf16.xpose.msra.mxu1 %v1080_v53  ;;  %v826_v63 = vsel %vm337_vm0, %v753_v12, 0  ;;  %v1129_v12 = vshll.u32 %v2617_v10, 16  ;;  %2078 = vset.pattern.permute.xlu0 %v2175_v21 }
  0x80   : > { %939 = vmatpush.bf16.xpose.msrb.mxu0 %v922_v0  ;;  %856 = vmatpush.bf16.xpose.msrb.mxu2 %v835_v2  ;;  %v1065_v0 = vsel %vm337_vm0, %v1041_v44, 0  ;;  %v888_v2 = vrot.slane %v2538_v50, 2  ;;  %v1283_v60 = vsel %vm1270_vm6, %v1280_v4, %v1282_v55 }
  0x81   : > { %1860 = vmatmul.msk.bf16.vlgmr.msrb.gmra.mxu3 %vm337_vm0, %v2499_v19  ;;  %v1171_v19 = vshrl.u32 %v2491_v13, 16  ;;  %v1309_v30 = vsel %vm337_vm0, %v1283_v60, 0  ;;  %1351 = vperm.xlu0 %2078, %v1348_v20  }
  0x82   : > { %1083 = vmatpush.bf16.xpose.msra.mxu3 %v1074_v42  ;;  %v893_v42 = vsel %vm886_vm4, %v890_v29, %v892_v3  ;;  %v1036_v3 = vrot.slane %v2592_v46, 2  ;;  %v891_v11 = vsel %vm886_vm4, %v888_v2, %v890_v29  ;;  %v1284_v29 = vrot.slane %v2456_v51, 3 }
  0x83   : > { %v1173_v40 = vrot.slane %v1171_v19, 2  ;;  %v916_v58 = vsel %vm337_vm0, %v893_v42, 0  ;;  %v889_v51 = vsel %vm886_vm4, %v887_v6, %v888_v2  ;;  %v1147_v42 = vshll.u32 %v2566_v15, 16 }
  0x84   : > { %v1039_v50 = vsel %vm886_vm4, %v1036_v3, %v1038_v31  ;;  %v1286_v31 = vrot.slane %v2459_v52, 3  ;;  %v1138_v2 = vshll.u32 %v2592_v46, 16 }
  0x85   : > { %v1177_v53 = vor.u32 %v1176_v41, %v1173_v40  ;;  %v1062_v19 = vsel %vm337_vm0, %v1039_v50, 0  ;;  %v1126_v50 = vshrl.u32 %v2617_v10, 16 }
  0x86   : > { %v1287_v41 = vsel %vm1270_vm6, %v1284_v29, %v1286_v31  ;;  %v1289_v44 = vsel %vm1270_vm6, %v1286_v31, %v1288_v38  ;;  %v1140_v8 = vrot.slane %v1138_v2, 3 }
  0x87   : > { %v1187_v9 = vsel %vm1116_vm5, %v1177_v53, %v1186_v24  ;;  %v913_v24 = vsel %vm337_vm0, %v891_v11, 0  ;;  %v1178_v35 = vsel %vm1116_vm5, %v1168_v18, %v1177_v53  ;;  %v1315_v34 = vsel %vm337_vm0, %v1287_v41, 0 }
  0x88   : > { %940 = vmatpush.bf16.xpose.msrb.mxu0 %v919_v27  ;;  %857 = vmatpush.bf16.xpose.msrb.mxu2 %v832_v37  ;;  %v1228_v16 = vsel %vm337_vm0, %v1187_v9, 0  ;;  %v1034_v27 = vrot.slane %v2617_v10, 2  ;;  %v1155_v37 = vrot.slane %v1153_v17, 2  ;;  %v1225_v52 = vsel %vm337_vm0, %v1178_v35, 0 }
  0x89   : > { %v1149_v53 = vrot.slane %v1147_v42, 3  ;;  %v1131_v17 = vrot.slane %v1129_v12, 3 }
  0x8a   : > { %1084 = vmatpush.bf16.xpose.msra.mxu3 %v1071_v1  ;;  %v829_v1 = vsel %vm337_vm0, %v762_v45, 0  ;;  %v1037_v40 = vsel %vm886_vm4, %v1034_v27, %v1036_v3  ;;  %v1159_v26 = vor.u32 %v1158_v28, %v1155_v37  ;;  %v910_v45 = vsel %vm337_vm0, %v889_v51, 0 }
  0x8b   : > { %v1059_v33 = vsel %vm337_vm0, %v1037_v40, 0  ;;  %v1274_v40 = vrot.slane %v2592_v46, 3 }
  0x8c   : > { %v1169_v57 = vsel %vm1116_vm5, %v1159_v26, %v1168_v18  ;;  %v1278_v18 = vrot.slane %v2541_v54, 3 }
  0x8d   : > { %v1222_v59 = vsel %vm337_vm0, %v1169_v57, 0 }
  0x8e   : > { %1898 = vmatmul.msk.bf16.vlgmr.msrb.gmra.mxu1 %vm337_vm0, %v2597_v48 }
  0x8f   : > { %1236 = vmatpush.bf16.xpose.msrb.mxu1 %v1231_v56  ;;  %v1318_v56 = vsel %vm337_vm0, %v1289_v44, 0  ;;  %v1264_v44 = vld [vmem:[%s2284_s20 + $0x10] sm:$0x8]  ;;  %s185_s20 = sand.u32 1, %s2149_s13  }
  0x90   : > { %941 = vmatpush.bf16.xpose.msrb.mxu0 %v916_v58  ;;  %858 = vmatpush.bf16.xpose.msrb.mxu2 %v829_v1  ;;  %v1146_v58 = vrot.slane %v1144_v36, 2  ;;  %v1135_v1 = vshrl.u32 %v2592_v46, 16  ;;  %s1784_s6 = sshll.u32 %s185_s20, 6  ;;  %s1679_s15 = scalar_lea.sflag [#allocation3], %s185_s20 }
  0x91   : > { %s2722_s7 = scalar_lea.vmem [#allocation2], %s1784_s6 }
  0x92   : > { %1085 = vmatpush.bf16.xpose.msra.mxu3 %v1068_v61  ;;  %v1005_v61 = vunpack.c.l.b16 %v2624_v22  ;;  %v1150_v13 = vor.u32 %v1149_v53, %v1146_v58  ;;  %v1137_v7 = vrot.slane %v1135_v1, 2 }
  0x94   : > { %v2647_v43 = vpack.c.b16 %v1005_v61, %v1004_v32  ;;  %v1160_v5 = vsel %vm1116_vm5, %v1150_v13, %v1159_v26  ;;  %v1141_v11 = vor.u32 %v1140_v8, %v1137_v7 }
  0x95   : > { %v1219_v9 = vsel %vm337_vm0, %v1160_v5, 0 }
  0x96   : > { %v1033_v49 = vrot.slane %v2647_v43, 2  ;;  %v1151_v14 = vsel %vm1116_vm5, %v1141_v11, %v1150_v13  ;;  %v1121_v35 = vshll.u32 %v2647_v43, 16 }
  0x97   : > { %1237 = vmatpush.bf16.xpose.msrb.mxu1 %v1228_v16  ;;  %v1128_v16 = vrot.slane %v1126_v50, 2  ;;  %v1216_v23 = vsel %vm337_vm0, %v1151_v14, 0 }
  0x98   : > { %942 = vmatpush.bf16.xpose.msrb.mxu0 %v913_v24  ;;  %859 = vmatpush.bf16.xpose.msrb.mxu2 %v826_v63  ;;  %v1035_v62 = vsel %vm886_vm4, %v1033_v49, %v1034_v27  ;;  %v1281_v24 = vsel %vm1270_vm6, %v1278_v18, %v1280_v4  ;;  %v1118_v63 = vshrl.u32 %v2647_v43, 16  ;;  %v1276_v27 = vrot.slane %v2566_v15, 3 }
  0x99   : > { %v1306_v6 = vsel %vm337_vm0, %v1281_v24, 0  ;;  %v1268_v49 = vunpack.c.l.b16 %v1264_v44 }
  0x9a   : > { %1086 = vmatpush.bf16.xpose.msra.mxu3 %v1065_v0  ;;  %v1285_v0 = vsel %vm1270_vm6, %v1282_v55, %v1284_v29  ;;  %v1120_v32 = vrot.slane %v1118_v63, 2  ;;  %v1279_v38 = vsel %vm1270_vm6, %v1276_v27, %v1278_v18  ;;  %v1277_v36 = vsel %vm1270_vm6, %v1274_v40, %v1276_v27 }
  0x9b   : > { %v1312_v3 = vsel %vm337_vm0, %v1285_v0, 0  ;;  %v1303_v15 = vsel %vm337_vm0, %v1279_v38, 0  ;;  %v1269_v55 = vpack.c.b16 %v1005_v61, %v1268_v49 }
  0x9d   : > { %v1271_v58 = vrot.slane %v1269_v55, 3 }
  0x9e   : > { %1933 = vmatmul.msk.bf16.vlgmr.msra.gmra.mxu1 %vm337_vm0, %v1899_v39 }
  0x9f   : > { %1238 = vmatpush.bf16.xpose.msrb.mxu1 %v1225_v52  ;;  %1894 = vmatmul.msk.bf16.vlgmr.msrb.gmra.mxu2 %vm337_vm0, %v2532_v47  ;;  %v1056_v47 = vsel %vm337_vm0, %v1035_v62, 0  ;;  %v1937_v52 = vld [vmem:[%s3012_s1 + $0x20] sm:$0xf] }
  0xa0   : > { %1256 = vmatpush.bf16.xpose.msra.mxu2 %v1234_v25  ;;  %943 = vmatpush.bf16.xpose.msrb.mxu0 %v910_v45  ;;  %v1123_v25 = vrot.slane %v1121_v35, 3 }
  0xa2   : > { %1087 = vmatpush.bf16.xpose.msra.mxu3 %v1062_v19  ;;  %v1132_v19 = vor.u32 %v1131_v17, %v1128_v16  ;;  %v1124_v51 = vor.u32 %v1123_v25, %v1120_v32 }
  0xa4   : > { %v1142_v31 = vsel %vm1116_vm5, %v1132_v19, %v1141_v11  ;;  %v1133_v43 = vsel %vm1116_vm5, %v1124_v51, %v1132_v19 }
  0xa5   : > { %v1213_v28 = vsel %vm337_vm0, %v1142_v31, 0  ;;  %v1210_v26 = vsel %vm337_vm0, %v1133_v43, 0 }
  0xa7   : > { %1239 = vmatpush.bf16.xpose.msrb.mxu1 %v1222_v59  ;;  %1897 = vmatmul.msk.bf16.vlgmr.msrb.gmra.mxu0 %vm337_vm0, %v2597_v48  ;;  %v1934_v48 = vld [vmem:[%s3012_s1 + $0x1c] sm:$0xf] }
  0xa8   : > { %1320 = vmatpush.bf16.xpose.msra.mxu0 %v1315_v34  ;;  %1340 = vmatpush.bf16.xpose.msrb.mxu2 %v1318_v56  ;;  %v1272_v34 = vrot.slane %v2617_v10, 3 }
  0xaa   : > { %1088 = vmatpush.bf16.xpose.msra.mxu3 %v1059_v33  ;;  %v1300_v33 = vsel %vm337_vm0, %v1277_v36, 0  ;;  %v1275_v46 = vsel %vm1270_vm6, %v1272_v34, %v1274_v40  ;;  %v1273_v53 = vsel %vm1270_vm6, %v1271_v58, %v1272_v34 }
  0xab   : > { %v390_v29 = vpop.f32.mrf.mxu1  ;;  %v1297_v57 = vsel %vm337_vm0, %v1275_v46, 0  ;;  %v1294_v59 = vsel %vm337_vm0, %v1273_v53, 0 }
  0xac   : > { %v441_v54 = vpop.f32.mrf.mxu3 }
  0xad   : > { %v442_v37 = vadd.f32 %v441_v54, %v390_v29 }
  0xaf   : > { %1240 = vmatpush.bf16.xpose.msrb.mxu1 %v1219_v9  ;;  %1936 = vmatmul.msk.bf16.vlgmr.msra.gmra.mxu2 %vm337_vm0, %v1934_v48 }
  0xb0   : > { %1321 = vmatpush.bf16.xpose.msra.mxu0 %v1312_v3 }
  0xb2   : > { %1089 = vmatpush.bf16.xpose.msra.mxu3 %v1056_v47 }
  0xb3   : > { %v392_v41 = vpop.f32.mrf.mxu1 }
  0xb7   : > { %1241 = vmatpush.bf16.xpose.msrb.mxu1 %v1216_v23 }
  0xb8   : > { %1322 = vmatpush.bf16.xpose.msra.mxu0 %v1309_v30 }
  0xb9   : > { %1932 = vmatmul.msk.bf16.vlgmr.msra.gmra.mxu3 %vm337_vm0, %v1899_v39  ;;  %v443_v39 = vpop.f32.mrf.mxu3 }
  0xbf   : > { %1242 = vmatpush.bf16.xpose.msrb.mxu1 %v1213_v28  ;;  %1939 = vmatmul.msk.bf16.vlgmr.msrb.gmra.mxu2 %vm337_vm0, %v1937_v52 }
  0xc0   : > { %1323 = vmatpush.bf16.xpose.msra.mxu0 %v1306_v6 }
  0xc1   : > { %v521_v42 = vpop.f32.mrf.mxu3 }
  0xc2   : > { %v526_v45 = vadd.f32 %v521_v42, %v442_v37 }
  0xc7   : > { %1243 = vmatpush.bf16.xpose.msrb.mxu1 %v1210_v26 }
  0xc8   : > { %1324 = vmatpush.bf16.xpose.msra.mxu0 %v1303_v15 }
  0xc9   : > { %v523_v56 = vpop.f32.mrf.mxu3 }
  0xce   : > { %1935 = vmatmul.msk.bf16.vlgmr.msrb.gmra.mxu1 %vm337_vm0, %v1934_v48 }
  0xd0   : > { %1325 = vmatpush.bf16.xpose.msra.mxu0 %v1300_v33 }
  0xd8   : > { %1326 = vmatpush.bf16.xpose.msra.mxu0 %v1297_v57 }
  0xe0   : > { %1327 = vmatpush.bf16.xpose.msra.mxu0 %v1294_v59 }
  0xe2   : > { %v428_v10 = vpop.f32.mrf.mxu2 }
  0xe4   : > { %v377_v0 = vpop.f32.mrf.mxu0 }
  0xe5   : > { %v429_v13 = vadd.f32 %v428_v10, %v377_v0 }
  0xe7   : > { %1938 = vmatmul.msk.bf16.vlgmr.msra.gmra.mxu0 %vm337_vm0, %v1937_v52 }
  0xea   : > { %v430_v61 = vpop.f32.mrf.mxu2 }
  0xeb   : > { %v508_v62 = vpop.f32.mrf.mxu1 }
  0xec   : > { %v525_v22 = vadd.f32 %v508_v62, %v429_v13  ;;  %v379_v47 = vpop.f32.mrf.mxu0 }
  0xf3   : > { %v510_v1 = vpop.f32.mrf.mxu1  ;;  %v1352_v37 = vpop.permute.xlu0 %1351 }
  0xf4   : > { %v648_v2 = vpop.f32.mrf.mxu3 }
  0xf5   : > { %v665_v3 = vadd.f32 %v648_v2, %v525_v22 }
  0xfb   : > { %v874_v4 = vpop.f32.mrf.mxu1 }
  0xfc   : > { %v650_v5 = vpop.f32.mrf.mxu3 }
 0x103   : > { %v876_v7 = vpop.f32.mrf.mxu1 }
 0x104   : > { %v661_v8 = vpop.f32.mrf.mxu3 }
 0x105   : > { %v666_v9 = vadd.f32 %v661_v8, %v526_v45 }
 0x107   : > { %v879_v60 = vadd.f32 %v874_v4, %v666_v9 }
 0x10b   : > { %v958_v11 = vpop.f32.mrf.mxu1 }
 0x10c   : > { %v963_v50 = vadd.f32 %v958_v11, %v879_v60  ;;  %v663_v12 = vpop.f32.mrf.mxu3 }
 0x113   : > { %v960_v48 = vpop.f32.mrf.mxu1 }
 0x11b   : > { %v1104_v30 = vpop.f32.mrf.mxu1 }
 0x11c   : > { %v1109_v18 = vadd.f32 %v1104_v30, %v963_v50 }
 0x122   : > { %v861_v16 = vpop.f32.mrf.mxu2 }
 0x123   : > { %v1106_v14 = vpop.f32.mrf.mxu1  ;;  %v878_v29 = vadd.f32 %v861_v16, %v665_v3 }
 0x124   : > { %v945_v17 = vpop.f32.mrf.mxu0 }
 0x125   : > { %v962_v32 = vadd.f32 %v945_v17, %v878_v29 }
 0x12a   : > { %v863_v20 = vpop.f32.mrf.mxu2 }
 0x12c   : > { %v947_v21 = vpop.f32.mrf.mxu0 }
 0x132   : > { %v1258_v24 = vpop.f32.mrf.mxu2 }
 0x133   : > { %v1263_v31 = vadd.f32 %v1258_v24, %v1109_v18 }
 0x13a   : > { %v1260_v54 = vpop.f32.mrf.mxu2 }
 0x13c   : > { %v1091_v23 = vpop.f32.mrf.mxu3 }
 0x13d   : > { %v1108_v28 = vadd.f32 %v1091_v23, %v962_v32 }
 0x142   : > { %v1342_v63 = vpop.f32.mrf.mxu2 }
 0x143   : > { %v1347_v25 = vadd.f32 %v1342_v63, %v1263_v31 }
 0x144   : > { %v1093_v19 = vpop.f32.mrf.mxu3 }
 0x145   : > { %v1355_v38 = vadd.f32 %v1352_v37, %v1347_v25 }
 0x147   : > { %v1581_v15 = vrot.slane %v1355_v38, 7 }
 0x14a   : > { %v1344_v6 = vpop.f32.mrf.mxu2 }
 0x14b   : > { %v1245_v35 = vpop.f32.mrf.mxu1 }
 0x14c   : > { %v1262_v39 = vadd.f32 %v1245_v35, %v1108_v28 }
 0x153   : > { %v1247_v27 = vpop.f32.mrf.mxu1 }
 0x164   : > { %v1329_v51 = vpop.f32.mrf.mxu0 }
 0x165   : > { %v1346_v52 = vadd.f32 %v1329_v51, %v1262_v39 }
 0x167   : > { %v2720_v40 = vadd.f32 %v1352_v37, %v1346_v52 }
 0x169   : > { %1372 = vst.msk [vmem:[%s2722_s7] sm:$0x1] %vm1371_vm7, %v2720_v40  ;;  %v1380_v41 = vperm.slane %v2720_v40, 0  ;;  %v1583_v43 = vsel %vm1582_vm8, %v2720_v40, %v1581_v15  ;;  %v1357_v26 = vrot.slane %v2720_v40, 1  ;;  %v1361_v36 = vrot.slane %v2720_v40, 5 }
 0x16a   : > { %v1359_v42 = vrot.slane %v2720_v40, 3  ;;  %v1358_v44 = vrot.slane %v2720_v40, 2  ;;  %v1360_v45 = vrot.slane %v2720_v40, 4  ;;  %v1362_v34 = vrot.slane %v2720_v40, 6 }
 0x16b   : > { %1484 = vrot.lane.b32.xlu1 %v1380_v41, %s2176_s8  ;;  %1452 = vrot.lane.b32.xlu2 %v1380_v41, %s2177_s9  ;;  %1373 = vst.msk [vmem:[%s2722_s7 + $0x8] sm:$0x1] %vm1371_vm7, %v1357_v26  ;;  %v2744_v49 = vsel %vm1584_vm9, %v2720_v40, %v1581_v15  ;;  %v1363_v46 = vrot.slane %v2720_v40, 7  ;;  %v2751_v55 = vsel %vm1587_vm10, %v2720_v40, %v1581_v15  ;;  %v1605_v59 = vperm.slane %v1583_v43, 0 }
 0x16c   : > { %1388 = vrot.lane.b32.xlu0 %v1380_v41, %s2178_s10  ;;  %v1331_v33 = vpop.f32.mrf.mxu0  ;;  %1377 = vst.msk [vmem:[%s2722_s7 + $0x28] sm:$0x1] %vm1371_vm7, %v1361_v36  ;;  %v2756_v56 = vsel %vm1590_vm11, %v2720_v40, %v1581_v15  ;;  %v2759_v57 = vsel %vm1593_vm12, %v2720_v40, %v1581_v15  ;;  %v2766_v58 = vsel %vm1596_vm13, %v2720_v40, %v1581_v15  ;;  %v1606_v62 = vperm.slane %v1583_v43, 1 }
 0x16d   : > { %1375 = vst.msk [vmem:[%s2722_s7 + $0x18] sm:$0x1] %vm1371_vm7, %v1359_v42  ;;  %v2769_v53 = vsel %vm1599_vm14, %v2720_v40, %v1581_v15  ;;  %v2775_v10 = vsel %vm451_vm1, %v1581_v15, %v2720_v40  ;;  %v1381_v0 = vperm.slane %v1357_v26, 0  ;;  %v1383_v13 = vperm.slane %v1359_v42, 0 }
 0x16e   : > { %1374 = vst.msk [vmem:[%s2722_s7 + $0x10] sm:$0x1] %vm1371_vm7, %v1358_v44  ;;  %v1382_v22 = vperm.slane %v1358_v44, 0  ;;  %v2782_v61 = vperm.slane %v1361_v36, 0  ;;  %v1384_v1 = vperm.slane %v1360_v45, 0  ;;  %v1386_v2 = vperm.slane %v1362_v34, 0 }
 0x16f   : > { %1376 = vst.msk [vmem:[%s2722_s7 + $0x20] sm:$0x1] %vm1371_vm7, %v1360_v45  ;;  %v1387_v47 = vperm.slane %v1363_v46, 0  ;;  %v1586_v48 = vrot.slane %v2744_v49, 1  ;;  %v1589_v16 = vrot.slane %v2751_v55, 2  ;;  %v1592_v19 = vrot.slane %v2756_v56, 3 }
 0x170   : > { %1378 = vst.msk [vmem:[%s2722_s7 + $0x30] sm:$0x1] %vm1371_vm7, %v1362_v34  ;;  %v1595_v35 = vrot.slane %v2759_v57, 4  ;;  %v1598_v25 = vrot.slane %v2766_v58, 5  ;;  %v1601_v15 = vrot.slane %v2769_v53, 6 }
 0x171   : > { %1379 = vst.msk [vmem:[%s2722_s7 + $0x38] sm:$0x1] %vm1371_vm7, %v1363_v46  ;;  %v1607_v30 = vperm.slane %v1586_v48, 0  ;;  %v1609_v20 = vperm.slane %v1589_v16, 0  ;;  %v1608_v21 = vperm.slane %v1586_v48, 1  ;;  %v1610_v23 = vperm.slane %v1589_v16, 1 }
 0x172   : > { %v1612_v6 = vperm.slane %v1592_v19, 1  ;;  %v1611_v27 = vperm.slane %v1592_v19, 0  ;;  %v1613_v29 = vperm.slane %v1595_v35, 0  ;;  %v1615_v28 = vperm.slane %v1598_v25, 0 }
 0x173   : > { %1621 = vrot.lane.b32.xlu1 %v1605_v59, %s2179_s11  ;;  %1548 = vrot.lane.b32.xlu2 %v1380_v41, %s2180_s21  ;;  %v1614_v38 = vperm.slane %v1595_v35, 1  ;;  %v1616_v39 = vperm.slane %v1598_v25, 1  ;;  %v1618_v43 = vperm.slane %v1601_v15, 1  ;;  %v1617_v26 = vperm.slane %v1601_v15, 0 }
 0x174   : > { %1420 = vrot.lane.b32.xlu0 %v1380_v41, %s2181_s24 }
 0x17b   : > { %1623 = vrot.lane.b32.xlu2 %v1606_v62, %s2179_s11  ;;  %1390 = vrot.lane.b32.xlu1 %v1381_v0, %s2178_s10 }
 0x17c   : > { %1516 = vrot.lane.b32.xlu0 %v1380_v41, %s2182_s27  ;;  %v1604_v41 = vrot.slane %v2775_v10, 7 }
 0x17e   : > { %v1619_v36 = vperm.slane %v1604_v41, 0  ;;  %v1620_v33 = vperm.slane %v1604_v41, 1 }
 0x183   : > { %1394 = vrot.lane.b32.xlu2 %v1383_v13, %s2178_s10  ;;  %1392 = vrot.lane.b32.xlu1 %v1382_v22, %s2178_s10 }
 0x184   : > { %1398 = vrot.lane.b32.xlu0 %v2782_v61, %s2178_s10 }
 0x18b   : > { %1396 = vrot.lane.b32.xlu2 %v1384_v1, %s2178_s10  ;;  %1400 = vrot.lane.b32.xlu1 %v1386_v2, %s2178_s10 }
 0x18c   : > { %1426 = vrot.lane.b32.xlu0 %v1383_v13, %s2181_s24 }
 0x193   : > { %1402 = vrot.lane.b32.xlu2 %v1387_v47, %s2178_s10  ;;  %1422 = vrot.lane.b32.xlu1 %v1381_v0, %s2181_s24 }
 0x194   : > { %1432 = vrot.lane.b32.xlu0 %v1386_v2, %s2181_s24 }
 0x19b   : > { %1424 = vrot.lane.b32.xlu2 %v1382_v22, %s2181_s24  ;;  %1428 = vrot.lane.b32.xlu1 %v1384_v1, %s2181_s24 }
 0x19c   : > { %1454 = vrot.lane.b32.xlu0 %v1381_v0, %s2177_s9 }
 0x1a3   : > { %1430 = vrot.lane.b32.xlu2 %v2782_v61, %s2181_s24  ;;  %1434 = vrot.lane.b32.xlu1 %v1387_v47, %s2181_s24 }
 0x1a4   : > { %1460 = vrot.lane.b32.xlu0 %v1384_v1, %s2177_s9 }
 0x1ab   : > { %1458 = vrot.lane.b32.xlu2 %v1383_v13, %s2177_s9  ;;  %1456 = vrot.lane.b32.xlu1 %v1382_v22, %s2177_s9 }
 0x1ac   : > { %1466 = vrot.lane.b32.xlu0 %v1387_v47, %s2177_s9 }
 0x1b3   : > { %1464 = vrot.lane.b32.xlu2 %v1386_v2, %s2177_s9  ;;  %1462 = vrot.lane.b32.xlu1 %v2782_v61, %s2177_s9  ;;  %s1694_s9 = sshll.u32 %s1691_s16, 4  ;;  %s1695_s9 = int_to_ptr.hbm [resolvable:$true] %s1694_s9 }
 0x1b4   : > { %1488 = vrot.lane.b32.xlu0 %v1382_v22, %s2176_s8  ;;  %s2093_s10 = sshra.s32 %s1695_s9, 4  ;;  %s2094_s10 = int_to_ptr.hbm [resolvable:$true] %s2093_s10 }
 0x1b5   : > { %p2100_p4 = scmp.lt.s32.totalorder %s2094_s10, %s3014_s3 }
 0x1bb   : > { %1486 = vrot.lane.b32.xlu2 %v1381_v0, %s2176_s8  ;;  %1490 = vrot.lane.b32.xlu1 %v1383_v13, %s2176_s8 }
 0x1bc   : > { %1494 = vrot.lane.b32.xlu0 %v2782_v61, %s2176_s8 }
 0x1c3   : > { %1492 = vrot.lane.b32.xlu2 %v1384_v1, %s2176_s8  ;;  %1496 = vrot.lane.b32.xlu1 %v1386_v2, %s2176_s8 }
 0x1c4   : > { %1522 = vrot.lane.b32.xlu0 %v1383_v13, %s2182_s27 }
 0x1c5   : > { %v1453_v3 = vpop.permute.xlu2 %1452 }
 0x1c6   : > { %1476 = vst.msk [vmem:[%s2722_s7 + $0x3] sm:$0x1] %vm1371_vm7, %v1453_v3 }
 0x1cb   : > { %1498 = vrot.lane.b32.xlu2 %v1387_v47, %s2176_s8  ;;  %1518 = vrot.lane.b32.xlu1 %v1381_v0, %s2182_s27  ;;  %s1692_s8 = sshll.u32 %s2722_s7, 4  ;;  %s1693_s8 = int_to_ptr.vmem [resolvable:$true] %s1692_s8 }
 0x1cc   : > { %1528 = vrot.lane.b32.xlu0 %v1386_v2, %s2182_s27 }
 0x1cd   : > { %v1549_v4 = vpop.permute.xlu2 %1548 }
 0x1ce   : > { %1572 = vst.msk [vmem:[%s2722_s7 + $0x6] sm:$0x1] %vm1371_vm7, %v1549_v4 }
 0x1d3   : > { %1520 = vrot.lane.b32.xlu2 %v1382_v22, %s2182_s27  ;;  %1524 = vrot.lane.b32.xlu1 %v1384_v1, %s2182_s27 }
 0x1d4   : > { %1550 = vrot.lane.b32.xlu0 %v1381_v0, %s2180_s21 }
 0x1d5   : > { %v1624_v5 = vpop.permute.xlu2 %1623 }
 0x1db   : > { %1526 = vrot.lane.b32.xlu2 %v2782_v61, %s2182_s27  ;;  %1530 = vrot.lane.b32.xlu1 %v1387_v47, %s2182_s27  ;;  %s2099_s27 = scalar_lea.hbm %s3014_s3, 256 }
 0x1dc   : > { %1556 = vrot.lane.b32.xlu0 %v1384_v1, %s2180_s21 }
 0x1dd   : > { %v1485_v7 = vpop.permute.xlu1 %1484  ;;  %v1395_v8 = vpop.permute.xlu2 %1394 }
 0x1de   : > { %1508 = vst.msk [vmem:[%s2722_s7 + $0x4] sm:$0x1] %vm1371_vm7, %v1485_v7  ;;  %v1389_v9 = vpop.permute.xlu0 %1388 }
 0x1df   : > { %1412 = vst.msk [vmem:[%s2722_s7 + $0x1] sm:$0x1] %vm1371_vm7, %v1389_v9 }
 0x1e0   : > { %1415 = vst.msk [vmem:[%s2722_s7 + $0x19] sm:$0x1] %vm1371_vm7, %v1395_v8 }
 0x1e3   : > { %1554 = vrot.lane.b32.xlu2 %v1383_v13, %s2180_s21  ;;  %1552 = vrot.lane.b32.xlu1 %v1382_v22, %s2180_s21 }
 0x1e4   : > { %1562 = vrot.lane.b32.xlu0 %v1387_v47, %s2180_s21 }
 0x1e5   : > { %v1622_v60 = vpop.permute.xlu1 %1621  ;;  %v1397_v11 = vpop.permute.xlu2 %1396 }
 0x1e6   : > { %v1654_v50 = vsel %vm1653_vm15, %v1622_v60, %v1624_v5  ;;  %v1421_v12 = vpop.permute.xlu0 %1420  ;;  %1416 = vst.msk [vmem:[%s2722_s7 + $0x21] sm:$0x1] %vm1371_vm7, %v1397_v11 }
 0x1e7   : > { %1670 = vst.msk [vmem:[%s2722_s7 + $0x7] sm:$0x1] %vm1371_vm7, %v1654_v50 }
 0x1e8   : > { %1444 = vst.msk [vmem:[%s2722_s7 + $0x2] sm:$0x1] %vm1371_vm7, %v1421_v12 }
 0x1eb   : > { %1560 = vrot.lane.b32.xlu2 %v1386_v2, %s2180_s21  ;;  %1558 = vrot.lane.b32.xlu1 %v2782_v61, %s2180_s21 }
 0x1ec   : > { %1625 = vrot.lane.b32.xlu0 %v1607_v30, %s2179_s11 }
 0x1ed   : > { %v1403_v18 = vpop.permute.xlu2 %1402  ;;  %v1391_v14 = vpop.permute.xlu1 %1390 }
 0x1ee   : > { %v1517_v17 = vpop.permute.xlu0 %1516  ;;  %1419 = vst.msk [vmem:[%s2722_s7 + $0x39] sm:$0x1] %vm1371_vm7, %v1403_v18 }
 0x1ef   : > { %1540 = vst.msk [vmem:[%s2722_s7 + $0x5] sm:$0x1] %vm1371_vm7, %v1517_v17 }
 0x1f0   : > { %1413 = vst.msk [vmem:[%s2722_s7 + $0x9] sm:$0x1] %vm1371_vm7, %v1391_v14 }
 0x1f3   : > { %1629 = vrot.lane.b32.xlu2 %v1609_v20, %s2179_s11  ;;  %1627 = vrot.lane.b32.xlu1 %v1608_v21, %s2179_s11 }
 0x1f4   : > { %1631 = vrot.lane.b32.xlu0 %v1610_v23, %s2179_s11 }
 0x1f5   : > { %v1425_v24 = vpop.permute.xlu2 %1424  ;;  %v1393_v54 = vpop.permute.xlu1 %1392 }
 0x1f6   : > { %v1399_v63 = vpop.permute.xlu0 %1398  ;;  %1446 = vst.msk [vmem:[%s2722_s7 + $0x12] sm:$0x1] %vm1371_vm7, %v1425_v24 }
 0x1f7   : > { %1417 = vst.msk [vmem:[%s2722_s7 + $0x29] sm:$0x1] %vm1371_vm7, %v1399_v63 }
 0x1f8   : > { %1414 = vst.msk [vmem:[%s2722_s7 + $0x11] sm:$0x1] %vm1371_vm7, %v1393_v54 }
 0x1fb   : > { %1635 = vrot.lane.b32.xlu2 %v1612_v6, %s2179_s11  ;;  %1633 = vrot.lane.b32.xlu1 %v1611_v27, %s2179_s11 }
 0x1fc   : > { %1637 = vrot.lane.b32.xlu0 %v1613_v29, %s2179_s11 }
 0x1fd   : > { %v1431_v31 = vpop.permute.xlu2 %1430  ;;  %v1401_v32 = vpop.permute.xlu1 %1400 }
 0x1fe   : > { %v1427_v37 = vpop.permute.xlu0 %1426  ;;  %1449 = vst.msk [vmem:[%s2722_s7 + $0x2a] sm:$0x1] %vm1371_vm7, %v1431_v31 }
 0x1ff   : > { %1447 = vst.msk [vmem:[%s2722_s7 + $0x1a] sm:$0x1] %vm1371_vm7, %v1427_v37 }
 0x200   : > { %1418 = vst.msk [vmem:[%s2722_s7 + $0x31] sm:$0x1] %vm1371_vm7, %v1401_v32 }
 0x203   : > { %1641 = vrot.lane.b32.xlu2 %v1615_v28, %s2179_s11  ;;  %1639 = vrot.lane.b32.xlu1 %v1614_v38, %s2179_s11 }
 0x204   : > { %1643 = vrot.lane.b32.xlu0 %v1616_v39, %s2179_s11 }
 0x205   : > { %v1459_v51 = vpop.permute.xlu2 %1458  ;;  %v1423_v52 = vpop.permute.xlu1 %1422 }
 0x206   : > { %v1433_v40 = vpop.permute.xlu0 %1432  ;;  %1479 = vst.msk [vmem:[%s2722_s7 + $0x1b] sm:$0x1] %vm1371_vm7, %v1459_v51 }
 0x207   : > { %1450 = vst.msk [vmem:[%s2722_s7 + $0x32] sm:$0x1] %vm1371_vm7, %v1433_v40 }
 0x208   : > { %1445 = vst.msk [vmem:[%s2722_s7 + $0xa] sm:$0x1] %vm1371_vm7, %v1423_v52 }
 0x20b   : > { %1647 = vrot.lane.b32.xlu2 %v1618_v43, %s2179_s11  ;;  %1645 = vrot.lane.b32.xlu1 %v1617_v26, %s2179_s11 }
 0x20c   : > { %1649 = vrot.lane.b32.xlu0 %v1619_v36, %s2179_s11 }
 0x20d   : > { %v1465_v42 = vpop.permute.xlu2 %1464  ;;  %v1429_v44 = vpop.permute.xlu1 %1428 }
 0x20e   : > { %1482 = vst.msk [vmem:[%s2722_s7 + $0x33] sm:$0x1] %vm1371_vm7, %v1465_v42  ;;  %v1455_v45 = vpop.permute.xlu0 %1454 }
 0x20f   : > { %1477 = vst.msk [vmem:[%s2722_s7 + $0xb] sm:$0x1] %vm1371_vm7, %v1455_v45 }
 0x210   : > { %1448 = vst.msk [vmem:[%s2722_s7 + $0x22] sm:$0x1] %vm1371_vm7, %v1429_v44 }
 0x213   : > { %1651 = vrot.lane.b32.xlu1 %v1620_v33, %s2179_s11  ;;  %s2095_s11 = scalar_lea.hbm %s2094_s10, 64 }
 0x214   : > { %p2096_p0 = scmp.ne.s32.totalorder %s2094_s10, %s2095_s11  ;;  %p2101_p5 = scmp.lt.s32.totalorder %s2099_s27, %s2095_s11 }
 0x215   : > { %v1487_v34 = vpop.permute.xlu2 %1486  ;;  %v1435_v49 = vpop.permute.xlu1 %1434 }
 0x216   : > { %1509 = vst.msk [vmem:[%s2722_s7 + $0xc] sm:$0x1] %vm1371_vm7, %v1487_v34  ;;  %v1461_v46 = vpop.permute.xlu0 %1460  ;;  %p2097_p1 = pnand %p2096_p0, %p2257_p3  ;;  %p2102_p6 = por %p2101_p5, %p2100_p4 }
 0x217   : > { %1480 = vst.msk [vmem:[%s2722_s7 + $0x23] sm:$0x1] %vm1371_vm7, %v1461_v46 }
 0x218   : > { %1451 = vst.msk [vmem:[%s2722_s7 + $0x3a] sm:$0x1] %vm1371_vm7, %v1435_v49  ;;  %p2098_p2 = pneg %p2097_p1 }
 0x21a   : > { %p2103_p7 = pnand %p2102_p6, %p2098_p2 }
 0x21d   : > { %v1493_v55 = vpop.permute.xlu2 %1492  ;;  %v1457_v56 = vpop.permute.xlu1 %1456 }
 0x21e   : > { %1512 = vst.msk [vmem:[%s2722_s7 + $0x24] sm:$0x1] %vm1371_vm7, %v1493_v55  ;;  %v1467_v57 = vpop.permute.xlu0 %1466 }
 0x21f   : > { %1483 = vst.msk [vmem:[%s2722_s7 + $0x3b] sm:$0x1] %vm1371_vm7, %v1467_v57 }
 0x220   : > { %1478 = vst.msk [vmem:[%s2722_s7 + $0x13] sm:$0x1] %vm1371_vm7, %v1457_v56 }
 0x225   : > { %v1499_v58 = vpop.permute.xlu2 %1498  ;;  %v1463_v53 = vpop.permute.xlu1 %1462 }
 0x226   : > { %1515 = vst.msk [vmem:[%s2722_s7 + $0x3c] sm:$0x1] %vm1371_vm7, %v1499_v58  ;;  %v1489_v59 = vpop.permute.xlu0 %1488 }
 0x227   : > { %1510 = vst.msk [vmem:[%s2722_s7 + $0x14] sm:$0x1] %vm1371_vm7, %v1489_v59 }
 0x228   : > { %1481 = vst.msk [vmem:[%s2722_s7 + $0x2b] sm:$0x1] %vm1371_vm7, %v1463_v53 }
 0x22d   : > { %v1521_v10 = vpop.permute.xlu2 %1520  ;;  %v1491_v62 = vpop.permute.xlu1 %1490 }
 0x22e   : > { %1542 = vst.msk [vmem:[%s2722_s7 + $0x15] sm:$0x1] %vm1371_vm7, %v1521_v10  ;;  %v1495_v0 = vpop.permute.xlu0 %1494 }
 0x22f   : > { %1513 = vst.msk [vmem:[%s2722_s7 + $0x2c] sm:$0x1] %vm1371_vm7, %v1495_v0 }
 0x230   : > { %1511 = vst.msk [vmem:[%s2722_s7 + $0x1c] sm:$0x1] %vm1371_vm7, %v1491_v62 }
 0x235   : > { %v1527_v13 = vpop.permute.xlu2 %1526  ;;  %v1497_v22 = vpop.permute.xlu1 %1496 }
 0x236   : > { %1545 = vst.msk [vmem:[%s2722_s7 + $0x2d] sm:$0x1] %vm1371_vm7, %v1527_v13  ;;  %v1523_v61 = vpop.permute.xlu0 %1522 }
 0x237   : > { %1543 = vst.msk [vmem:[%s2722_s7 + $0x1d] sm:$0x1] %vm1371_vm7, %v1523_v61 }
 0x238   : > { %1514 = vst.msk [vmem:[%s2722_s7 + $0x34] sm:$0x1] %vm1371_vm7, %v1497_v22 }
 0x23d   : > { %v1555_v1 = vpop.permute.xlu2 %1554  ;;  %v1519_v2 = vpop.permute.xlu1 %1518 }
 0x23e   : > { %1575 = vst.msk [vmem:[%s2722_s7 + $0x1e] sm:$0x1] %vm1371_vm7, %v1555_v1  ;;  %v1529_v47 = vpop.permute.xlu0 %1528 }
 0x23f   : > { %1546 = vst.msk [vmem:[%s2722_s7 + $0x35] sm:$0x1] %vm1371_vm7, %v1529_v47 }
 0x240   : > { %1541 = vst.msk [vmem:[%s2722_s7 + $0xd] sm:$0x1] %vm1371_vm7, %v1519_v2 }
 0x245   : > { %v1561_v3 = vpop.permute.xlu2 %1560  ;;  %v1525_v4 = vpop.permute.xlu1 %1524 }
 0x246   : > { %1578 = vst.msk [vmem:[%s2722_s7 + $0x36] sm:$0x1] %vm1371_vm7, %v1561_v3  ;;  %v1551_v5 = vpop.permute.xlu0 %1550 }
 0x247   : > { %1573 = vst.msk [vmem:[%s2722_s7 + $0xe] sm:$0x1] %vm1371_vm7, %v1551_v5 }
 0x248   : > { %1544 = vst.msk [vmem:[%s2722_s7 + $0x25] sm:$0x1] %vm1371_vm7, %v1525_v4 }
 0x24d   : > { %v1531_v7 = vpop.permute.xlu1 %1530  ;;  %v1630_v12 = vpop.permute.xlu2 %1629 }
 0x24e   : > { %v1557_v8 = vpop.permute.xlu0 %1556  ;;  %1547 = vst.msk [vmem:[%s2722_s7 + $0x3d] sm:$0x1] %vm1371_vm7, %v1531_v7 }
 0x24f   : > { %1576 = vst.msk [vmem:[%s2722_s7 + $0x26] sm:$0x1] %vm1371_vm7, %v1557_v8 }
 0x255   : > { %v1553_v9 = vpop.permute.xlu1 %1552  ;;  %v1636_v16 = vpop.permute.xlu2 %1635 }
 0x256   : > { %v1563_v60 = vpop.permute.xlu0 %1562  ;;  %1574 = vst.msk [vmem:[%s2722_s7 + $0x16] sm:$0x1] %vm1371_vm7, %v1553_v9 }
 0x257   : > { %1579 = vst.msk [vmem:[%s2722_s7 + $0x3e] sm:$0x1] %vm1371_vm7, %v1563_v60 }
 0x25d   : > { %v1559_v11 = vpop.permute.xlu1 %1558  ;;  %v1642_v23 = vpop.permute.xlu2 %1641 }
 0x25e   : > { %v1626_v50 = vpop.permute.xlu0 %1625  ;;  %1577 = vst.msk [vmem:[%s2722_s7 + $0x2e] sm:$0x1] %vm1371_vm7, %v1559_v11 }
 0x265   : > { %v1628_v48 = vpop.permute.xlu1 %1627  ;;  %v1648_v35 = vpop.permute.xlu2 %1647 }
 0x266   : > { %v1632_v30 = vpop.permute.xlu0 %1631  ;;  %v1655_v18 = vsel %vm1653_vm15, %v1626_v50, %v1628_v48 }
 0x267   : > { %v1656_v14 = vsel %vm1653_vm15, %v1630_v12, %v1632_v30  ;;  %1671 = vst.msk [vmem:[%s2722_s7 + $0xf] sm:$0x1] %vm1371_vm7, %v1655_v18 }
 0x268   : > { %1672 = vst.msk [vmem:[%s2722_s7 + $0x17] sm:$0x1] %vm1371_vm7, %v1656_v14 }
 0x26d   : > { %v1634_v17 = vpop.permute.xlu1 %1633 }
 0x26e   : > { %v1638_v20 = vpop.permute.xlu0 %1637  ;;  %v1657_v21 = vsel %vm1653_vm15, %v1634_v17, %v1636_v16 }
 0x26f   : > { %1673 = vst.msk [vmem:[%s2722_s7 + $0x1f] sm:$0x1] %vm1371_vm7, %v1657_v21 }
 0x275   : > { %v1640_v24 = vpop.permute.xlu1 %1639 }
 0x276   : > { %v1644_v54 = vpop.permute.xlu0 %1643  ;;  %v1658_v19 = vsel %vm1653_vm15, %v1638_v20, %v1640_v24 }
 0x277   : > { %v1659_v63 = vsel %vm1653_vm15, %v1642_v23, %v1644_v54  ;;  %1674 = vst.msk [vmem:[%s2722_s7 + $0x27] sm:$0x1] %vm1371_vm7, %v1658_v19 }
 0x278   : > { %1675 = vst.msk [vmem:[%s2722_s7 + $0x2f] sm:$0x1] %vm1371_vm7, %v1659_v63 }
 0x27d   : > { %v1646_v6 = vpop.permute.xlu1 %1645 }
 0x27e   : > { %v1660_v27 = vsel %vm1653_vm15, %v1646_v6, %v1648_v35  ;;  %v1650_v29 = vpop.permute.xlu0 %1649 }
 0x27f   : > { %1676 = vst.msk [vmem:[%s2722_s7 + $0x37] sm:$0x1] %vm1371_vm7, %v1660_v27 }
 0x285   : > { %v1652_v31 = vpop.permute.xlu1 %1651 }
 0x286   : > { %v1661_v32 = vsel %vm1653_vm15, %v1650_v29, %v1652_v31 }
 0x287   : > { %1677 = vst.msk [vmem:[%s2722_s7 + $0x3f] sm:$0x1] %vm1371_vm7, %v1661_v32 }
 0x288   : > { %2106 = shalt.err (!%p2103_p7)
}
 0x289   : > { %s2183_s20 = smov 128   ;;  %s2184_s7 = smov 256  }
 0x28a   : > { %s2185_s4 = smov 8  }
 0x28b   : > { %1996 = dma.vmem_to_hbm [thread:$0]  (%p2257_p3), %s1693_s8, 1024, %s1695_s9, %s1679_s15, %s2183_s20, %s2184_s7, %s2185_s4  }
 0x28c PF: > { %p2002_p9 = scmp.ge.s32.totalorder %s2173_s19, 2  ;;  %s1709_s5 = sand.u32 1, %s2145_s12  }
 0x28d   : > { %s1710_s6 = scalar_lea.sflag [#allocation3], %s1709_s5 }
 0x28e   : > { %p1999_p10 = pnand %p2002_p9, %p2266_p8 }
 0x290   : > { %p2000_p11 = pneg %p1999_p10 }
 0x292   : > { %2140 = dma.done.wait (%p2000_p11), %s1710_s6, 1024  }
 0x293   : > { %2142 = vsyncadd (%p2000_p11), %s1710_s6, 4294966272  ;;  %s16_s19 = sadd.s32 1, %s2173_s19   ;;  %s3017_s12 = smov %s2149_s13 }
 0x294   : > { %p13_p12 = scmp.ge.s32.totalorder %s16_s19, 6   ;;  %s3018_s13 = smov %s2153_s14 }
 0x295   : > { %s3019_s14 = smov %s2275_s30  ;;  %s3020_s15 = smov %s2165_s17 }
 0x296   : > { %s3021_s16 = smov %s2169_s18  ;;  %s3022_s17 = smov %s3025_s22 }
 0x297   : > { %s3023_s18 = smov %s3029_s23  ;;  %15 = sbr.rel (!%p13_p12) target bundleno = 5 (0x5), region = 75 }
 0x29c   :  { %1716 = vsyncpa [#allocation3], 1 }
 0x29d   :  { %1718 = vsyncpa [#allocation3 + $0x1], 1 }

</bundles_post_ra>
